<compile_context>
chip_gen: v7x
topology: tpu7x:2x2x1
jax: 0.10.0
libtpu: 0.0.40
codegen_flags: <defaults>
</compile_context>

<pallas_src>
import jax
import jax.numpy as jnp
from jax.experimental import pallas as pl
from jax.experimental.pallas import tpu as pltpu

LN_EPS = 1e-5          # torch.nn.LayerNorm default
LRELU_SLOPE = 0.2

# (H_in, W_in, kh, kw, sh, ph, pw) of conv layers 1..3 (width stride is 1 for
# all of them).  Layer 0 is fed by host-side im2col, layer 4 is a full-extent
# dot.  Spatial sizes are pinned by the LayerNorm shapes in the module.
_LAYER_GEOM = (
    (64, 8, 4, 3, 2, 1, 0),   # conv1: (ndf, 64, 8)   -> (2ndf, 32, 6)
    (32, 6, 4, 3, 2, 2, 0),   # conv2: (2ndf, 32, 6)  -> (4ndf, 17, 4)
    (17, 4, 8, 4, 2, 1, 1),   # conv3: (4ndf, 17, 4)  -> (8ndf, 6, 3)
)


def _out_hw(geom):
    h, w, kh, kw, sh, ph, pw = geom
    return (h + 2 * ph - kh) // sh + 1, (w + 2 * pw - kw) + 1


# ---------------------------------------------------------------------------
# In-kernel helpers (all static Python control flow; traced once)
# ---------------------------------------------------------------------------
def _layernorm_lrelu(x, gamma, beta):
    # LayerNorm over the full (C, H, W) map of one sample (biased variance, as
    # torch.nn.LayerNorm), two-pass statistics, then LeakyReLU(0.2).
    inv_n = 1.0 / x.size
    mean = jnp.sum(x) * inv_n
    xc = x - mean
    var = jnp.sum(xc * xc) * inv_n
    y = xc * jax.lax.rsqrt(var + LN_EPS) * gamma + beta
    return jnp.where(y > 0, y, LRELU_SLOPE * y)


def _store_padded(dense_ref, pad_ref, cin, geom):
    # Copy the dense (cin, H*W) map held in dense_ref[0:cin, :H*W] into
    # pad_ref[0:cin, :Hp*Wp] as a zero-padded flat (H+2ph, W+2pw) row-major map.
    h, w, kh, kw, sh, ph, pw = geom
    wp = w + 2 * pw
    plen = (h + 2 * ph) * wp
    pad_ref[0:cin, 0:plen] = jnp.zeros((cin, plen), jnp.float32)
    if pw == 0:
        pad_ref[0:cin, ph * w:ph * w + h * w] = dense_ref[0:cin, 0:h * w]
    else:
        for r in range(h):
            pad_ref[0:cin, (ph + r) * wp + pw:(ph + r) * wp + pw + w] = (
                dense_ref[0:cin, r * w:(r + 1) * w])


def _conv_decimate(pad_ref, acc_ref, dense_ref, w_ref, cin, geom):
    # Stride-(sh, 1) conv of the zero-padded flat map in pad_ref[0:cin, :Hp*Wp]
    # with taps in w_ref (layout (Cout, kh*kw*Cin), tap-major columns).
    # Writes the dense (Cout, OH*OW) result into dense_ref[0:Cout, :OH*OW].
    h, w, kh, kw, sh, ph, pw = geom
    cout = w_ref.shape[0]
    wp, hp = w + 2 * pw, h + 2 * ph
    oh, ow = _out_hw(geom)
    # Evaluate the conv at every H offset so every tap is a pure lane-shift
    # window of the flat padded map; rows are decimated by `sh` afterwards.
    span = sh * (oh - 1) * wp + ow
    assert span - 1 + (kh - 1) * wp + (kw - 1) < hp * wp
    acc = jnp.zeros((cout, span), jnp.float32)
    for i in range(kh):
        for j in range(kw):
            t = i * kw + j
            s = i * wp + j
            acc = acc + jnp.dot(w_ref[:, t * cin:(t + 1) * cin],
                                pad_ref[0:cin, s:s + span],
                                preferred_element_type=jnp.float32)
    acc_ref[0:cout, 0:span] = acc
    # Decimate: keep rows h = sh*oh and the first OW columns of each row.
    for r in range(oh):
        dense_ref[0:cout, r * ow:(r + 1) * ow] = (
            acc_ref[0:cout, sh * r * wp:sh * r * wp + ow])


# ---------------------------------------------------------------------------
# The fused kernel: one grid step == one batch sample, whole net in VMEM
# ---------------------------------------------------------------------------
def _netd_fused_kernel(p0_ref, w0_ref, w1_ref, w2_ref, w3_ref, w4_ref,
                       g0_ref, b0_ref, g1_ref, b1_ref, g2_ref, b2_ref,
                       g3_ref, b3_ref, out_ref, pad_ref, acc_ref, dense_ref):
    ndf = w0_ref.shape[0]

    # ---- layer 0: host-im2col patches -> one matmul, then LN + LeakyReLU ----
    a0 = jnp.dot(w0_ref[...], p0_ref[0], preferred_element_type=jnp.float32)
    dense_ref[0:ndf, 0:a0.shape[1]] = _layernorm_lrelu(a0, g0_ref[...],
                                                       b0_ref[...])

    # ---- layers 1..3: in-VMEM shifted-matmul conv + LN + LeakyReLU ----
    cin = ndf
    y = None
    layer_params = ((w1_ref, g1_ref, b1_ref),
                    (w2_ref, g2_ref, b2_ref),
                    (w3_ref, g3_ref, b3_ref))
    for l, (w_ref, g_ref, b_ref) in enumerate(layer_params):
        geom = _LAYER_GEOM[l]
        cout = w_ref.shape[0]
        oh, ow = _out_hw(geom)
        _store_padded(dense_ref, pad_ref, cin, geom)
        _conv_decimate(pad_ref, acc_ref, dense_ref, w_ref, cin, geom)
        y = _layernorm_lrelu(dense_ref[0:cout, 0:oh * ow], g_ref[...],
                             b_ref[...])
        dense_ref[0:cout, 0:oh * ow] = y
        cin = cout

    # ---- final conv (kernel == full remaining spatial extent) + sigmoid ----
    logit = jnp.sum(y * w4_ref[...], keepdims=True)          # (1, 1)
    out_ref[0] = 1.0 / (1.0 + jnp.exp(-logit))


# ---------------------------------------------------------------------------
# Host-side glue
# ---------------------------------------------------------------------------
def _im2col(x, kh, kw, sh, sw, ph, pw):
    """(N, C, H, W) -> (N, C*kh*kw, OH*OW) patches, K inner order (C, kh, kw)."""
    n, c, h, w = x.shape
    xpad = jnp.pad(x, ((0, 0), (0, 0), (ph, ph), (pw, pw)))
    oh = (h + 2 * ph - kh) // sh + 1
    ow = (w + 2 * pw - kw) // sw + 1
    slabs = []
    for i in range(kh):
        for j in range(kw):
            slabs.append(xpad[:, :, i:i + (oh - 1) * sh + 1:sh,
                                    j:j + (ow - 1) * sw + 1:sw])
    p = jnp.stack(slabs, axis=2)                        # (N, C, kh*kw, OH, OW)
    return p.reshape(n, c * kh * kw, oh * ow)


def _const_spec(a):
    zeros = (0,) * a.ndim
    return pl.BlockSpec(a.shape, lambda b, _z=zeros: _z)


def _scratch_sizes(ndf):
    pad_len, acc_len, dense_len = 0, 0, 64 * 8          # layer-0 dense length
    for geom in _LAYER_GEOM:
        h, w, kh, kw, sh, ph, pw = geom
        wp, hp = w + 2 * pw, h + 2 * ph
        oh, ow = _out_hw(geom)
        pad_len = max(pad_len, hp * wp)
        acc_len = max(acc_len, sh * (oh - 1) * wp + ow)
        dense_len = max(dense_len, oh * ow)
    return (4 * ndf, pad_len), (8 * ndf, acc_len), (8 * ndf, dense_len)


def netD_forward(x, convs, gammas, betas):
    n = x.shape[0]
    ndf = convs[0].shape[0]

    # Layer-0 im2col on the host: only the network INPUT is expanded (one fused
    # XLA gather); all intermediate activations stay inside the single kernel.
    patches0 = _im2col(x, 4, 4, 2, 2, 1, 1)             # (N, nc*16, 512)
    k0, p0 = patches0.shape[1], patches0.shape[2]

    def taps(wc):          # (O, I, kh, kw) -> (O, kh*kw*I), tap-major columns
        o, i, kh, kw = wc.shape
        return jnp.transpose(wc, (0, 2, 3, 1)).reshape(o, kh * kw * i)

    w0 = convs[0].reshape(ndf, k0)                      # (ndf, nc*16)
    w1, w2, w3 = taps(convs[1]), taps(convs[2]), taps(convs[3])
    w4 = convs[4].reshape(convs[4].shape[1], -1)        # (8ndf, 6*3)
    gs = [g.reshape(g.shape[0], -1) for g in gammas]
    bs = [b.reshape(b.shape[0], -1) for b in betas]

    params = (w0, w1, w2, w3, w4,
              gs[0], bs[0], gs[1], bs[1], gs[2], bs[2], gs[3], bs[3])
    pad_s, acc_s, dense_s = _scratch_sizes(ndf)

    out = pl.pallas_call(
        _netd_fused_kernel,
        out_shape=jax.ShapeDtypeStruct((n, 1, 1), jnp.float32),
        grid_spec=pltpu.PrefetchScalarGridSpec(
            num_scalar_prefetch=0,
            grid=(n,),
            in_specs=[pl.BlockSpec((1, k0, p0), lambda b: (b, 0, 0))]
                     + [_const_spec(a) for a in params],
            out_specs=pl.BlockSpec((1, 1, 1), lambda b: (b, 0, 0)),
            scratch_shapes=[pltpu.VMEM(pad_s, jnp.float32),
                            pltpu.VMEM(acc_s, jnp.float32),
                            pltpu.VMEM(dense_s, jnp.float32)],
        ),
        compiler_params=pltpu.CompilerParams(
            dimension_semantics=("parallel",)),
    )(patches0, *params)
    return out.reshape(n, 1)


# ---------------------------------------------------------------------------
# Parameters (deterministic synthetic init; matches the nn.Module shapes)
# ---------------------------------------------------------------------------
def make_params(ndf, nc, key):
    conv_shapes = [(ndf, nc, 4, 4), (ndf * 2, ndf, 4, 3),
                   (ndf * 4, ndf * 2, 4, 3), (ndf * 8, ndf * 4, 8, 4),
                   (1, ndf * 8, 6, 3)]
    ln_shapes = [(ndf, 64, 8), (ndf * 2, 32, 6), (ndf * 4, 17, 4),
                 (ndf * 8, 6, 3)]
    keys = jax.random.split(key, 13)
    convs = [0.02 * jax.random.normal(k, s, jnp.float32)
             for k, s in zip(keys[:5], conv_shapes)]
    gammas = [1.0 + 0.1 * jax.random.normal(k, s, jnp.float32)
              for k, s in zip(keys[5:9], ln_shapes)]
    betas = [0.1 * jax.random.normal(k, s, jnp.float32)
             for k, s in zip(keys[9:13], ln_shapes)]
    return convs, gammas, betas


# ---------------------------------------------------------------------------
# Pure-JAX reference (mirrors the PyTorch module) for a correctness check
# ---------------------------------------------------------------------------
def netD_reference(x, convs, gammas, betas):
    strides = [(2, 2), (2, 1), (2, 1), (2, 1), (1, 1)]
    pads = [((1, 1), (1, 1)), ((1, 1), (0, 0)), ((2, 2), (0, 0)),
            ((1, 1), (1, 1)), ((0, 0), (0, 0))]
    a = x
    for i in range(4):
        a = jax.lax.conv_general_dilated(
            a, convs[i], strides[i], pads[i],
            dimension_numbers=("NCHW", "OIHW", "NCHW"),
            precision=jax.lax.Precision.HIGHEST)
        mean = jnp.mean(a, axis=(1, 2, 3), keepdims=True)
        var = jnp.mean(jnp.square(a - mean), axis=(1, 2, 3), keepdims=True)
        a = (a - mean) * jax.lax.rsqrt(var + LN_EPS) * gammas[i][None] \
            + betas[i][None]
        a = jnp.where(a > 0, a, LRELU_SLOPE * a)
    a = jax.lax.conv_general_dilated(
        a, convs[4], (1, 1), ((0, 0), (0, 0)),
        dimension_numbers=("NCHW", "OIHW", "NCHW"),
        precision=jax.lax.Precision.HIGHEST)
    return jax.nn.sigmoid(a).reshape(-1, 1)


if __name__ == "__main__":
    # The LayerNorm shapes in __init__ pin the spatial input to 128 x 16.
    ndf, nc, batch = 4, 1, 2
    key = jax.random.PRNGKey(0)
    pkey, xkey = jax.random.split(key)
    convs, gammas, betas = make_params(ndf, nc, pkey)
    x = jax.random.normal(xkey, (batch, nc, 128, 16), jnp.float32)

    out = jax.block_until_ready(jax.jit(netD_forward)(x, convs, gammas, betas))
    ref = jax.block_until_ready(jax.jit(netD_reference)(x, convs, gammas, betas))

    assert out.shape == (batch, 1), out.shape
    assert bool(jnp.all(jnp.isfinite(out)))
    assert bool(jnp.all((out >= 0.0) & (out <= 1.0)))
    assert bool(jnp.allclose(out, ref, atol=2e-2)), (out, ref)
    print("KERNEL_OK")
</pallas_src>

<mosaic_0001>
module attributes {stable_mosaic.version = 11 : i64} {
  func.func @_netd_fused_kernel(%arg0: i32, %arg1: memref<1x16x512xf32, #tpu.memory_space<vmem>>, %arg2: memref<4x16xf32, #tpu.memory_space<vmem>>, %arg3: memref<8x48xf32, #tpu.memory_space<vmem>>, %arg4: memref<16x96xf32, #tpu.memory_space<vmem>>, %arg5: memref<32x512xf32, #tpu.memory_space<vmem>>, %arg6: memref<32x18xf32, #tpu.memory_space<vmem>>, %arg7: memref<4x512xf32, #tpu.memory_space<vmem>>, %arg8: memref<4x512xf32, #tpu.memory_space<vmem>>, %arg9: memref<8x192xf32, #tpu.memory_space<vmem>>, %arg10: memref<8x192xf32, #tpu.memory_space<vmem>>, %arg11: memref<16x68xf32, #tpu.memory_space<vmem>>, %arg12: memref<16x68xf32, #tpu.memory_space<vmem>>, %arg13: memref<32x18xf32, #tpu.memory_space<vmem>>, %arg14: memref<32x18xf32, #tpu.memory_space<vmem>>, %arg15: memref<1x1x1xf32, #tpu.memory_space<vmem>>, %arg16: memref<16x528xf32, #tpu.memory_space<vmem>>, %arg17: memref<32x502xf32, #tpu.memory_space<vmem>>, %arg18: memref<32x512xf32, #tpu.memory_space<vmem>>) attributes {dimension_semantics = [#tpu.dimension_semantics<parallel>], iteration_bounds = array<i64: 2>, scalar_prefetch = 0 : i64, scratch_operands = 3 : i64, tpu.core_type = #tpu.core_type<tc>, window_params = [{transform_indices = @transform_0, window_bounds = array<i64: 1, 16, 512>}, {pipeline_mode = #tpu.pipeline_mode<synchronous>, transform_indices = @transform_1, window_bounds = array<i64: 4, 16>}, {pipeline_mode = #tpu.pipeline_mode<synchronous>, transform_indices = @transform_2, window_bounds = array<i64: 8, 48>}, {pipeline_mode = #tpu.pipeline_mode<synchronous>, transform_indices = @transform_3, window_bounds = array<i64: 16, 96>}, {pipeline_mode = #tpu.pipeline_mode<synchronous>, transform_indices = @transform_4, window_bounds = array<i64: 32, 512>}, {pipeline_mode = #tpu.pipeline_mode<synchronous>, transform_indices = @transform_5, window_bounds = array<i64: 32, 18>}, {pipeline_mode = #tpu.pipeline_mode<synchronous>, transform_indices = @transform_6, window_bounds = array<i64: 4, 512>}, {pipeline_mode = #tpu.pipeline_mode<synchronous>, transform_indices = @transform_7, window_bounds = array<i64: 4, 512>}, {pipeline_mode = #tpu.pipeline_mode<synchronous>, transform_indices = @transform_8, window_bounds = array<i64: 8, 192>}, {pipeline_mode = #tpu.pipeline_mode<synchronous>, transform_indices = @transform_9, window_bounds = array<i64: 8, 192>}, {pipeline_mode = #tpu.pipeline_mode<synchronous>, transform_indices = @transform_10, window_bounds = array<i64: 16, 68>}, {pipeline_mode = #tpu.pipeline_mode<synchronous>, transform_indices = @transform_11, window_bounds = array<i64: 16, 68>}, {pipeline_mode = #tpu.pipeline_mode<synchronous>, transform_indices = @transform_12, window_bounds = array<i64: 32, 18>}, {pipeline_mode = #tpu.pipeline_mode<synchronous>, transform_indices = @transform_13, window_bounds = array<i64: 32, 18>}, {transform_indices = @transform_14, window_bounds = array<i64: 1, 1, 1>}]} {
    %c0 = arith.constant 0 : index
    %c0_0 = arith.constant 0 : index
    %0 = vector.load %arg2[%c0, %c0_0] : memref<4x16xf32, #tpu.memory_space<vmem>>, vector<4x16xf32>
    %c0_1 = arith.constant 0 : index
    %c0_2 = arith.constant 0 : index
    %c0_3 = arith.constant 0 : index
    %1 = vector.load %arg1[%c0_1, %c0_2, %c0_3] : memref<1x16x512xf32, #tpu.memory_space<vmem>>, vector<1x16x512xf32>
    %2 = vector.shape_cast %1 : vector<1x16x512xf32> to vector<16x512xf32>
    %cst = arith.constant dense<0.000000e+00> : vector<4x512xf32>
    %3 = tpu.matmul %0, %2, %cst {dimension_numbers = #tpu.dot_dimension_numbers<[1], [0], [0], [1], [0, 0, 1, 1], [], []>} : vector<4x16xf32>, vector<16x512xf32>, vector<4x512xf32> -> vector<4x512xf32>
    %c0_4 = arith.constant 0 : index
    %c0_5 = arith.constant 0 : index
    %4 = vector.load %arg7[%c0_4, %c0_5] : memref<4x512xf32, #tpu.memory_space<vmem>>, vector<4x512xf32>
    %c0_6 = arith.constant 0 : index
    %c0_7 = arith.constant 0 : index
    %5 = vector.load %arg8[%c0_6, %c0_7] : memref<4x512xf32, #tpu.memory_space<vmem>>, vector<4x512xf32>
    %6 = vector.shape_cast %3 : vector<4x512xf32> to vector<1x4x512xf32>
    %cst_8 = arith.constant dense<0.000000e+00> : vector<1xf32>
    %7 = vector.multi_reduction <add>, %6, %cst_8 [1, 2] : vector<1x4x512xf32> to vector<1xf32>
    %8 = vector.shape_cast %7 : vector<1xf32> to vector<1x1x1xf32>
    %9 = vector.extract %8[0, 0, 0] : f32 from vector<1x1x1xf32>
    %cst_9 = arith.constant 4.8828125E-4 : f32
    %10 = arith.mulf %9, %cst_9 : f32
    %11 = vector.broadcast %10 : f32 to vector<4x512xf32>
    %12 = arith.subf %3, %11 : vector<4x512xf32>
    %13 = arith.mulf %12, %12 : vector<4x512xf32>
    %14 = vector.shape_cast %13 : vector<4x512xf32> to vector<1x4x512xf32>
    %cst_10 = arith.constant dense<0.000000e+00> : vector<1xf32>
    %15 = vector.multi_reduction <add>, %14, %cst_10 [1, 2] : vector<1x4x512xf32> to vector<1xf32>
    %16 = vector.shape_cast %15 : vector<1xf32> to vector<1x1x1xf32>
    %17 = vector.extract %16[0, 0, 0] : f32 from vector<1x1x1xf32>
    %cst_11 = arith.constant 4.8828125E-4 : f32
    %18 = arith.mulf %17, %cst_11 : f32
    %cst_12 = arith.constant 9.99999974E-6 : f32
    %19 = arith.addf %18, %cst_12 : f32
    %20 = math.rsqrt %19 : f32
    %21 = vector.broadcast %20 : f32 to vector<4x512xf32>
    %22 = arith.mulf %12, %21 : vector<4x512xf32>
    %23 = arith.mulf %22, %4 : vector<4x512xf32>
    %24 = arith.addf %23, %5 : vector<4x512xf32>
    %cst_13 = arith.constant 0.000000e+00 : f32
    %25 = vector.broadcast %cst_13 : f32 to vector<4x512xf32>
    %26 = arith.cmpf ogt, %24, %25 : vector<4x512xf32>
    %cst_14 = arith.constant 2.000000e-01 : f32
    %27 = vector.broadcast %cst_14 : f32 to vector<4x512xf32>
    %28 = arith.mulf %27, %24 : vector<4x512xf32>
    %29 = arith.select %26, %24, %28 : vector<4x512xi1>, vector<4x512xf32>
    %c0_15 = arith.constant 0 : index
    %c0_16 = arith.constant 0 : index
    %30 = vector.load %arg18[%c0_15, %c0_16] : memref<32x512xf32, #tpu.memory_space<vmem>>, vector<4x512xf32>
    tpu.vector_store %arg18[%c0_15, %c0_16], %29 {strides = array<i32>} : memref<32x512xf32, #tpu.memory_space<vmem>>, vector<4x512xf32>,
    %cst_17 = arith.constant 0.000000e+00 : f32
    %31 = vector.broadcast %cst_17 : f32 to vector<4x528xf32>
    %c0_18 = arith.constant 0 : index
    %c0_19 = arith.constant 0 : index
    %32 = vector.load %arg16[%c0_18, %c0_19] : memref<16x528xf32, #tpu.memory_space<vmem>>, vector<4x528xf32>
    tpu.vector_store %arg16[%c0_18, %c0_19], %31 {strides = array<i32>} : memref<16x528xf32, #tpu.memory_space<vmem>>, vector<4x528xf32>,
    %c0_20 = arith.constant 0 : index
    %c0_21 = arith.constant 0 : index
    %33 = vector.load %arg18[%c0_20, %c0_21] : memref<32x512xf32, #tpu.memory_space<vmem>>, vector<4x512xf32>
    %c0_22 = arith.constant 0 : index
    %c8 = arith.constant 8 : index
    %34 = vector.load %arg16[%c0_22, %c8] : memref<16x528xf32, #tpu.memory_space<vmem>>, vector<4x512xf32>
    tpu.vector_store %arg16[%c0_22, %c8], %33 {strides = array<i32>} : memref<16x528xf32, #tpu.memory_space<vmem>>, vector<4x512xf32>,
    %cst_23 = arith.constant 0.000000e+00 : f32
    %35 = vector.broadcast %cst_23 : f32 to vector<8x502xf32>
    %c0_24 = arith.constant 0 : index
    %c0_25 = arith.constant 0 : index
    %36 = vector.load %arg3[%c0_24, %c0_25] : memref<8x48xf32, #tpu.memory_space<vmem>>, vector<8x4xf32>
    %c0_26 = arith.constant 0 : index
    %c0_27 = arith.constant 0 : index
    %37 = vector.load %arg16[%c0_26, %c0_27] : memref<16x528xf32, #tpu.memory_space<vmem>>, vector<4x502xf32>
    %cst_28 = arith.constant dense<0.000000e+00> : vector<8x502xf32>
    %38 = tpu.matmul %36, %37, %cst_28 {dimension_numbers = #tpu.dot_dimension_numbers<[1], [0], [0], [1], [0, 0, 1, 1], [], []>} : vector<8x4xf32>, vector<4x502xf32>, vector<8x502xf32> -> vector<8x502xf32>
    %39 = arith.addf %35, %38 : vector<8x502xf32>
    %c0_29 = arith.constant 0 : index
    %c4 = arith.constant 4 : index
    %40 = vector.load %arg3[%c0_29, %c4] : memref<8x48xf32, #tpu.memory_space<vmem>>, vector<8x4xf32>
    %c0_30 = arith.constant 0 : index
    %c1 = arith.constant 1 : index
    %41 = vector.load %arg16[%c0_30, %c1] : memref<16x528xf32, #tpu.memory_space<vmem>>, vector<4x502xf32>
    %cst_31 = arith.constant dense<0.000000e+00> : vector<8x502xf32>
    %42 = tpu.matmul %40, %41, %cst_31 {dimension_numbers = #tpu.dot_dimension_numbers<[1], [0], [0], [1], [0, 0, 1, 1], [], []>} : vector<8x4xf32>, vector<4x502xf32>, vector<8x502xf32> -> vector<8x502xf32>
    %43 = arith.addf %39, %42 : vector<8x502xf32>
    %c0_32 = arith.constant 0 : index
    %c8_33 = arith.constant 8 : index
    %44 = vector.load %arg3[%c0_32, %c8_33] : memref<8x48xf32, #tpu.memory_space<vmem>>, vector<8x4xf32>
    %c0_34 = arith.constant 0 : index
    %c2 = arith.constant 2 : index
    %45 = vector.load %arg16[%c0_34, %c2] : memref<16x528xf32, #tpu.memory_space<vmem>>, vector<4x502xf32>
    %cst_35 = arith.constant dense<0.000000e+00> : vector<8x502xf32>
    %46 = tpu.matmul %44, %45, %cst_35 {dimension_numbers = #tpu.dot_dimension_numbers<[1], [0], [0], [1], [0, 0, 1, 1], [], []>} : vector<8x4xf32>, vector<4x502xf32>, vector<8x502xf32> -> vector<8x502xf32>
    %47 = arith.addf %43, %46 : vector<8x502xf32>
    %c0_36 = arith.constant 0 : index
    %c12 = arith.constant 12 : index
    %48 = vector.load %arg3[%c0_36, %c12] : memref<8x48xf32, #tpu.memory_space<vmem>>, vector<8x4xf32>
    %c0_37 = arith.constant 0 : index
    %c8_38 = arith.constant 8 : index
    %49 = vector.load %arg16[%c0_37, %c8_38] : memref<16x528xf32, #tpu.memory_space<vmem>>, vector<4x502xf32>
    %cst_39 = arith.constant dense<0.000000e+00> : vector<8x502xf32>
    %50 = tpu.matmul %48, %49, %cst_39 {dimension_numbers = #tpu.dot_dimension_numbers<[1], [0], [0], [1], [0, 0, 1, 1], [], []>} : vector<8x4xf32>, vector<4x502xf32>, vector<8x502xf32> -> vector<8x502xf32>
    %51 = arith.addf %47, %50 : vector<8x502xf32>
    %c0_40 = arith.constant 0 : index
    %c16 = arith.constant 16 : index
    %52 = vector.load %arg3[%c0_40, %c16] : memref<8x48xf32, #tpu.memory_space<vmem>>, vector<8x4xf32>
    %c0_41 = arith.constant 0 : index
    %c9 = arith.constant 9 : index
    %53 = vector.load %arg16[%c0_41, %c9] : memref<16x528xf32, #tpu.memory_space<vmem>>, vector<4x502xf32>
    %cst_42 = arith.constant dense<0.000000e+00> : vector<8x502xf32>
    %54 = tpu.matmul %52, %53, %cst_42 {dimension_numbers = #tpu.dot_dimension_numbers<[1], [0], [0], [1], [0, 0, 1, 1], [], []>} : vector<8x4xf32>, vector<4x502xf32>, vector<8x502xf32> -> vector<8x502xf32>
    %55 = arith.addf %51, %54 : vector<8x502xf32>
    %c0_43 = arith.constant 0 : index
    %c20 = arith.constant 20 : index
    %56 = vector.load %arg3[%c0_43, %c20] : memref<8x48xf32, #tpu.memory_space<vmem>>, vector<8x4xf32>
    %c0_44 = arith.constant 0 : index
    %c10 = arith.constant 10 : index
    %57 = vector.load %arg16[%c0_44, %c10] : memref<16x528xf32, #tpu.memory_space<vmem>>, vector<4x502xf32>
    %cst_45 = arith.constant dense<0.000000e+00> : vector<8x502xf32>
    %58 = tpu.matmul %56, %57, %cst_45 {dimension_numbers = #tpu.dot_dimension_numbers<[1], [0], [0], [1], [0, 0, 1, 1], [], []>} : vector<8x4xf32>, vector<4x502xf32>, vector<8x502xf32> -> vector<8x502xf32>
    %59 = arith.addf %55, %58 : vector<8x502xf32>
    %c0_46 = arith.constant 0 : index
    %c24 = arith.constant 24 : index
    %60 = vector.load %arg3[%c0_46, %c24] : memref<8x48xf32, #tpu.memory_space<vmem>>, vector<8x4xf32>
    %c0_47 = arith.constant 0 : index
    %c16_48 = arith.constant 16 : index
    %61 = vector.load %arg16[%c0_47, %c16_48] : memref<16x528xf32, #tpu.memory_space<vmem>>, vector<4x502xf32>
    %cst_49 = arith.constant dense<0.000000e+00> : vector<8x502xf32>
    %62 = tpu.matmul %60, %61, %cst_49 {dimension_numbers = #tpu.dot_dimension_numbers<[1], [0], [0], [1], [0, 0, 1, 1], [], []>} : vector<8x4xf32>, vector<4x502xf32>, vector<8x502xf32> -> vector<8x502xf32>
    %63 = arith.addf %59, %62 : vector<8x502xf32>
    %c0_50 = arith.constant 0 : index
    %c28 = arith.constant 28 : index
    %64 = vector.load %arg3[%c0_50, %c28] : memref<8x48xf32, #tpu.memory_space<vmem>>, vector<8x4xf32>
    %c0_51 = arith.constant 0 : index
    %c17 = arith.constant 17 : index
    %65 = vector.load %arg16[%c0_51, %c17] : memref<16x528xf32, #tpu.memory_space<vmem>>, vector<4x502xf32>
    %cst_52 = arith.constant dense<0.000000e+00> : vector<8x502xf32>
    %66 = tpu.matmul %64, %65, %cst_52 {dimension_numbers = #tpu.dot_dimension_numbers<[1], [0], [0], [1], [0, 0, 1, 1], [], []>} : vector<8x4xf32>, vector<4x502xf32>, vector<8x502xf32> -> vector<8x502xf32>
    %67 = arith.addf %63, %66 : vector<8x502xf32>
    %c0_53 = arith.constant 0 : index
    %c32 = arith.constant 32 : index
    %68 = vector.load %arg3[%c0_53, %c32] : memref<8x48xf32, #tpu.memory_space<vmem>>, vector<8x4xf32>
    %c0_54 = arith.constant 0 : index
    %c18 = arith.constant 18 : index
    %69 = vector.load %arg16[%c0_54, %c18] : memref<16x528xf32, #tpu.memory_space<vmem>>, vector<4x502xf32>
    %cst_55 = arith.constant dense<0.000000e+00> : vector<8x502xf32>
    %70 = tpu.matmul %68, %69, %cst_55 {dimension_numbers = #tpu.dot_dimension_numbers<[1], [0], [0], [1], [0, 0, 1, 1], [], []>} : vector<8x4xf32>, vector<4x502xf32>, vector<8x502xf32> -> vector<8x502xf32>
    %71 = arith.addf %67, %70 : vector<8x502xf32>
    %c0_56 = arith.constant 0 : index
    %c36 = arith.constant 36 : index
    %72 = vector.load %arg3[%c0_56, %c36] : memref<8x48xf32, #tpu.memory_space<vmem>>, vector<8x4xf32>
    %c0_57 = arith.constant 0 : index
    %c24_58 = arith.constant 24 : index
    %73 = vector.load %arg16[%c0_57, %c24_58] : memref<16x528xf32, #tpu.memory_space<vmem>>, vector<4x502xf32>
    %cst_59 = arith.constant dense<0.000000e+00> : vector<8x502xf32>
    %74 = tpu.matmul %72, %73, %cst_59 {dimension_numbers = #tpu.dot_dimension_numbers<[1], [0], [0], [1], [0, 0, 1, 1], [], []>} : vector<8x4xf32>, vector<4x502xf32>, vector<8x502xf32> -> vector<8x502xf32>
    %75 = arith.addf %71, %74 : vector<8x502xf32>
    %c0_60 = arith.constant 0 : index
    %c40 = arith.constant 40 : index
    %76 = vector.load %arg3[%c0_60, %c40] : memref<8x48xf32, #tpu.memory_space<vmem>>, vector<8x4xf32>
    %c0_61 = arith.constant 0 : index
    %c25 = arith.constant 25 : index
    %77 = vector.load %arg16[%c0_61, %c25] : memref<16x528xf32, #tpu.memory_space<vmem>>, vector<4x502xf32>
    %cst_62 = arith.constant dense<0.000000e+00> : vector<8x502xf32>
    %78 = tpu.matmul %76, %77, %cst_62 {dimension_numbers = #tpu.dot_dimension_numbers<[1], [0], [0], [1], [0, 0, 1, 1], [], []>} : vector<8x4xf32>, vector<4x502xf32>, vector<8x502xf32> -> vector<8x502xf32>
    %79 = arith.addf %75, %78 : vector<8x502xf32>
    %c0_63 = arith.constant 0 : index
    %c44 = arith.constant 44 : index
    %80 = vector.load %arg3[%c0_63, %c44] : memref<8x48xf32, #tpu.memory_space<vmem>>, vector<8x4xf32>
    %c0_64 = arith.constant 0 : index
    %c26 = arith.constant 26 : index
    %81 = vector.load %arg16[%c0_64, %c26] : memref<16x528xf32, #tpu.memory_space<vmem>>, vector<4x502xf32>
    %cst_65 = arith.constant dense<0.000000e+00> : vector<8x502xf32>
    %82 = tpu.matmul %80, %81, %cst_65 {dimension_numbers = #tpu.dot_dimension_numbers<[1], [0], [0], [1], [0, 0, 1, 1], [], []>} : vector<8x4xf32>, vector<4x502xf32>, vector<8x502xf32> -> vector<8x502xf32>
    %83 = arith.addf %79, %82 : vector<8x502xf32>
    %c0_66 = arith.constant 0 : index
    %c0_67 = arith.constant 0 : index
    %84 = vector.load %arg17[%c0_66, %c0_67] : memref<32x502xf32, #tpu.memory_space<vmem>>, vector<8x502xf32>
    tpu.vector_store %arg17[%c0_66, %c0_67], %83 {strides = array<i32>} : memref<32x502xf32, #tpu.memory_space<vmem>>, vector<8x502xf32>,
    %c0_68 = arith.constant 0 : index
    %c0_69 = arith.constant 0 : index
    %85 = vector.load %arg17[%c0_68, %c0_69] : memref<32x502xf32, #tpu.memory_space<vmem>>, vector<8x6xf32>
    %c0_70 = arith.constant 0 : index
    %c0_71 = arith.constant 0 : index
    %86 = vector.load %arg18[%c0_70, %c0_71] : memref<32x512xf32, #tpu.memory_space<vmem>>, vector<8x6xf32>
    tpu.vector_store %arg18[%c0_70, %c0_71], %85 {strides = array<i32>} : memref<32x512xf32, #tpu.memory_space<vmem>>, vector<8x6xf32>,
    %c0_72 = arith.constant 0 : index
    %c16_73 = arith.constant 16 : index
    %87 = vector.load %arg17[%c0_72, %c16_73] : memref<32x502xf32, #tpu.memory_space<vmem>>, vector<8x6xf32>
    %c0_74 = arith.constant 0 : index
    %c6 = arith.constant 6 : index
    %88 = vector.load %arg18[%c0_74, %c6] : memref<32x512xf32, #tpu.memory_space<vmem>>, vector<8x6xf32>
    tpu.vector_store %arg18[%c0_74, %c6], %87 {strides = array<i32>} : memref<32x512xf32, #tpu.memory_space<vmem>>, vector<8x6xf32>,
    %c0_75 = arith.constant 0 : index
    %c32_76 = arith.constant 32 : index
    %89 = vector.load %arg17[%c0_75, %c32_76] : memref<32x502xf32, #tpu.memory_space<vmem>>, vector<8x6xf32>
    %c0_77 = arith.constant 0 : index
    %c12_78 = arith.constant 12 : index
    %90 = vector.load %arg18[%c0_77, %c12_78] : memref<32x512xf32, #tpu.memory_space<vmem>>, vector<8x6xf32>
    tpu.vector_store %arg18[%c0_77, %c12_78], %89 {strides = array<i32>} : memref<32x512xf32, #tpu.memory_space<vmem>>, vector<8x6xf32>,
    %c0_79 = arith.constant 0 : index
    %c48 = arith.constant 48 : index
    %91 = vector.load %arg17[%c0_79, %c48] : memref<32x502xf32, #tpu.memory_space<vmem>>, vector<8x6xf32>
    %c0_80 = arith.constant 0 : index
    %c18_81 = arith.constant 18 : index
    %92 = vector.load %arg18[%c0_80, %c18_81] : memref<32x512xf32, #tpu.memory_space<vmem>>, vector<8x6xf32>
    tpu.vector_store %arg18[%c0_80, %c18_81], %91 {strides = array<i32>} : memref<32x512xf32, #tpu.memory_space<vmem>>, vector<8x6xf32>,
    %c0_82 = arith.constant 0 : index
    %c64 = arith.constant 64 : index
    %93 = vector.load %arg17[%c0_82, %c64] : memref<32x502xf32, #tpu.memory_space<vmem>>, vector<8x6xf32>
    %c0_83 = arith.constant 0 : index
    %c24_84 = arith.constant 24 : index
    %94 = vector.load %arg18[%c0_83, %c24_84] : memref<32x512xf32, #tpu.memory_space<vmem>>, vector<8x6xf32>
    tpu.vector_store %arg18[%c0_83, %c24_84], %93 {strides = array<i32>} : memref<32x512xf32, #tpu.memory_space<vmem>>, vector<8x6xf32>,
    %c0_85 = arith.constant 0 : index
    %c80 = arith.constant 80 : index
    %95 = vector.load %arg17[%c0_85, %c80] : memref<32x502xf32, #tpu.memory_space<vmem>>, vector<8x6xf32>
    %c0_86 = arith.constant 0 : index
    %c30 = arith.constant 30 : index
    %96 = vector.load %arg18[%c0_86, %c30] : memref<32x512xf32, #tpu.memory_space<vmem>>, vector<8x6xf32>
    tpu.vector_store %arg18[%c0_86, %c30], %95 {strides = array<i32>} : memref<32x512xf32, #tpu.memory_space<vmem>>, vector<8x6xf32>,
    %c0_87 = arith.constant 0 : index
    %c96 = arith.constant 96 : index
    %97 = vector.load %arg17[%c0_87, %c96] : memref<32x502xf32, #tpu.memory_space<vmem>>, vector<8x6xf32>
    %c0_88 = arith.constant 0 : index
    %c36_89 = arith.constant 36 : index
    %98 = vector.load %arg18[%c0_88, %c36_89] : memref<32x512xf32, #tpu.memory_space<vmem>>, vector<8x6xf32>
    tpu.vector_store %arg18[%c0_88, %c36_89], %97 {strides = array<i32>} : memref<32x512xf32, #tpu.memory_space<vmem>>, vector<8x6xf32>,
    %c0_90 = arith.constant 0 : index
    %c112 = arith.constant 112 : index
    %99 = vector.load %arg17[%c0_90, %c112] : memref<32x502xf32, #tpu.memory_space<vmem>>, vector<8x6xf32>
    %c0_91 = arith.constant 0 : index
    %c42 = arith.constant 42 : index
    %100 = vector.load %arg18[%c0_91, %c42] : memref<32x512xf32, #tpu.memory_space<vmem>>, vector<8x6xf32>
    tpu.vector_store %arg18[%c0_91, %c42], %99 {strides = array<i32>} : memref<32x512xf32, #tpu.memory_space<vmem>>, vector<8x6xf32>,
    %c0_92 = arith.constant 0 : index
    %c128 = arith.constant 128 : index
    %101 = vector.load %arg17[%c0_92, %c128] : memref<32x502xf32, #tpu.memory_space<vmem>>, vector<8x6xf32>
    %c0_93 = arith.constant 0 : index
    %c48_94 = arith.constant 48 : index
    %102 = vector.load %arg18[%c0_93, %c48_94] : memref<32x512xf32, #tpu.memory_space<vmem>>, vector<8x6xf32>
    tpu.vector_store %arg18[%c0_93, %c48_94], %101 {strides = array<i32>} : memref<32x512xf32, #tpu.memory_space<vmem>>, vector<8x6xf32>,
    %c0_95 = arith.constant 0 : index
    %c144 = arith.constant 144 : index
    %103 = vector.load %arg17[%c0_95, %c144] : memref<32x502xf32, #tpu.memory_space<vmem>>, vector<8x6xf32>
    %c0_96 = arith.constant 0 : index
    %c54 = arith.constant 54 : index
    %104 = vector.load %arg18[%c0_96, %c54] : memref<32x512xf32, #tpu.memory_space<vmem>>, vector<8x6xf32>
    tpu.vector_store %arg18[%c0_96, %c54], %103 {strides = array<i32>} : memref<32x512xf32, #tpu.memory_space<vmem>>, vector<8x6xf32>,
    %c0_97 = arith.constant 0 : index
    %c160 = arith.constant 160 : index
    %105 = vector.load %arg17[%c0_97, %c160] : memref<32x502xf32, #tpu.memory_space<vmem>>, vector<8x6xf32>
    %c0_98 = arith.constant 0 : index
    %c60 = arith.constant 60 : index
    %106 = vector.load %arg18[%c0_98, %c60] : memref<32x512xf32, #tpu.memory_space<vmem>>, vector<8x6xf32>
    tpu.vector_store %arg18[%c0_98, %c60], %105 {strides = array<i32>} : memref<32x512xf32, #tpu.memory_space<vmem>>, vector<8x6xf32>,
    %c0_99 = arith.constant 0 : index
    %c176 = arith.constant 176 : index
    %107 = vector.load %arg17[%c0_99, %c176] : memref<32x502xf32, #tpu.memory_space<vmem>>, vector<8x6xf32>
    %c0_100 = arith.constant 0 : index
    %c66 = arith.constant 66 : index
    %108 = vector.load %arg18[%c0_100, %c66] : memref<32x512xf32, #tpu.memory_space<vmem>>, vector<8x6xf32>
    tpu.vector_store %arg18[%c0_100, %c66], %107 {strides = array<i32>} : memref<32x512xf32, #tpu.memory_space<vmem>>, vector<8x6xf32>,
    %c0_101 = arith.constant 0 : index
    %c192 = arith.constant 192 : index
    %109 = vector.load %arg17[%c0_101, %c192] : memref<32x502xf32, #tpu.memory_space<vmem>>, vector<8x6xf32>
    %c0_102 = arith.constant 0 : index
    %c72 = arith.constant 72 : index
    %110 = vector.load %arg18[%c0_102, %c72] : memref<32x512xf32, #tpu.memory_space<vmem>>, vector<8x6xf32>
    tpu.vector_store %arg18[%c0_102, %c72], %109 {strides = array<i32>} : memref<32x512xf32, #tpu.memory_space<vmem>>, vector<8x6xf32>,
    %c0_103 = arith.constant 0 : index
    %c208 = arith.constant 208 : index
    %111 = vector.load %arg17[%c0_103, %c208] : memref<32x502xf32, #tpu.memory_space<vmem>>, vector<8x6xf32>
    %c0_104 = arith.constant 0 : index
    %c78 = arith.constant 78 : index
    %112 = vector.load %arg18[%c0_104, %c78] : memref<32x512xf32, #tpu.memory_space<vmem>>, vector<8x6xf32>
    tpu.vector_store %arg18[%c0_104, %c78], %111 {strides = array<i32>} : memref<32x512xf32, #tpu.memory_space<vmem>>, vector<8x6xf32>,
    %c0_105 = arith.constant 0 : index
    %c224 = arith.constant 224 : index
    %113 = vector.load %arg17[%c0_105, %c224] : memref<32x502xf32, #tpu.memory_space<vmem>>, vector<8x6xf32>
    %c0_106 = arith.constant 0 : index
    %c84 = arith.constant 84 : index
    %114 = vector.load %arg18[%c0_106, %c84] : memref<32x512xf32, #tpu.memory_space<vmem>>, vector<8x6xf32>
    tpu.vector_store %arg18[%c0_106, %c84], %113 {strides = array<i32>} : memref<32x512xf32, #tpu.memory_space<vmem>>, vector<8x6xf32>,
    %c0_107 = arith.constant 0 : index
    %c240 = arith.constant 240 : index
    %115 = vector.load %arg17[%c0_107, %c240] : memref<32x502xf32, #tpu.memory_space<vmem>>, vector<8x6xf32>
    %c0_108 = arith.constant 0 : index
    %c90 = arith.constant 90 : index
    %116 = vector.load %arg18[%c0_108, %c90] : memref<32x512xf32, #tpu.memory_space<vmem>>, vector<8x6xf32>
    tpu.vector_store %arg18[%c0_108, %c90], %115 {strides = array<i32>} : memref<32x512xf32, #tpu.memory_space<vmem>>, vector<8x6xf32>,
    %c0_109 = arith.constant 0 : index
    %c256 = arith.constant 256 : index
    %117 = vector.load %arg17[%c0_109, %c256] : memref<32x502xf32, #tpu.memory_space<vmem>>, vector<8x6xf32>
    %c0_110 = arith.constant 0 : index
    %c96_111 = arith.constant 96 : index
    %118 = vector.load %arg18[%c0_110, %c96_111] : memref<32x512xf32, #tpu.memory_space<vmem>>, vector<8x6xf32>
    tpu.vector_store %arg18[%c0_110, %c96_111], %117 {strides = array<i32>} : memref<32x512xf32, #tpu.memory_space<vmem>>, vector<8x6xf32>,
    %c0_112 = arith.constant 0 : index
    %c272 = arith.constant 272 : index
    %119 = vector.load %arg17[%c0_112, %c272] : memref<32x502xf32, #tpu.memory_space<vmem>>, vector<8x6xf32>
    %c0_113 = arith.constant 0 : index
    %c102 = arith.constant 102 : index
    %120 = vector.load %arg18[%c0_113, %c102] : memref<32x512xf32, #tpu.memory_space<vmem>>, vector<8x6xf32>
    tpu.vector_store %arg18[%c0_113, %c102], %119 {strides = array<i32>} : memref<32x512xf32, #tpu.memory_space<vmem>>, vector<8x6xf32>,
    %c0_114 = arith.constant 0 : index
    %c288 = arith.constant 288 : index
    %121 = vector.load %arg17[%c0_114, %c288] : memref<32x502xf32, #tpu.memory_space<vmem>>, vector<8x6xf32>
    %c0_115 = arith.constant 0 : index
    %c108 = arith.constant 108 : index
    %122 = vector.load %arg18[%c0_115, %c108] : memref<32x512xf32, #tpu.memory_space<vmem>>, vector<8x6xf32>
    tpu.vector_store %arg18[%c0_115, %c108], %121 {strides = array<i32>} : memref<32x512xf32, #tpu.memory_space<vmem>>, vector<8x6xf32>,
    %c0_116 = arith.constant 0 : index
    %c304 = arith.constant 304 : index
    %123 = vector.load %arg17[%c0_116, %c304] : memref<32x502xf32, #tpu.memory_space<vmem>>, vector<8x6xf32>
    %c0_117 = arith.constant 0 : index
    %c114 = arith.constant 114 : index
    %124 = vector.load %arg18[%c0_117, %c114] : memref<32x512xf32, #tpu.memory_space<vmem>>, vector<8x6xf32>
    tpu.vector_store %arg18[%c0_117, %c114], %123 {strides = array<i32>} : memref<32x512xf32, #tpu.memory_space<vmem>>, vector<8x6xf32>,
    %c0_118 = arith.constant 0 : index
    %c320 = arith.constant 320 : index
    %125 = vector.load %arg17[%c0_118, %c320] : memref<32x502xf32, #tpu.memory_space<vmem>>, vector<8x6xf32>
    %c0_119 = arith.constant 0 : index
    %c120 = arith.constant 120 : index
    %126 = vector.load %arg18[%c0_119, %c120] : memref<32x512xf32, #tpu.memory_space<vmem>>, vector<8x6xf32>
    tpu.vector_store %arg18[%c0_119, %c120], %125 {strides = array<i32>} : memref<32x512xf32, #tpu.memory_space<vmem>>, vector<8x6xf32>,
    %c0_120 = arith.constant 0 : index
    %c336 = arith.constant 336 : index
    %127 = vector.load %arg17[%c0_120, %c336] : memref<32x502xf32, #tpu.memory_space<vmem>>, vector<8x6xf32>
    %c0_121 = arith.constant 0 : index
    %c126 = arith.constant 126 : index
    %128 = vector.load %arg18[%c0_121, %c126] : memref<32x512xf32, #tpu.memory_space<vmem>>, vector<8x6xf32>
    tpu.vector_store %arg18[%c0_121, %c126], %127 {strides = array<i32>} : memref<32x512xf32, #tpu.memory_space<vmem>>, vector<8x6xf32>,
    %c0_122 = arith.constant 0 : index
    %c352 = arith.constant 352 : index
    %129 = vector.load %arg17[%c0_122, %c352] : memref<32x502xf32, #tpu.memory_space<vmem>>, vector<8x6xf32>
    %c0_123 = arith.constant 0 : index
    %c132 = arith.constant 132 : index
    %130 = vector.load %arg18[%c0_123, %c132] : memref<32x512xf32, #tpu.memory_space<vmem>>, vector<8x6xf32>
    tpu.vector_store %arg18[%c0_123, %c132], %129 {strides = array<i32>} : memref<32x512xf32, #tpu.memory_space<vmem>>, vector<8x6xf32>,
    %c0_124 = arith.constant 0 : index
    %c368 = arith.constant 368 : index
    %131 = vector.load %arg17[%c0_124, %c368] : memref<32x502xf32, #tpu.memory_space<vmem>>, vector<8x6xf32>
    %c0_125 = arith.constant 0 : index
    %c138 = arith.constant 138 : index
    %132 = vector.load %arg18[%c0_125, %c138] : memref<32x512xf32, #tpu.memory_space<vmem>>, vector<8x6xf32>
    tpu.vector_store %arg18[%c0_125, %c138], %131 {strides = array<i32>} : memref<32x512xf32, #tpu.memory_space<vmem>>, vector<8x6xf32>,
    %c0_126 = arith.constant 0 : index
    %c384 = arith.constant 384 : index
    %133 = vector.load %arg17[%c0_126, %c384] : memref<32x502xf32, #tpu.memory_space<vmem>>, vector<8x6xf32>
    %c0_127 = arith.constant 0 : index
    %c144_128 = arith.constant 144 : index
    %134 = vector.load %arg18[%c0_127, %c144_128] : memref<32x512xf32, #tpu.memory_space<vmem>>, vector<8x6xf32>
    tpu.vector_store %arg18[%c0_127, %c144_128], %133 {strides = array<i32>} : memref<32x512xf32, #tpu.memory_space<vmem>>, vector<8x6xf32>,
    %c0_129 = arith.constant 0 : index
    %c400 = arith.constant 400 : index
    %135 = vector.load %arg17[%c0_129, %c400] : memref<32x502xf32, #tpu.memory_space<vmem>>, vector<8x6xf32>
    %c0_130 = arith.constant 0 : index
    %c150 = arith.constant 150 : index
    %136 = vector.load %arg18[%c0_130, %c150] : memref<32x512xf32, #tpu.memory_space<vmem>>, vector<8x6xf32>
    tpu.vector_store %arg18[%c0_130, %c150], %135 {strides = array<i32>} : memref<32x512xf32, #tpu.memory_space<vmem>>, vector<8x6xf32>,
    %c0_131 = arith.constant 0 : index
    %c416 = arith.constant 416 : index
    %137 = vector.load %arg17[%c0_131, %c416] : memref<32x502xf32, #tpu.memory_space<vmem>>, vector<8x6xf32>
    %c0_132 = arith.constant 0 : index
    %c156 = arith.constant 156 : index
    %138 = vector.load %arg18[%c0_132, %c156] : memref<32x512xf32, #tpu.memory_space<vmem>>, vector<8x6xf32>
    tpu.vector_store %arg18[%c0_132, %c156], %137 {strides = array<i32>} : memref<32x512xf32, #tpu.memory_space<vmem>>, vector<8x6xf32>,
    %c0_133 = arith.constant 0 : index
    %c432 = arith.constant 432 : index
    %139 = vector.load %arg17[%c0_133, %c432] : memref<32x502xf32, #tpu.memory_space<vmem>>, vector<8x6xf32>
    %c0_134 = arith.constant 0 : index
    %c162 = arith.constant 162 : index
    %140 = vector.load %arg18[%c0_134, %c162] : memref<32x512xf32, #tpu.memory_space<vmem>>, vector<8x6xf32>
    tpu.vector_store %arg18[%c0_134, %c162], %139 {strides = array<i32>} : memref<32x512xf32, #tpu.memory_space<vmem>>, vector<8x6xf32>,
    %c0_135 = arith.constant 0 : index
    %c448 = arith.constant 448 : index
    %141 = vector.load %arg17[%c0_135, %c448] : memref<32x502xf32, #tpu.memory_space<vmem>>, vector<8x6xf32>
    %c0_136 = arith.constant 0 : index
    %c168 = arith.constant 168 : index
    %142 = vector.load %arg18[%c0_136, %c168] : memref<32x512xf32, #tpu.memory_space<vmem>>, vector<8x6xf32>
    tpu.vector_store %arg18[%c0_136, %c168], %141 {strides = array<i32>} : memref<32x512xf32, #tpu.memory_space<vmem>>, vector<8x6xf32>,
    %c0_137 = arith.constant 0 : index
    %c464 = arith.constant 464 : index
    %143 = vector.load %arg17[%c0_137, %c464] : memref<32x502xf32, #tpu.memory_space<vmem>>, vector<8x6xf32>
    %c0_138 = arith.constant 0 : index
    %c174 = arith.constant 174 : index
    %144 = vector.load %arg18[%c0_138, %c174] : memref<32x512xf32, #tpu.memory_space<vmem>>, vector<8x6xf32>
    tpu.vector_store %arg18[%c0_138, %c174], %143 {strides = array<i32>} : memref<32x512xf32, #tpu.memory_space<vmem>>, vector<8x6xf32>,
    %c0_139 = arith.constant 0 : index
    %c480 = arith.constant 480 : index
    %145 = vector.load %arg17[%c0_139, %c480] : memref<32x502xf32, #tpu.memory_space<vmem>>, vector<8x6xf32>
    %c0_140 = arith.constant 0 : index
    %c180 = arith.constant 180 : index
    %146 = vector.load %arg18[%c0_140, %c180] : memref<32x512xf32, #tpu.memory_space<vmem>>, vector<8x6xf32>
    tpu.vector_store %arg18[%c0_140, %c180], %145 {strides = array<i32>} : memref<32x512xf32, #tpu.memory_space<vmem>>, vector<8x6xf32>,
    %c0_141 = arith.constant 0 : index
    %c496 = arith.constant 496 : index
    %147 = vector.load %arg17[%c0_141, %c496] : memref<32x502xf32, #tpu.memory_space<vmem>>, vector<8x6xf32>
    %c0_142 = arith.constant 0 : index
    %c186 = arith.constant 186 : index
    %148 = vector.load %arg18[%c0_142, %c186] : memref<32x512xf32, #tpu.memory_space<vmem>>, vector<8x6xf32>
    tpu.vector_store %arg18[%c0_142, %c186], %147 {strides = array<i32>} : memref<32x512xf32, #tpu.memory_space<vmem>>, vector<8x6xf32>,
    %c0_143 = arith.constant 0 : index
    %c0_144 = arith.constant 0 : index
    %149 = vector.load %arg18[%c0_143, %c0_144] : memref<32x512xf32, #tpu.memory_space<vmem>>, vector<8x192xf32>
    %c0_145 = arith.constant 0 : index
    %c0_146 = arith.constant 0 : index
    %150 = vector.load %arg9[%c0_145, %c0_146] : memref<8x192xf32, #tpu.memory_space<vmem>>, vector<8x192xf32>
    %c0_147 = arith.constant 0 : index
    %c0_148 = arith.constant 0 : index
    %151 = vector.load %arg10[%c0_147, %c0_148] : memref<8x192xf32, #tpu.memory_space<vmem>>, vector<8x192xf32>
    %152 = vector.shape_cast %149 : vector<8x192xf32> to vector<1x8x192xf32>
    %cst_149 = arith.constant dense<0.000000e+00> : vector<1xf32>
    %153 = vector.multi_reduction <add>, %152, %cst_149 [1, 2] : vector<1x8x192xf32> to vector<1xf32>
    %154 = vector.shape_cast %153 : vector<1xf32> to vector<1x1x1xf32>
    %155 = vector.extract %154[0, 0, 0] : f32 from vector<1x1x1xf32>
    %cst_150 = arith.constant 6.51041686E-4 : f32
    %156 = arith.mulf %155, %cst_150 : f32
    %157 = vector.broadcast %156 : f32 to vector<8x192xf32>
    %158 = arith.subf %149, %157 : vector<8x192xf32>
    %159 = arith.mulf %158, %158 : vector<8x192xf32>
    %160 = vector.shape_cast %159 : vector<8x192xf32> to vector<1x8x192xf32>
    %cst_151 = arith.constant dense<0.000000e+00> : vector<1xf32>
    %161 = vector.multi_reduction <add>, %160, %cst_151 [1, 2] : vector<1x8x192xf32> to vector<1xf32>
    %162 = vector.shape_cast %161 : vector<1xf32> to vector<1x1x1xf32>
    %163 = vector.extract %162[0, 0, 0] : f32 from vector<1x1x1xf32>
    %cst_152 = arith.constant 6.51041686E-4 : f32
    %164 = arith.mulf %163, %cst_152 : f32
    %cst_153 = arith.constant 9.99999974E-6 : f32
    %165 = arith.addf %164, %cst_153 : f32
    %166 = math.rsqrt %165 : f32
    %167 = vector.broadcast %166 : f32 to vector<8x192xf32>
    %168 = arith.mulf %158, %167 : vector<8x192xf32>
    %169 = arith.mulf %168, %150 : vector<8x192xf32>
    %170 = arith.addf %169, %151 : vector<8x192xf32>
    %cst_154 = arith.constant 0.000000e+00 : f32
    %171 = vector.broadcast %cst_154 : f32 to vector<8x192xf32>
    %172 = arith.cmpf ogt, %170, %171 : vector<8x192xf32>
    %cst_155 = arith.constant 2.000000e-01 : f32
    %173 = vector.broadcast %cst_155 : f32 to vector<8x192xf32>
    %174 = arith.mulf %173, %170 : vector<8x192xf32>
    %175 = arith.select %172, %170, %174 : vector<8x192xi1>, vector<8x192xf32>
    %c0_156 = arith.constant 0 : index
    %c0_157 = arith.constant 0 : index
    %176 = vector.load %arg18[%c0_156, %c0_157] : memref<32x512xf32, #tpu.memory_space<vmem>>, vector<8x192xf32>
    tpu.vector_store %arg18[%c0_156, %c0_157], %175 {strides = array<i32>} : memref<32x512xf32, #tpu.memory_space<vmem>>, vector<8x192xf32>,
    %cst_158 = arith.constant 0.000000e+00 : f32
    %177 = vector.broadcast %cst_158 : f32 to vector<8x216xf32>
    %c0_159 = arith.constant 0 : index
    %c0_160 = arith.constant 0 : index
    %178 = vector.load %arg16[%c0_159, %c0_160] : memref<16x528xf32, #tpu.memory_space<vmem>>, vector<8x216xf32>
    tpu.vector_store %arg16[%c0_159, %c0_160], %177 {strides = array<i32>} : memref<16x528xf32, #tpu.memory_space<vmem>>, vector<8x216xf32>,
    %c0_161 = arith.constant 0 : index
    %c0_162 = arith.constant 0 : index
    %179 = vector.load %arg18[%c0_161, %c0_162] : memref<32x512xf32, #tpu.memory_space<vmem>>, vector<8x192xf32>
    %c0_163 = arith.constant 0 : index
    %c12_164 = arith.constant 12 : index
    %180 = vector.load %arg16[%c0_163, %c12_164] : memref<16x528xf32, #tpu.memory_space<vmem>>, vector<8x192xf32>
    tpu.vector_store %arg16[%c0_163, %c12_164], %179 {strides = array<i32>} : memref<16x528xf32, #tpu.memory_space<vmem>>, vector<8x192xf32>,
    %cst_165 = arith.constant 0.000000e+00 : f32
    %181 = vector.broadcast %cst_165 : f32 to vector<16x196xf32>
    %c0_166 = arith.constant 0 : index
    %c0_167 = arith.constant 0 : index
    %182 = vector.load %arg4[%c0_166, %c0_167] : memref<16x96xf32, #tpu.memory_space<vmem>>, vector<16x8xf32>
    %c0_168 = arith.constant 0 : index
    %c0_169 = arith.constant 0 : index
    %183 = vector.load %arg16[%c0_168, %c0_169] : memref<16x528xf32, #tpu.memory_space<vmem>>, vector<8x196xf32>
    %cst_170 = arith.constant dense<0.000000e+00> : vector<16x196xf32>
    %184 = tpu.matmul %182, %183, %cst_170 {dimension_numbers = #tpu.dot_dimension_numbers<[1], [0], [0], [1], [0, 0, 1, 1], [], []>} : vector<16x8xf32>, vector<8x196xf32>, vector<16x196xf32> -> vector<16x196xf32>
    %185 = arith.addf %181, %184 : vector<16x196xf32>
    %c0_171 = arith.constant 0 : index
    %c8_172 = arith.constant 8 : index
    %186 = vector.load %arg4[%c0_171, %c8_172] : memref<16x96xf32, #tpu.memory_space<vmem>>, vector<16x8xf32>
    %c0_173 = arith.constant 0 : index
    %c1_174 = arith.constant 1 : index
    %187 = vector.load %arg16[%c0_173, %c1_174] : memref<16x528xf32, #tpu.memory_space<vmem>>, vector<8x196xf32>
    %cst_175 = arith.constant dense<0.000000e+00> : vector<16x196xf32>
    %188 = tpu.matmul %186, %187, %cst_175 {dimension_numbers = #tpu.dot_dimension_numbers<[1], [0], [0], [1], [0, 0, 1, 1], [], []>} : vector<16x8xf32>, vector<8x196xf32>, vector<16x196xf32> -> vector<16x196xf32>
    %189 = arith.addf %185, %188 : vector<16x196xf32>
    %c0_176 = arith.constant 0 : index
    %c16_177 = arith.constant 16 : index
    %190 = vector.load %arg4[%c0_176, %c16_177] : memref<16x96xf32, #tpu.memory_space<vmem>>, vector<16x8xf32>
    %c0_178 = arith.constant 0 : index
    %c2_179 = arith.constant 2 : index
    %191 = vector.load %arg16[%c0_178, %c2_179] : memref<16x528xf32, #tpu.memory_space<vmem>>, vector<8x196xf32>
    %cst_180 = arith.constant dense<0.000000e+00> : vector<16x196xf32>
    %192 = tpu.matmul %190, %191, %cst_180 {dimension_numbers = #tpu.dot_dimension_numbers<[1], [0], [0], [1], [0, 0, 1, 1], [], []>} : vector<16x8xf32>, vector<8x196xf32>, vector<16x196xf32> -> vector<16x196xf32>
    %193 = arith.addf %189, %192 : vector<16x196xf32>
    %c0_181 = arith.constant 0 : index
    %c24_182 = arith.constant 24 : index
    %194 = vector.load %arg4[%c0_181, %c24_182] : memref<16x96xf32, #tpu.memory_space<vmem>>, vector<16x8xf32>
    %c0_183 = arith.constant 0 : index
    %c6_184 = arith.constant 6 : index
    %195 = vector.load %arg16[%c0_183, %c6_184] : memref<16x528xf32, #tpu.memory_space<vmem>>, vector<8x196xf32>
    %cst_185 = arith.constant dense<0.000000e+00> : vector<16x196xf32>
    %196 = tpu.matmul %194, %195, %cst_185 {dimension_numbers = #tpu.dot_dimension_numbers<[1], [0], [0], [1], [0, 0, 1, 1], [], []>} : vector<16x8xf32>, vector<8x196xf32>, vector<16x196xf32> -> vector<16x196xf32>
    %197 = arith.addf %193, %196 : vector<16x196xf32>
    %c0_186 = arith.constant 0 : index
    %c32_187 = arith.constant 32 : index
    %198 = vector.load %arg4[%c0_186, %c32_187] : memref<16x96xf32, #tpu.memory_space<vmem>>, vector<16x8xf32>
    %c0_188 = arith.constant 0 : index
    %c7 = arith.constant 7 : index
    %199 = vector.load %arg16[%c0_188, %c7] : memref<16x528xf32, #tpu.memory_space<vmem>>, vector<8x196xf32>
    %cst_189 = arith.constant dense<0.000000e+00> : vector<16x196xf32>
    %200 = tpu.matmul %198, %199, %cst_189 {dimension_numbers = #tpu.dot_dimension_numbers<[1], [0], [0], [1], [0, 0, 1, 1], [], []>} : vector<16x8xf32>, vector<8x196xf32>, vector<16x196xf32> -> vector<16x196xf32>
    %201 = arith.addf %197, %200 : vector<16x196xf32>
    %c0_190 = arith.constant 0 : index
    %c40_191 = arith.constant 40 : index
    %202 = vector.load %arg4[%c0_190, %c40_191] : memref<16x96xf32, #tpu.memory_space<vmem>>, vector<16x8xf32>
    %c0_192 = arith.constant 0 : index
    %c8_193 = arith.constant 8 : index
    %203 = vector.load %arg16[%c0_192, %c8_193] : memref<16x528xf32, #tpu.memory_space<vmem>>, vector<8x196xf32>
    %cst_194 = arith.constant dense<0.000000e+00> : vector<16x196xf32>
    %204 = tpu.matmul %202, %203, %cst_194 {dimension_numbers = #tpu.dot_dimension_numbers<[1], [0], [0], [1], [0, 0, 1, 1], [], []>} : vector<16x8xf32>, vector<8x196xf32>, vector<16x196xf32> -> vector<16x196xf32>
    %205 = arith.addf %201, %204 : vector<16x196xf32>
    %c0_195 = arith.constant 0 : index
    %c48_196 = arith.constant 48 : index
    %206 = vector.load %arg4[%c0_195, %c48_196] : memref<16x96xf32, #tpu.memory_space<vmem>>, vector<16x8xf32>
    %c0_197 = arith.constant 0 : index
    %c12_198 = arith.constant 12 : index
    %207 = vector.load %arg16[%c0_197, %c12_198] : memref<16x528xf32, #tpu.memory_space<vmem>>, vector<8x196xf32>
    %cst_199 = arith.constant dense<0.000000e+00> : vector<16x196xf32>
    %208 = tpu.matmul %206, %207, %cst_199 {dimension_numbers = #tpu.dot_dimension_numbers<[1], [0], [0], [1], [0, 0, 1, 1], [], []>} : vector<16x8xf32>, vector<8x196xf32>, vector<16x196xf32> -> vector<16x196xf32>
    %209 = arith.addf %205, %208 : vector<16x196xf32>
    %c0_200 = arith.constant 0 : index
    %c56 = arith.constant 56 : index
    %210 = vector.load %arg4[%c0_200, %c56] : memref<16x96xf32, #tpu.memory_space<vmem>>, vector<16x8xf32>
    %c0_201 = arith.constant 0 : index
    %c13 = arith.constant 13 : index
    %211 = vector.load %arg16[%c0_201, %c13] : memref<16x528xf32, #tpu.memory_space<vmem>>, vector<8x196xf32>
    %cst_202 = arith.constant dense<0.000000e+00> : vector<16x196xf32>
    %212 = tpu.matmul %210, %211, %cst_202 {dimension_numbers = #tpu.dot_dimension_numbers<[1], [0], [0], [1], [0, 0, 1, 1], [], []>} : vector<16x8xf32>, vector<8x196xf32>, vector<16x196xf32> -> vector<16x196xf32>
    %213 = arith.addf %209, %212 : vector<16x196xf32>
    %c0_203 = arith.constant 0 : index
    %c64_204 = arith.constant 64 : index
    %214 = vector.load %arg4[%c0_203, %c64_204] : memref<16x96xf32, #tpu.memory_space<vmem>>, vector<16x8xf32>
    %c0_205 = arith.constant 0 : index
    %c14 = arith.constant 14 : index
    %215 = vector.load %arg16[%c0_205, %c14] : memref<16x528xf32, #tpu.memory_space<vmem>>, vector<8x196xf32>
    %cst_206 = arith.constant dense<0.000000e+00> : vector<16x196xf32>
    %216 = tpu.matmul %214, %215, %cst_206 {dimension_numbers = #tpu.dot_dimension_numbers<[1], [0], [0], [1], [0, 0, 1, 1], [], []>} : vector<16x8xf32>, vector<8x196xf32>, vector<16x196xf32> -> vector<16x196xf32>
    %217 = arith.addf %213, %216 : vector<16x196xf32>
    %c0_207 = arith.constant 0 : index
    %c72_208 = arith.constant 72 : index
    %218 = vector.load %arg4[%c0_207, %c72_208] : memref<16x96xf32, #tpu.memory_space<vmem>>, vector<16x8xf32>
    %c0_209 = arith.constant 0 : index
    %c18_210 = arith.constant 18 : index
    %219 = vector.load %arg16[%c0_209, %c18_210] : memref<16x528xf32, #tpu.memory_space<vmem>>, vector<8x196xf32>
    %cst_211 = arith.constant dense<0.000000e+00> : vector<16x196xf32>
    %220 = tpu.matmul %218, %219, %cst_211 {dimension_numbers = #tpu.dot_dimension_numbers<[1], [0], [0], [1], [0, 0, 1, 1], [], []>} : vector<16x8xf32>, vector<8x196xf32>, vector<16x196xf32> -> vector<16x196xf32>
    %221 = arith.addf %217, %220 : vector<16x196xf32>
    %c0_212 = arith.constant 0 : index
    %c80_213 = arith.constant 80 : index
    %222 = vector.load %arg4[%c0_212, %c80_213] : memref<16x96xf32, #tpu.memory_space<vmem>>, vector<16x8xf32>
    %c0_214 = arith.constant 0 : index
    %c19 = arith.constant 19 : index
    %223 = vector.load %arg16[%c0_214, %c19] : memref<16x528xf32, #tpu.memory_space<vmem>>, vector<8x196xf32>
    %cst_215 = arith.constant dense<0.000000e+00> : vector<16x196xf32>
    %224 = tpu.matmul %222, %223, %cst_215 {dimension_numbers = #tpu.dot_dimension_numbers<[1], [0], [0], [1], [0, 0, 1, 1], [], []>} : vector<16x8xf32>, vector<8x196xf32>, vector<16x196xf32> -> vector<16x196xf32>
    %225 = arith.addf %221, %224 : vector<16x196xf32>
    %c0_216 = arith.constant 0 : index
    %c88 = arith.constant 88 : index
    %226 = vector.load %arg4[%c0_216, %c88] : memref<16x96xf32, #tpu.memory_space<vmem>>, vector<16x8xf32>
    %c0_217 = arith.constant 0 : index
    %c20_218 = arith.constant 20 : index
    %227 = vector.load %arg16[%c0_217, %c20_218] : memref<16x528xf32, #tpu.memory_space<vmem>>, vector<8x196xf32>
    %cst_219 = arith.constant dense<0.000000e+00> : vector<16x196xf32>
    %228 = tpu.matmul %226, %227, %cst_219 {dimension_numbers = #tpu.dot_dimension_numbers<[1], [0], [0], [1], [0, 0, 1, 1], [], []>} : vector<16x8xf32>, vector<8x196xf32>, vector<16x196xf32> -> vector<16x196xf32>
    %229 = arith.addf %225, %228 : vector<16x196xf32>
    %c0_220 = arith.constant 0 : index
    %c0_221 = arith.constant 0 : index
    %230 = vector.load %arg17[%c0_220, %c0_221] : memref<32x502xf32, #tpu.memory_space<vmem>>, vector<16x196xf32>
    tpu.vector_store %arg17[%c0_220, %c0_221], %229 {strides = array<i32>} : memref<32x502xf32, #tpu.memory_space<vmem>>, vector<16x196xf32>,
    %c0_222 = arith.constant 0 : index
    %c0_223 = arith.constant 0 : index
    %231 = vector.load %arg17[%c0_222, %c0_223] : memref<32x502xf32, #tpu.memory_space<vmem>>, vector<16x4xf32>
    %c0_224 = arith.constant 0 : index
    %c0_225 = arith.constant 0 : index
    %232 = vector.load %arg18[%c0_224, %c0_225] : memref<32x512xf32, #tpu.memory_space<vmem>>, vector<16x4xf32>
    tpu.vector_store %arg18[%c0_224, %c0_225], %231 {strides = array<i32>} : memref<32x512xf32, #tpu.memory_space<vmem>>, vector<16x4xf32>,
    %c0_226 = arith.constant 0 : index
    %c12_227 = arith.constant 12 : index
    %233 = vector.load %arg17[%c0_226, %c12_227] : memref<32x502xf32, #tpu.memory_space<vmem>>, vector<16x4xf32>
    %c0_228 = arith.constant 0 : index
    %c4_229 = arith.constant 4 : index
    %234 = vector.load %arg18[%c0_228, %c4_229] : memref<32x512xf32, #tpu.memory_space<vmem>>, vector<16x4xf32>
    tpu.vector_store %arg18[%c0_228, %c4_229], %233 {strides = array<i32>} : memref<32x512xf32, #tpu.memory_space<vmem>>, vector<16x4xf32>,
    %c0_230 = arith.constant 0 : index
    %c24_231 = arith.constant 24 : index
    %235 = vector.load %arg17[%c0_230, %c24_231] : memref<32x502xf32, #tpu.memory_space<vmem>>, vector<16x4xf32>
    %c0_232 = arith.constant 0 : index
    %c8_233 = arith.constant 8 : index
    %236 = vector.load %arg18[%c0_232, %c8_233] : memref<32x512xf32, #tpu.memory_space<vmem>>, vector<16x4xf32>
    tpu.vector_store %arg18[%c0_232, %c8_233], %235 {strides = array<i32>} : memref<32x512xf32, #tpu.memory_space<vmem>>, vector<16x4xf32>,
    %c0_234 = arith.constant 0 : index
    %c36_235 = arith.constant 36 : index
    %237 = vector.load %arg17[%c0_234, %c36_235] : memref<32x502xf32, #tpu.memory_space<vmem>>, vector<16x4xf32>
    %c0_236 = arith.constant 0 : index
    %c12_237 = arith.constant 12 : index
    %238 = vector.load %arg18[%c0_236, %c12_237] : memref<32x512xf32, #tpu.memory_space<vmem>>, vector<16x4xf32>
    tpu.vector_store %arg18[%c0_236, %c12_237], %237 {strides = array<i32>} : memref<32x512xf32, #tpu.memory_space<vmem>>, vector<16x4xf32>,
    %c0_238 = arith.constant 0 : index
    %c48_239 = arith.constant 48 : index
    %239 = vector.load %arg17[%c0_238, %c48_239] : memref<32x502xf32, #tpu.memory_space<vmem>>, vector<16x4xf32>
    %c0_240 = arith.constant 0 : index
    %c16_241 = arith.constant 16 : index
    %240 = vector.load %arg18[%c0_240, %c16_241] : memref<32x512xf32, #tpu.memory_space<vmem>>, vector<16x4xf32>
    tpu.vector_store %arg18[%c0_240, %c16_241], %239 {strides = array<i32>} : memref<32x512xf32, #tpu.memory_space<vmem>>, vector<16x4xf32>,
    %c0_242 = arith.constant 0 : index
    %c60_243 = arith.constant 60 : index
    %241 = vector.load %arg17[%c0_242, %c60_243] : memref<32x502xf32, #tpu.memory_space<vmem>>, vector<16x4xf32>
    %c0_244 = arith.constant 0 : index
    %c20_245 = arith.constant 20 : index
    %242 = vector.load %arg18[%c0_244, %c20_245] : memref<32x512xf32, #tpu.memory_space<vmem>>, vector<16x4xf32>
    tpu.vector_store %arg18[%c0_244, %c20_245], %241 {strides = array<i32>} : memref<32x512xf32, #tpu.memory_space<vmem>>, vector<16x4xf32>,
    %c0_246 = arith.constant 0 : index
    %c72_247 = arith.constant 72 : index
    %243 = vector.load %arg17[%c0_246, %c72_247] : memref<32x502xf32, #tpu.memory_space<vmem>>, vector<16x4xf32>
    %c0_248 = arith.constant 0 : index
    %c24_249 = arith.constant 24 : index
    %244 = vector.load %arg18[%c0_248, %c24_249] : memref<32x512xf32, #tpu.memory_space<vmem>>, vector<16x4xf32>
    tpu.vector_store %arg18[%c0_248, %c24_249], %243 {strides = array<i32>} : memref<32x512xf32, #tpu.memory_space<vmem>>, vector<16x4xf32>,
    %c0_250 = arith.constant 0 : index
    %c84_251 = arith.constant 84 : index
    %245 = vector.load %arg17[%c0_250, %c84_251] : memref<32x502xf32, #tpu.memory_space<vmem>>, vector<16x4xf32>
    %c0_252 = arith.constant 0 : index
    %c28_253 = arith.constant 28 : index
    %246 = vector.load %arg18[%c0_252, %c28_253] : memref<32x512xf32, #tpu.memory_space<vmem>>, vector<16x4xf32>
    tpu.vector_store %arg18[%c0_252, %c28_253], %245 {strides = array<i32>} : memref<32x512xf32, #tpu.memory_space<vmem>>, vector<16x4xf32>,
    %c0_254 = arith.constant 0 : index
    %c96_255 = arith.constant 96 : index
    %247 = vector.load %arg17[%c0_254, %c96_255] : memref<32x502xf32, #tpu.memory_space<vmem>>, vector<16x4xf32>
    %c0_256 = arith.constant 0 : index
    %c32_257 = arith.constant 32 : index
    %248 = vector.load %arg18[%c0_256, %c32_257] : memref<32x512xf32, #tpu.memory_space<vmem>>, vector<16x4xf32>
    tpu.vector_store %arg18[%c0_256, %c32_257], %247 {strides = array<i32>} : memref<32x512xf32, #tpu.memory_space<vmem>>, vector<16x4xf32>,
    %c0_258 = arith.constant 0 : index
    %c108_259 = arith.constant 108 : index
    %249 = vector.load %arg17[%c0_258, %c108_259] : memref<32x502xf32, #tpu.memory_space<vmem>>, vector<16x4xf32>
    %c0_260 = arith.constant 0 : index
    %c36_261 = arith.constant 36 : index
    %250 = vector.load %arg18[%c0_260, %c36_261] : memref<32x512xf32, #tpu.memory_space<vmem>>, vector<16x4xf32>
    tpu.vector_store %arg18[%c0_260, %c36_261], %249 {strides = array<i32>} : memref<32x512xf32, #tpu.memory_space<vmem>>, vector<16x4xf32>,
    %c0_262 = arith.constant 0 : index
    %c120_263 = arith.constant 120 : index
    %251 = vector.load %arg17[%c0_262, %c120_263] : memref<32x502xf32, #tpu.memory_space<vmem>>, vector<16x4xf32>
    %c0_264 = arith.constant 0 : index
    %c40_265 = arith.constant 40 : index
    %252 = vector.load %arg18[%c0_264, %c40_265] : memref<32x512xf32, #tpu.memory_space<vmem>>, vector<16x4xf32>
    tpu.vector_store %arg18[%c0_264, %c40_265], %251 {strides = array<i32>} : memref<32x512xf32, #tpu.memory_space<vmem>>, vector<16x4xf32>,
    %c0_266 = arith.constant 0 : index
    %c132_267 = arith.constant 132 : index
    %253 = vector.load %arg17[%c0_266, %c132_267] : memref<32x502xf32, #tpu.memory_space<vmem>>, vector<16x4xf32>
    %c0_268 = arith.constant 0 : index
    %c44_269 = arith.constant 44 : index
    %254 = vector.load %arg18[%c0_268, %c44_269] : memref<32x512xf32, #tpu.memory_space<vmem>>, vector<16x4xf32>
    tpu.vector_store %arg18[%c0_268, %c44_269], %253 {strides = array<i32>} : memref<32x512xf32, #tpu.memory_space<vmem>>, vector<16x4xf32>,
    %c0_270 = arith.constant 0 : index
    %c144_271 = arith.constant 144 : index
    %255 = vector.load %arg17[%c0_270, %c144_271] : memref<32x502xf32, #tpu.memory_space<vmem>>, vector<16x4xf32>
    %c0_272 = arith.constant 0 : index
    %c48_273 = arith.constant 48 : index
    %256 = vector.load %arg18[%c0_272, %c48_273] : memref<32x512xf32, #tpu.memory_space<vmem>>, vector<16x4xf32>
    tpu.vector_store %arg18[%c0_272, %c48_273], %255 {strides = array<i32>} : memref<32x512xf32, #tpu.memory_space<vmem>>, vector<16x4xf32>,
    %c0_274 = arith.constant 0 : index
    %c156_275 = arith.constant 156 : index
    %257 = vector.load %arg17[%c0_274, %c156_275] : memref<32x502xf32, #tpu.memory_space<vmem>>, vector<16x4xf32>
    %c0_276 = arith.constant 0 : index
    %c52 = arith.constant 52 : index
    %258 = vector.load %arg18[%c0_276, %c52] : memref<32x512xf32, #tpu.memory_space<vmem>>, vector<16x4xf32>
    tpu.vector_store %arg18[%c0_276, %c52], %257 {strides = array<i32>} : memref<32x512xf32, #tpu.memory_space<vmem>>, vector<16x4xf32>,
    %c0_277 = arith.constant 0 : index
    %c168_278 = arith.constant 168 : index
    %259 = vector.load %arg17[%c0_277, %c168_278] : memref<32x502xf32, #tpu.memory_space<vmem>>, vector<16x4xf32>
    %c0_279 = arith.constant 0 : index
    %c56_280 = arith.constant 56 : index
    %260 = vector.load %arg18[%c0_279, %c56_280] : memref<32x512xf32, #tpu.memory_space<vmem>>, vector<16x4xf32>
    tpu.vector_store %arg18[%c0_279, %c56_280], %259 {strides = array<i32>} : memref<32x512xf32, #tpu.memory_space<vmem>>, vector<16x4xf32>,
    %c0_281 = arith.constant 0 : index
    %c180_282 = arith.constant 180 : index
    %261 = vector.load %arg17[%c0_281, %c180_282] : memref<32x502xf32, #tpu.memory_space<vmem>>, vector<16x4xf32>
    %c0_283 = arith.constant 0 : index
    %c60_284 = arith.constant 60 : index
    %262 = vector.load %arg18[%c0_283, %c60_284] : memref<32x512xf32, #tpu.memory_space<vmem>>, vector<16x4xf32>
    tpu.vector_store %arg18[%c0_283, %c60_284], %261 {strides = array<i32>} : memref<32x512xf32, #tpu.memory_space<vmem>>, vector<16x4xf32>,
    %c0_285 = arith.constant 0 : index
    %c192_286 = arith.constant 192 : index
    %263 = vector.load %arg17[%c0_285, %c192_286] : memref<32x502xf32, #tpu.memory_space<vmem>>, vector<16x4xf32>
    %c0_287 = arith.constant 0 : index
    %c64_288 = arith.constant 64 : index
    %264 = vector.load %arg18[%c0_287, %c64_288] : memref<32x512xf32, #tpu.memory_space<vmem>>, vector<16x4xf32>
    tpu.vector_store %arg18[%c0_287, %c64_288], %263 {strides = array<i32>} : memref<32x512xf32, #tpu.memory_space<vmem>>, vector<16x4xf32>,
    %c0_289 = arith.constant 0 : index
    %c0_290 = arith.constant 0 : index
    %265 = vector.load %arg18[%c0_289, %c0_290] : memref<32x512xf32, #tpu.memory_space<vmem>>, vector<16x68xf32>
    %c0_291 = arith.constant 0 : index
    %c0_292 = arith.constant 0 : index
    %266 = vector.load %arg11[%c0_291, %c0_292] : memref<16x68xf32, #tpu.memory_space<vmem>>, vector<16x68xf32>
    %c0_293 = arith.constant 0 : index
    %c0_294 = arith.constant 0 : index
    %267 = vector.load %arg12[%c0_293, %c0_294] : memref<16x68xf32, #tpu.memory_space<vmem>>, vector<16x68xf32>
    %268 = vector.shape_cast %265 : vector<16x68xf32> to vector<1x16x68xf32>
    %cst_295 = arith.constant dense<0.000000e+00> : vector<1xf32>
    %269 = vector.multi_reduction <add>, %268, %cst_295 [1, 2] : vector<1x16x68xf32> to vector<1xf32>
    %270 = vector.shape_cast %269 : vector<1xf32> to vector<1x1x1xf32>
    %271 = vector.extract %270[0, 0, 0] : f32 from vector<1x1x1xf32>
    %cst_296 = arith.constant 9.1911765E-4 : f32
    %272 = arith.mulf %271, %cst_296 : f32
    %273 = vector.broadcast %272 : f32 to vector<16x68xf32>
    %274 = arith.subf %265, %273 : vector<16x68xf32>
    %275 = arith.mulf %274, %274 : vector<16x68xf32>
    %276 = vector.shape_cast %275 : vector<16x68xf32> to vector<1x16x68xf32>
    %cst_297 = arith.constant dense<0.000000e+00> : vector<1xf32>
    %277 = vector.multi_reduction <add>, %276, %cst_297 [1, 2] : vector<1x16x68xf32> to vector<1xf32>
    %278 = vector.shape_cast %277 : vector<1xf32> to vector<1x1x1xf32>
    %279 = vector.extract %278[0, 0, 0] : f32 from vector<1x1x1xf32>
    %cst_298 = arith.constant 9.1911765E-4 : f32
    %280 = arith.mulf %279, %cst_298 : f32
    %cst_299 = arith.constant 9.99999974E-6 : f32
    %281 = arith.addf %280, %cst_299 : f32
    %282 = math.rsqrt %281 : f32
    %283 = vector.broadcast %282 : f32 to vector<16x68xf32>
    %284 = arith.mulf %274, %283 : vector<16x68xf32>
    %285 = arith.mulf %284, %266 : vector<16x68xf32>
    %286 = arith.addf %285, %267 : vector<16x68xf32>
    %cst_300 = arith.constant 0.000000e+00 : f32
    %287 = vector.broadcast %cst_300 : f32 to vector<16x68xf32>
    %288 = arith.cmpf ogt, %286, %287 : vector<16x68xf32>
    %cst_301 = arith.constant 2.000000e-01 : f32
    %289 = vector.broadcast %cst_301 : f32 to vector<16x68xf32>
    %290 = arith.mulf %289, %286 : vector<16x68xf32>
    %291 = arith.select %288, %286, %290 : vector<16x68xi1>, vector<16x68xf32>
    %c0_302 = arith.constant 0 : index
    %c0_303 = arith.constant 0 : index
    %292 = vector.load %arg18[%c0_302, %c0_303] : memref<32x512xf32, #tpu.memory_space<vmem>>, vector<16x68xf32>
    tpu.vector_store %arg18[%c0_302, %c0_303], %291 {strides = array<i32>} : memref<32x512xf32, #tpu.memory_space<vmem>>, vector<16x68xf32>,
    %cst_304 = arith.constant 0.000000e+00 : f32
    %293 = vector.broadcast %cst_304 : f32 to vector<16x114xf32>
    %c0_305 = arith.constant 0 : index
    %c0_306 = arith.constant 0 : index
    %294 = vector.load %arg16[%c0_305, %c0_306] : memref<16x528xf32, #tpu.memory_space<vmem>>, vector<16x114xf32>
    tpu.vector_store %arg16[%c0_305, %c0_306], %293 {strides = array<i32>} : memref<16x528xf32, #tpu.memory_space<vmem>>, vector<16x114xf32>,
    %c0_307 = arith.constant 0 : index
    %c0_308 = arith.constant 0 : index
    %295 = vector.load %arg18[%c0_307, %c0_308] : memref<32x512xf32, #tpu.memory_space<vmem>>, vector<16x4xf32>
    %c0_309 = arith.constant 0 : index
    %c7_310 = arith.constant 7 : index
    %296 = vector.load %arg16[%c0_309, %c7_310] : memref<16x528xf32, #tpu.memory_space<vmem>>, vector<16x4xf32>
    tpu.vector_store %arg16[%c0_309, %c7_310], %295 {strides = array<i32>} : memref<16x528xf32, #tpu.memory_space<vmem>>, vector<16x4xf32>,
    %c0_311 = arith.constant 0 : index
    %c4_312 = arith.constant 4 : index
    %297 = vector.load %arg18[%c0_311, %c4_312] : memref<32x512xf32, #tpu.memory_space<vmem>>, vector<16x4xf32>
    %c0_313 = arith.constant 0 : index
    %c13_314 = arith.constant 13 : index
    %298 = vector.load %arg16[%c0_313, %c13_314] : memref<16x528xf32, #tpu.memory_space<vmem>>, vector<16x4xf32>
    tpu.vector_store %arg16[%c0_313, %c13_314], %297 {strides = array<i32>} : memref<16x528xf32, #tpu.memory_space<vmem>>, vector<16x4xf32>,
    %c0_315 = arith.constant 0 : index
    %c8_316 = arith.constant 8 : index
    %299 = vector.load %arg18[%c0_315, %c8_316] : memref<32x512xf32, #tpu.memory_space<vmem>>, vector<16x4xf32>
    %c0_317 = arith.constant 0 : index
    %c19_318 = arith.constant 19 : index
    %300 = vector.load %arg16[%c0_317, %c19_318] : memref<16x528xf32, #tpu.memory_space<vmem>>, vector<16x4xf32>
    tpu.vector_store %arg16[%c0_317, %c19_318], %299 {strides = array<i32>} : memref<16x528xf32, #tpu.memory_space<vmem>>, vector<16x4xf32>,
    %c0_319 = arith.constant 0 : index
    %c12_320 = arith.constant 12 : index
    %301 = vector.load %arg18[%c0_319, %c12_320] : memref<32x512xf32, #tpu.memory_space<vmem>>, vector<16x4xf32>
    %c0_321 = arith.constant 0 : index
    %c25_322 = arith.constant 25 : index
    %302 = vector.load %arg16[%c0_321, %c25_322] : memref<16x528xf32, #tpu.memory_space<vmem>>, vector<16x4xf32>
    tpu.vector_store %arg16[%c0_321, %c25_322], %301 {strides = array<i32>} : memref<16x528xf32, #tpu.memory_space<vmem>>, vector<16x4xf32>,
    %c0_323 = arith.constant 0 : index
    %c16_324 = arith.constant 16 : index
    %303 = vector.load %arg18[%c0_323, %c16_324] : memref<32x512xf32, #tpu.memory_space<vmem>>, vector<16x4xf32>
    %c0_325 = arith.constant 0 : index
    %c31 = arith.constant 31 : index
    %304 = vector.load %arg16[%c0_325, %c31] : memref<16x528xf32, #tpu.memory_space<vmem>>, vector<16x4xf32>
    tpu.vector_store %arg16[%c0_325, %c31], %303 {strides = array<i32>} : memref<16x528xf32, #tpu.memory_space<vmem>>, vector<16x4xf32>,
    %c0_326 = arith.constant 0 : index
    %c20_327 = arith.constant 20 : index
    %305 = vector.load %arg18[%c0_326, %c20_327] : memref<32x512xf32, #tpu.memory_space<vmem>>, vector<16x4xf32>
    %c0_328 = arith.constant 0 : index
    %c37 = arith.constant 37 : index
    %306 = vector.load %arg16[%c0_328, %c37] : memref<16x528xf32, #tpu.memory_space<vmem>>, vector<16x4xf32>
    tpu.vector_store %arg16[%c0_328, %c37], %305 {strides = array<i32>} : memref<16x528xf32, #tpu.memory_space<vmem>>, vector<16x4xf32>,
    %c0_329 = arith.constant 0 : index
    %c24_330 = arith.constant 24 : index
    %307 = vector.load %arg18[%c0_329, %c24_330] : memref<32x512xf32, #tpu.memory_space<vmem>>, vector<16x4xf32>
    %c0_331 = arith.constant 0 : index
    %c43 = arith.constant 43 : index
    %308 = vector.load %arg16[%c0_331, %c43] : memref<16x528xf32, #tpu.memory_space<vmem>>, vector<16x4xf32>
    tpu.vector_store %arg16[%c0_331, %c43], %307 {strides = array<i32>} : memref<16x528xf32, #tpu.memory_space<vmem>>, vector<16x4xf32>,
    %c0_332 = arith.constant 0 : index
    %c28_333 = arith.constant 28 : index
    %309 = vector.load %arg18[%c0_332, %c28_333] : memref<32x512xf32, #tpu.memory_space<vmem>>, vector<16x4xf32>
    %c0_334 = arith.constant 0 : index
    %c49 = arith.constant 49 : index
    %310 = vector.load %arg16[%c0_334, %c49] : memref<16x528xf32, #tpu.memory_space<vmem>>, vector<16x4xf32>
    tpu.vector_store %arg16[%c0_334, %c49], %309 {strides = array<i32>} : memref<16x528xf32, #tpu.memory_space<vmem>>, vector<16x4xf32>,
    %c0_335 = arith.constant 0 : index
    %c32_336 = arith.constant 32 : index
    %311 = vector.load %arg18[%c0_335, %c32_336] : memref<32x512xf32, #tpu.memory_space<vmem>>, vector<16x4xf32>
    %c0_337 = arith.constant 0 : index
    %c55 = arith.constant 55 : index
    %312 = vector.load %arg16[%c0_337, %c55] : memref<16x528xf32, #tpu.memory_space<vmem>>, vector<16x4xf32>
    tpu.vector_store %arg16[%c0_337, %c55], %311 {strides = array<i32>} : memref<16x528xf32, #tpu.memory_space<vmem>>, vector<16x4xf32>,
    %c0_338 = arith.constant 0 : index
    %c36_339 = arith.constant 36 : index
    %313 = vector.load %arg18[%c0_338, %c36_339] : memref<32x512xf32, #tpu.memory_space<vmem>>, vector<16x4xf32>
    %c0_340 = arith.constant 0 : index
    %c61 = arith.constant 61 : index
    %314 = vector.load %arg16[%c0_340, %c61] : memref<16x528xf32, #tpu.memory_space<vmem>>, vector<16x4xf32>
    tpu.vector_store %arg16[%c0_340, %c61], %313 {strides = array<i32>} : memref<16x528xf32, #tpu.memory_space<vmem>>, vector<16x4xf32>,
    %c0_341 = arith.constant 0 : index
    %c40_342 = arith.constant 40 : index
    %315 = vector.load %arg18[%c0_341, %c40_342] : memref<32x512xf32, #tpu.memory_space<vmem>>, vector<16x4xf32>
    %c0_343 = arith.constant 0 : index
    %c67 = arith.constant 67 : index
    %316 = vector.load %arg16[%c0_343, %c67] : memref<16x528xf32, #tpu.memory_space<vmem>>, vector<16x4xf32>
    tpu.vector_store %arg16[%c0_343, %c67], %315 {strides = array<i32>} : memref<16x528xf32, #tpu.memory_space<vmem>>, vector<16x4xf32>,
    %c0_344 = arith.constant 0 : index
    %c44_345 = arith.constant 44 : index
    %317 = vector.load %arg18[%c0_344, %c44_345] : memref<32x512xf32, #tpu.memory_space<vmem>>, vector<16x4xf32>
    %c0_346 = arith.constant 0 : index
    %c73 = arith.constant 73 : index
    %318 = vector.load %arg16[%c0_346, %c73] : memref<16x528xf32, #tpu.memory_space<vmem>>, vector<16x4xf32>
    tpu.vector_store %arg16[%c0_346, %c73], %317 {strides = array<i32>} : memref<16x528xf32, #tpu.memory_space<vmem>>, vector<16x4xf32>,
    %c0_347 = arith.constant 0 : index
    %c48_348 = arith.constant 48 : index
    %319 = vector.load %arg18[%c0_347, %c48_348] : memref<32x512xf32, #tpu.memory_space<vmem>>, vector<16x4xf32>
    %c0_349 = arith.constant 0 : index
    %c79 = arith.constant 79 : index
    %320 = vector.load %arg16[%c0_349, %c79] : memref<16x528xf32, #tpu.memory_space<vmem>>, vector<16x4xf32>
    tpu.vector_store %arg16[%c0_349, %c79], %319 {strides = array<i32>} : memref<16x528xf32, #tpu.memory_space<vmem>>, vector<16x4xf32>,
    %c0_350 = arith.constant 0 : index
    %c52_351 = arith.constant 52 : index
    %321 = vector.load %arg18[%c0_350, %c52_351] : memref<32x512xf32, #tpu.memory_space<vmem>>, vector<16x4xf32>
    %c0_352 = arith.constant 0 : index
    %c85 = arith.constant 85 : index
    %322 = vector.load %arg16[%c0_352, %c85] : memref<16x528xf32, #tpu.memory_space<vmem>>, vector<16x4xf32>
    tpu.vector_store %arg16[%c0_352, %c85], %321 {strides = array<i32>} : memref<16x528xf32, #tpu.memory_space<vmem>>, vector<16x4xf32>,
    %c0_353 = arith.constant 0 : index
    %c56_354 = arith.constant 56 : index
    %323 = vector.load %arg18[%c0_353, %c56_354] : memref<32x512xf32, #tpu.memory_space<vmem>>, vector<16x4xf32>
    %c0_355 = arith.constant 0 : index
    %c91 = arith.constant 91 : index
    %324 = vector.load %arg16[%c0_355, %c91] : memref<16x528xf32, #tpu.memory_space<vmem>>, vector<16x4xf32>
    tpu.vector_store %arg16[%c0_355, %c91], %323 {strides = array<i32>} : memref<16x528xf32, #tpu.memory_space<vmem>>, vector<16x4xf32>,
    %c0_356 = arith.constant 0 : index
    %c60_357 = arith.constant 60 : index
    %325 = vector.load %arg18[%c0_356, %c60_357] : memref<32x512xf32, #tpu.memory_space<vmem>>, vector<16x4xf32>
    %c0_358 = arith.constant 0 : index
    %c97 = arith.constant 97 : index
    %326 = vector.load %arg16[%c0_358, %c97] : memref<16x528xf32, #tpu.memory_space<vmem>>, vector<16x4xf32>
    tpu.vector_store %arg16[%c0_358, %c97], %325 {strides = array<i32>} : memref<16x528xf32, #tpu.memory_space<vmem>>, vector<16x4xf32>,
    %c0_359 = arith.constant 0 : index
    %c64_360 = arith.constant 64 : index
    %327 = vector.load %arg18[%c0_359, %c64_360] : memref<32x512xf32, #tpu.memory_space<vmem>>, vector<16x4xf32>
    %c0_361 = arith.constant 0 : index
    %c103 = arith.constant 103 : index
    %328 = vector.load %arg16[%c0_361, %c103] : memref<16x528xf32, #tpu.memory_space<vmem>>, vector<16x4xf32>
    tpu.vector_store %arg16[%c0_361, %c103], %327 {strides = array<i32>} : memref<16x528xf32, #tpu.memory_space<vmem>>, vector<16x4xf32>,
    %cst_362 = arith.constant 0.000000e+00 : f32
    %329 = vector.broadcast %cst_362 : f32 to vector<32x63xf32>
    %c0_363 = arith.constant 0 : index
    %c0_364 = arith.constant 0 : index
    %330 = vector.load %arg5[%c0_363, %c0_364] : memref<32x512xf32, #tpu.memory_space<vmem>>, vector<32x16xf32>
    %c0_365 = arith.constant 0 : index
    %c0_366 = arith.constant 0 : index
    %331 = vector.load %arg16[%c0_365, %c0_366] : memref<16x528xf32, #tpu.memory_space<vmem>>, vector<16x63xf32>
    %cst_367 = arith.constant dense<0.000000e+00> : vector<32x63xf32>
    %332 = tpu.matmul %330, %331, %cst_367 {dimension_numbers = #tpu.dot_dimension_numbers<[1], [0], [0], [1], [0, 0, 1, 1], [], []>} : vector<32x16xf32>, vector<16x63xf32>, vector<32x63xf32> -> vector<32x63xf32>
    %333 = arith.addf %329, %332 : vector<32x63xf32>
    %c0_368 = arith.constant 0 : index
    %c16_369 = arith.constant 16 : index
    %334 = vector.load %arg5[%c0_368, %c16_369] : memref<32x512xf32, #tpu.memory_space<vmem>>, vector<32x16xf32>
    %c0_370 = arith.constant 0 : index
    %c1_371 = arith.constant 1 : index
    %335 = vector.load %arg16[%c0_370, %c1_371] : memref<16x528xf32, #tpu.memory_space<vmem>>, vector<16x63xf32>
    %cst_372 = arith.constant dense<0.000000e+00> : vector<32x63xf32>
    %336 = tpu.matmul %334, %335, %cst_372 {dimension_numbers = #tpu.dot_dimension_numbers<[1], [0], [0], [1], [0, 0, 1, 1], [], []>} : vector<32x16xf32>, vector<16x63xf32>, vector<32x63xf32> -> vector<32x63xf32>
    %337 = arith.addf %333, %336 : vector<32x63xf32>
    %c0_373 = arith.constant 0 : index
    %c32_374 = arith.constant 32 : index
    %338 = vector.load %arg5[%c0_373, %c32_374] : memref<32x512xf32, #tpu.memory_space<vmem>>, vector<32x16xf32>
    %c0_375 = arith.constant 0 : index
    %c2_376 = arith.constant 2 : index
    %339 = vector.load %arg16[%c0_375, %c2_376] : memref<16x528xf32, #tpu.memory_space<vmem>>, vector<16x63xf32>
    %cst_377 = arith.constant dense<0.000000e+00> : vector<32x63xf32>
    %340 = tpu.matmul %338, %339, %cst_377 {dimension_numbers = #tpu.dot_dimension_numbers<[1], [0], [0], [1], [0, 0, 1, 1], [], []>} : vector<32x16xf32>, vector<16x63xf32>, vector<32x63xf32> -> vector<32x63xf32>
    %341 = arith.addf %337, %340 : vector<32x63xf32>
    %c0_378 = arith.constant 0 : index
    %c48_379 = arith.constant 48 : index
    %342 = vector.load %arg5[%c0_378, %c48_379] : memref<32x512xf32, #tpu.memory_space<vmem>>, vector<32x16xf32>
    %c0_380 = arith.constant 0 : index
    %c3 = arith.constant 3 : index
    %343 = vector.load %arg16[%c0_380, %c3] : memref<16x528xf32, #tpu.memory_space<vmem>>, vector<16x63xf32>
    %cst_381 = arith.constant dense<0.000000e+00> : vector<32x63xf32>
    %344 = tpu.matmul %342, %343, %cst_381 {dimension_numbers = #tpu.dot_dimension_numbers<[1], [0], [0], [1], [0, 0, 1, 1], [], []>} : vector<32x16xf32>, vector<16x63xf32>, vector<32x63xf32> -> vector<32x63xf32>
    %345 = arith.addf %341, %344 : vector<32x63xf32>
    %c0_382 = arith.constant 0 : index
    %c64_383 = arith.constant 64 : index
    %346 = vector.load %arg5[%c0_382, %c64_383] : memref<32x512xf32, #tpu.memory_space<vmem>>, vector<32x16xf32>
    %c0_384 = arith.constant 0 : index
    %c6_385 = arith.constant 6 : index
    %347 = vector.load %arg16[%c0_384, %c6_385] : memref<16x528xf32, #tpu.memory_space<vmem>>, vector<16x63xf32>
    %cst_386 = arith.constant dense<0.000000e+00> : vector<32x63xf32>
    %348 = tpu.matmul %346, %347, %cst_386 {dimension_numbers = #tpu.dot_dimension_numbers<[1], [0], [0], [1], [0, 0, 1, 1], [], []>} : vector<32x16xf32>, vector<16x63xf32>, vector<32x63xf32> -> vector<32x63xf32>
    %349 = arith.addf %345, %348 : vector<32x63xf32>
    %c0_387 = arith.constant 0 : index
    %c80_388 = arith.constant 80 : index
    %350 = vector.load %arg5[%c0_387, %c80_388] : memref<32x512xf32, #tpu.memory_space<vmem>>, vector<32x16xf32>
    %c0_389 = arith.constant 0 : index
    %c7_390 = arith.constant 7 : index
    %351 = vector.load %arg16[%c0_389, %c7_390] : memref<16x528xf32, #tpu.memory_space<vmem>>, vector<16x63xf32>
    %cst_391 = arith.constant dense<0.000000e+00> : vector<32x63xf32>
    %352 = tpu.matmul %350, %351, %cst_391 {dimension_numbers = #tpu.dot_dimension_numbers<[1], [0], [0], [1], [0, 0, 1, 1], [], []>} : vector<32x16xf32>, vector<16x63xf32>, vector<32x63xf32> -> vector<32x63xf32>
    %353 = arith.addf %349, %352 : vector<32x63xf32>
    %c0_392 = arith.constant 0 : index
    %c96_393 = arith.constant 96 : index
    %354 = vector.load %arg5[%c0_392, %c96_393] : memref<32x512xf32, #tpu.memory_space<vmem>>, vector<32x16xf32>
    %c0_394 = arith.constant 0 : index
    %c8_395 = arith.constant 8 : index
    %355 = vector.load %arg16[%c0_394, %c8_395] : memref<16x528xf32, #tpu.memory_space<vmem>>, vector<16x63xf32>
    %cst_396 = arith.constant dense<0.000000e+00> : vector<32x63xf32>
    %356 = tpu.matmul %354, %355, %cst_396 {dimension_numbers = #tpu.dot_dimension_numbers<[1], [0], [0], [1], [0, 0, 1, 1], [], []>} : vector<32x16xf32>, vector<16x63xf32>, vector<32x63xf32> -> vector<32x63xf32>
    %357 = arith.addf %353, %356 : vector<32x63xf32>
    %c0_397 = arith.constant 0 : index
    %c112_398 = arith.constant 112 : index
    %358 = vector.load %arg5[%c0_397, %c112_398] : memref<32x512xf32, #tpu.memory_space<vmem>>, vector<32x16xf32>
    %c0_399 = arith.constant 0 : index
    %c9_400 = arith.constant 9 : index
    %359 = vector.load %arg16[%c0_399, %c9_400] : memref<16x528xf32, #tpu.memory_space<vmem>>, vector<16x63xf32>
    %cst_401 = arith.constant dense<0.000000e+00> : vector<32x63xf32>
    %360 = tpu.matmul %358, %359, %cst_401 {dimension_numbers = #tpu.dot_dimension_numbers<[1], [0], [0], [1], [0, 0, 1, 1], [], []>} : vector<32x16xf32>, vector<16x63xf32>, vector<32x63xf32> -> vector<32x63xf32>
    %361 = arith.addf %357, %360 : vector<32x63xf32>
    %c0_402 = arith.constant 0 : index
    %c128_403 = arith.constant 128 : index
    %362 = vector.load %arg5[%c0_402, %c128_403] : memref<32x512xf32, #tpu.memory_space<vmem>>, vector<32x16xf32>
    %c0_404 = arith.constant 0 : index
    %c12_405 = arith.constant 12 : index
    %363 = vector.load %arg16[%c0_404, %c12_405] : memref<16x528xf32, #tpu.memory_space<vmem>>, vector<16x63xf32>
    %cst_406 = arith.constant dense<0.000000e+00> : vector<32x63xf32>
    %364 = tpu.matmul %362, %363, %cst_406 {dimension_numbers = #tpu.dot_dimension_numbers<[1], [0], [0], [1], [0, 0, 1, 1], [], []>} : vector<32x16xf32>, vector<16x63xf32>, vector<32x63xf32> -> vector<32x63xf32>
    %365 = arith.addf %361, %364 : vector<32x63xf32>
    %c0_407 = arith.constant 0 : index
    %c144_408 = arith.constant 144 : index
    %366 = vector.load %arg5[%c0_407, %c144_408] : memref<32x512xf32, #tpu.memory_space<vmem>>, vector<32x16xf32>
    %c0_409 = arith.constant 0 : index
    %c13_410 = arith.constant 13 : index
    %367 = vector.load %arg16[%c0_409, %c13_410] : memref<16x528xf32, #tpu.memory_space<vmem>>, vector<16x63xf32>
    %cst_411 = arith.constant dense<0.000000e+00> : vector<32x63xf32>
    %368 = tpu.matmul %366, %367, %cst_411 {dimension_numbers = #tpu.dot_dimension_numbers<[1], [0], [0], [1], [0, 0, 1, 1], [], []>} : vector<32x16xf32>, vector<16x63xf32>, vector<32x63xf32> -> vector<32x63xf32>
    %369 = arith.addf %365, %368 : vector<32x63xf32>
    %c0_412 = arith.constant 0 : index
    %c160_413 = arith.constant 160 : index
    %370 = vector.load %arg5[%c0_412, %c160_413] : memref<32x512xf32, #tpu.memory_space<vmem>>, vector<32x16xf32>
    %c0_414 = arith.constant 0 : index
    %c14_415 = arith.constant 14 : index
    %371 = vector.load %arg16[%c0_414, %c14_415] : memref<16x528xf32, #tpu.memory_space<vmem>>, vector<16x63xf32>
    %cst_416 = arith.constant dense<0.000000e+00> : vector<32x63xf32>
    %372 = tpu.matmul %370, %371, %cst_416 {dimension_numbers = #tpu.dot_dimension_numbers<[1], [0], [0], [1], [0, 0, 1, 1], [], []>} : vector<32x16xf32>, vector<16x63xf32>, vector<32x63xf32> -> vector<32x63xf32>
    %373 = arith.addf %369, %372 : vector<32x63xf32>
    %c0_417 = arith.constant 0 : index
    %c176_418 = arith.constant 176 : index
    %374 = vector.load %arg5[%c0_417, %c176_418] : memref<32x512xf32, #tpu.memory_space<vmem>>, vector<32x16xf32>
    %c0_419 = arith.constant 0 : index
    %c15 = arith.constant 15 : index
    %375 = vector.load %arg16[%c0_419, %c15] : memref<16x528xf32, #tpu.memory_space<vmem>>, vector<16x63xf32>
    %cst_420 = arith.constant dense<0.000000e+00> : vector<32x63xf32>
    %376 = tpu.matmul %374, %375, %cst_420 {dimension_numbers = #tpu.dot_dimension_numbers<[1], [0], [0], [1], [0, 0, 1, 1], [], []>} : vector<32x16xf32>, vector<16x63xf32>, vector<32x63xf32> -> vector<32x63xf32>
    %377 = arith.addf %373, %376 : vector<32x63xf32>
    %c0_421 = arith.constant 0 : index
    %c192_422 = arith.constant 192 : index
    %378 = vector.load %arg5[%c0_421, %c192_422] : memref<32x512xf32, #tpu.memory_space<vmem>>, vector<32x16xf32>
    %c0_423 = arith.constant 0 : index
    %c18_424 = arith.constant 18 : index
    %379 = vector.load %arg16[%c0_423, %c18_424] : memref<16x528xf32, #tpu.memory_space<vmem>>, vector<16x63xf32>
    %cst_425 = arith.constant dense<0.000000e+00> : vector<32x63xf32>
    %380 = tpu.matmul %378, %379, %cst_425 {dimension_numbers = #tpu.dot_dimension_numbers<[1], [0], [0], [1], [0, 0, 1, 1], [], []>} : vector<32x16xf32>, vector<16x63xf32>, vector<32x63xf32> -> vector<32x63xf32>
    %381 = arith.addf %377, %380 : vector<32x63xf32>
    %c0_426 = arith.constant 0 : index
    %c208_427 = arith.constant 208 : index
    %382 = vector.load %arg5[%c0_426, %c208_427] : memref<32x512xf32, #tpu.memory_space<vmem>>, vector<32x16xf32>
    %c0_428 = arith.constant 0 : index
    %c19_429 = arith.constant 19 : index
    %383 = vector.load %arg16[%c0_428, %c19_429] : memref<16x528xf32, #tpu.memory_space<vmem>>, vector<16x63xf32>
    %cst_430 = arith.constant dense<0.000000e+00> : vector<32x63xf32>
    %384 = tpu.matmul %382, %383, %cst_430 {dimension_numbers = #tpu.dot_dimension_numbers<[1], [0], [0], [1], [0, 0, 1, 1], [], []>} : vector<32x16xf32>, vector<16x63xf32>, vector<32x63xf32> -> vector<32x63xf32>
    %385 = arith.addf %381, %384 : vector<32x63xf32>
    %c0_431 = arith.constant 0 : index
    %c224_432 = arith.constant 224 : index
    %386 = vector.load %arg5[%c0_431, %c224_432] : memref<32x512xf32, #tpu.memory_space<vmem>>, vector<32x16xf32>
    %c0_433 = arith.constant 0 : index
    %c20_434 = arith.constant 20 : index
    %387 = vector.load %arg16[%c0_433, %c20_434] : memref<16x528xf32, #tpu.memory_space<vmem>>, vector<16x63xf32>
    %cst_435 = arith.constant dense<0.000000e+00> : vector<32x63xf32>
    %388 = tpu.matmul %386, %387, %cst_435 {dimension_numbers = #tpu.dot_dimension_numbers<[1], [0], [0], [1], [0, 0, 1, 1], [], []>} : vector<32x16xf32>, vector<16x63xf32>, vector<32x63xf32> -> vector<32x63xf32>
    %389 = arith.addf %385, %388 : vector<32x63xf32>
    %c0_436 = arith.constant 0 : index
    %c240_437 = arith.constant 240 : index
    %390 = vector.load %arg5[%c0_436, %c240_437] : memref<32x512xf32, #tpu.memory_space<vmem>>, vector<32x16xf32>
    %c0_438 = arith.constant 0 : index
    %c21 = arith.constant 21 : index
    %391 = vector.load %arg16[%c0_438, %c21] : memref<16x528xf32, #tpu.memory_space<vmem>>, vector<16x63xf32>
    %cst_439 = arith.constant dense<0.000000e+00> : vector<32x63xf32>
    %392 = tpu.matmul %390, %391, %cst_439 {dimension_numbers = #tpu.dot_dimension_numbers<[1], [0], [0], [1], [0, 0, 1, 1], [], []>} : vector<32x16xf32>, vector<16x63xf32>, vector<32x63xf32> -> vector<32x63xf32>
    %393 = arith.addf %389, %392 : vector<32x63xf32>
    %c0_440 = arith.constant 0 : index
    %c256_441 = arith.constant 256 : index
    %394 = vector.load %arg5[%c0_440, %c256_441] : memref<32x512xf32, #tpu.memory_space<vmem>>, vector<32x16xf32>
    %c0_442 = arith.constant 0 : index
    %c24_443 = arith.constant 24 : index
    %395 = vector.load %arg16[%c0_442, %c24_443] : memref<16x528xf32, #tpu.memory_space<vmem>>, vector<16x63xf32>
    %cst_444 = arith.constant dense<0.000000e+00> : vector<32x63xf32>
    %396 = tpu.matmul %394, %395, %cst_444 {dimension_numbers = #tpu.dot_dimension_numbers<[1], [0], [0], [1], [0, 0, 1, 1], [], []>} : vector<32x16xf32>, vector<16x63xf32>, vector<32x63xf32> -> vector<32x63xf32>
    %397 = arith.addf %393, %396 : vector<32x63xf32>
    %c0_445 = arith.constant 0 : index
    %c272_446 = arith.constant 272 : index
    %398 = vector.load %arg5[%c0_445, %c272_446] : memref<32x512xf32, #tpu.memory_space<vmem>>, vector<32x16xf32>
    %c0_447 = arith.constant 0 : index
    %c25_448 = arith.constant 25 : index
    %399 = vector.load %arg16[%c0_447, %c25_448] : memref<16x528xf32, #tpu.memory_space<vmem>>, vector<16x63xf32>
    %cst_449 = arith.constant dense<0.000000e+00> : vector<32x63xf32>
    %400 = tpu.matmul %398, %399, %cst_449 {dimension_numbers = #tpu.dot_dimension_numbers<[1], [0], [0], [1], [0, 0, 1, 1], [], []>} : vector<32x16xf32>, vector<16x63xf32>, vector<32x63xf32> -> vector<32x63xf32>
    %401 = arith.addf %397, %400 : vector<32x63xf32>
    %c0_450 = arith.constant 0 : index
    %c288_451 = arith.constant 288 : index
    %402 = vector.load %arg5[%c0_450, %c288_451] : memref<32x512xf32, #tpu.memory_space<vmem>>, vector<32x16xf32>
    %c0_452 = arith.constant 0 : index
    %c26_453 = arith.constant 26 : index
    %403 = vector.load %arg16[%c0_452, %c26_453] : memref<16x528xf32, #tpu.memory_space<vmem>>, vector<16x63xf32>
    %cst_454 = arith.constant dense<0.000000e+00> : vector<32x63xf32>
    %404 = tpu.matmul %402, %403, %cst_454 {dimension_numbers = #tpu.dot_dimension_numbers<[1], [0], [0], [1], [0, 0, 1, 1], [], []>} : vector<32x16xf32>, vector<16x63xf32>, vector<32x63xf32> -> vector<32x63xf32>
    %405 = arith.addf %401, %404 : vector<32x63xf32>
    %c0_455 = arith.constant 0 : index
    %c304_456 = arith.constant 304 : index
    %406 = vector.load %arg5[%c0_455, %c304_456] : memref<32x512xf32, #tpu.memory_space<vmem>>, vector<32x16xf32>
    %c0_457 = arith.constant 0 : index
    %c27 = arith.constant 27 : index
    %407 = vector.load %arg16[%c0_457, %c27] : memref<16x528xf32, #tpu.memory_space<vmem>>, vector<16x63xf32>
    %cst_458 = arith.constant dense<0.000000e+00> : vector<32x63xf32>
    %408 = tpu.matmul %406, %407, %cst_458 {dimension_numbers = #tpu.dot_dimension_numbers<[1], [0], [0], [1], [0, 0, 1, 1], [], []>} : vector<32x16xf32>, vector<16x63xf32>, vector<32x63xf32> -> vector<32x63xf32>
    %409 = arith.addf %405, %408 : vector<32x63xf32>
    %c0_459 = arith.constant 0 : index
    %c320_460 = arith.constant 320 : index
    %410 = vector.load %arg5[%c0_459, %c320_460] : memref<32x512xf32, #tpu.memory_space<vmem>>, vector<32x16xf32>
    %c0_461 = arith.constant 0 : index
    %c30_462 = arith.constant 30 : index
    %411 = vector.load %arg16[%c0_461, %c30_462] : memref<16x528xf32, #tpu.memory_space<vmem>>, vector<16x63xf32>
    %cst_463 = arith.constant dense<0.000000e+00> : vector<32x63xf32>
    %412 = tpu.matmul %410, %411, %cst_463 {dimension_numbers = #tpu.dot_dimension_numbers<[1], [0], [0], [1], [0, 0, 1, 1], [], []>} : vector<32x16xf32>, vector<16x63xf32>, vector<32x63xf32> -> vector<32x63xf32>
    %413 = arith.addf %409, %412 : vector<32x63xf32>
    %c0_464 = arith.constant 0 : index
    %c336_465 = arith.constant 336 : index
    %414 = vector.load %arg5[%c0_464, %c336_465] : memref<32x512xf32, #tpu.memory_space<vmem>>, vector<32x16xf32>
    %c0_466 = arith.constant 0 : index
    %c31_467 = arith.constant 31 : index
    %415 = vector.load %arg16[%c0_466, %c31_467] : memref<16x528xf32, #tpu.memory_space<vmem>>, vector<16x63xf32>
    %cst_468 = arith.constant dense<0.000000e+00> : vector<32x63xf32>
    %416 = tpu.matmul %414, %415, %cst_468 {dimension_numbers = #tpu.dot_dimension_numbers<[1], [0], [0], [1], [0, 0, 1, 1], [], []>} : vector<32x16xf32>, vector<16x63xf32>, vector<32x63xf32> -> vector<32x63xf32>
    %417 = arith.addf %413, %416 : vector<32x63xf32>
    %c0_469 = arith.constant 0 : index
    %c352_470 = arith.constant 352 : index
    %418 = vector.load %arg5[%c0_469, %c352_470] : memref<32x512xf32, #tpu.memory_space<vmem>>, vector<32x16xf32>
    %c0_471 = arith.constant 0 : index
    %c32_472 = arith.constant 32 : index
    %419 = vector.load %arg16[%c0_471, %c32_472] : memref<16x528xf32, #tpu.memory_space<vmem>>, vector<16x63xf32>
    %cst_473 = arith.constant dense<0.000000e+00> : vector<32x63xf32>
    %420 = tpu.matmul %418, %419, %cst_473 {dimension_numbers = #tpu.dot_dimension_numbers<[1], [0], [0], [1], [0, 0, 1, 1], [], []>} : vector<32x16xf32>, vector<16x63xf32>, vector<32x63xf32> -> vector<32x63xf32>
    %421 = arith.addf %417, %420 : vector<32x63xf32>
    %c0_474 = arith.constant 0 : index
    %c368_475 = arith.constant 368 : index
    %422 = vector.load %arg5[%c0_474, %c368_475] : memref<32x512xf32, #tpu.memory_space<vmem>>, vector<32x16xf32>
    %c0_476 = arith.constant 0 : index
    %c33 = arith.constant 33 : index
    %423 = vector.load %arg16[%c0_476, %c33] : memref<16x528xf32, #tpu.memory_space<vmem>>, vector<16x63xf32>
    %cst_477 = arith.constant dense<0.000000e+00> : vector<32x63xf32>
    %424 = tpu.matmul %422, %423, %cst_477 {dimension_numbers = #tpu.dot_dimension_numbers<[1], [0], [0], [1], [0, 0, 1, 1], [], []>} : vector<32x16xf32>, vector<16x63xf32>, vector<32x63xf32> -> vector<32x63xf32>
    %425 = arith.addf %421, %424 : vector<32x63xf32>
    %c0_478 = arith.constant 0 : index
    %c384_479 = arith.constant 384 : index
    %426 = vector.load %arg5[%c0_478, %c384_479] : memref<32x512xf32, #tpu.memory_space<vmem>>, vector<32x16xf32>
    %c0_480 = arith.constant 0 : index
    %c36_481 = arith.constant 36 : index
    %427 = vector.load %arg16[%c0_480, %c36_481] : memref<16x528xf32, #tpu.memory_space<vmem>>, vector<16x63xf32>
    %cst_482 = arith.constant dense<0.000000e+00> : vector<32x63xf32>
    %428 = tpu.matmul %426, %427, %cst_482 {dimension_numbers = #tpu.dot_dimension_numbers<[1], [0], [0], [1], [0, 0, 1, 1], [], []>} : vector<32x16xf32>, vector<16x63xf32>, vector<32x63xf32> -> vector<32x63xf32>
    %429 = arith.addf %425, %428 : vector<32x63xf32>
    %c0_483 = arith.constant 0 : index
    %c400_484 = arith.constant 400 : index
    %430 = vector.load %arg5[%c0_483, %c400_484] : memref<32x512xf32, #tpu.memory_space<vmem>>, vector<32x16xf32>
    %c0_485 = arith.constant 0 : index
    %c37_486 = arith.constant 37 : index
    %431 = vector.load %arg16[%c0_485, %c37_486] : memref<16x528xf32, #tpu.memory_space<vmem>>, vector<16x63xf32>
    %cst_487 = arith.constant dense<0.000000e+00> : vector<32x63xf32>
    %432 = tpu.matmul %430, %431, %cst_487 {dimension_numbers = #tpu.dot_dimension_numbers<[1], [0], [0], [1], [0, 0, 1, 1], [], []>} : vector<32x16xf32>, vector<16x63xf32>, vector<32x63xf32> -> vector<32x63xf32>
    %433 = arith.addf %429, %432 : vector<32x63xf32>
    %c0_488 = arith.constant 0 : index
    %c416_489 = arith.constant 416 : index
    %434 = vector.load %arg5[%c0_488, %c416_489] : memref<32x512xf32, #tpu.memory_space<vmem>>, vector<32x16xf32>
    %c0_490 = arith.constant 0 : index
    %c38 = arith.constant 38 : index
    %435 = vector.load %arg16[%c0_490, %c38] : memref<16x528xf32, #tpu.memory_space<vmem>>, vector<16x63xf32>
    %cst_491 = arith.constant dense<0.000000e+00> : vector<32x63xf32>
    %436 = tpu.matmul %434, %435, %cst_491 {dimension_numbers = #tpu.dot_dimension_numbers<[1], [0], [0], [1], [0, 0, 1, 1], [], []>} : vector<32x16xf32>, vector<16x63xf32>, vector<32x63xf32> -> vector<32x63xf32>
    %437 = arith.addf %433, %436 : vector<32x63xf32>
    %c0_492 = arith.constant 0 : index
    %c432_493 = arith.constant 432 : index
    %438 = vector.load %arg5[%c0_492, %c432_493] : memref<32x512xf32, #tpu.memory_space<vmem>>, vector<32x16xf32>
    %c0_494 = arith.constant 0 : index
    %c39 = arith.constant 39 : index
    %439 = vector.load %arg16[%c0_494, %c39] : memref<16x528xf32, #tpu.memory_space<vmem>>, vector<16x63xf32>
    %cst_495 = arith.constant dense<0.000000e+00> : vector<32x63xf32>
    %440 = tpu.matmul %438, %439, %cst_495 {dimension_numbers = #tpu.dot_dimension_numbers<[1], [0], [0], [1], [0, 0, 1, 1], [], []>} : vector<32x16xf32>, vector<16x63xf32>, vector<32x63xf32> -> vector<32x63xf32>
    %441 = arith.addf %437, %440 : vector<32x63xf32>
    %c0_496 = arith.constant 0 : index
    %c448_497 = arith.constant 448 : index
    %442 = vector.load %arg5[%c0_496, %c448_497] : memref<32x512xf32, #tpu.memory_space<vmem>>, vector<32x16xf32>
    %c0_498 = arith.constant 0 : index
    %c42_499 = arith.constant 42 : index
    %443 = vector.load %arg16[%c0_498, %c42_499] : memref<16x528xf32, #tpu.memory_space<vmem>>, vector<16x63xf32>
    %cst_500 = arith.constant dense<0.000000e+00> : vector<32x63xf32>
    %444 = tpu.matmul %442, %443, %cst_500 {dimension_numbers = #tpu.dot_dimension_numbers<[1], [0], [0], [1], [0, 0, 1, 1], [], []>} : vector<32x16xf32>, vector<16x63xf32>, vector<32x63xf32> -> vector<32x63xf32>
    %445 = arith.addf %441, %444 : vector<32x63xf32>
    %c0_501 = arith.constant 0 : index
    %c464_502 = arith.constant 464 : index
    %446 = vector.load %arg5[%c0_501, %c464_502] : memref<32x512xf32, #tpu.memory_space<vmem>>, vector<32x16xf32>
    %c0_503 = arith.constant 0 : index
    %c43_504 = arith.constant 43 : index
    %447 = vector.load %arg16[%c0_503, %c43_504] : memref<16x528xf32, #tpu.memory_space<vmem>>, vector<16x63xf32>
    %cst_505 = arith.constant dense<0.000000e+00> : vector<32x63xf32>
    %448 = tpu.matmul %446, %447, %cst_505 {dimension_numbers = #tpu.dot_dimension_numbers<[1], [0], [0], [1], [0, 0, 1, 1], [], []>} : vector<32x16xf32>, vector<16x63xf32>, vector<32x63xf32> -> vector<32x63xf32>
    %449 = arith.addf %445, %448 : vector<32x63xf32>
    %c0_506 = arith.constant 0 : index
    %c480_507 = arith.constant 480 : index
    %450 = vector.load %arg5[%c0_506, %c480_507] : memref<32x512xf32, #tpu.memory_space<vmem>>, vector<32x16xf32>
    %c0_508 = arith.constant 0 : index
    %c44_509 = arith.constant 44 : index
    %451 = vector.load %arg16[%c0_508, %c44_509] : memref<16x528xf32, #tpu.memory_space<vmem>>, vector<16x63xf32>
    %cst_510 = arith.constant dense<0.000000e+00> : vector<32x63xf32>
    %452 = tpu.matmul %450, %451, %cst_510 {dimension_numbers = #tpu.dot_dimension_numbers<[1], [0], [0], [1], [0, 0, 1, 1], [], []>} : vector<32x16xf32>, vector<16x63xf32>, vector<32x63xf32> -> vector<32x63xf32>
    %453 = arith.addf %449, %452 : vector<32x63xf32>
    %c0_511 = arith.constant 0 : index
    %c496_512 = arith.constant 496 : index
    %454 = vector.load %arg5[%c0_511, %c496_512] : memref<32x512xf32, #tpu.memory_space<vmem>>, vector<32x16xf32>
    %c0_513 = arith.constant 0 : index
    %c45 = arith.constant 45 : index
    %455 = vector.load %arg16[%c0_513, %c45] : memref<16x528xf32, #tpu.memory_space<vmem>>, vector<16x63xf32>
    %cst_514 = arith.constant dense<0.000000e+00> : vector<32x63xf32>
    %456 = tpu.matmul %454, %455, %cst_514 {dimension_numbers = #tpu.dot_dimension_numbers<[1], [0], [0], [1], [0, 0, 1, 1], [], []>} : vector<32x16xf32>, vector<16x63xf32>, vector<32x63xf32> -> vector<32x63xf32>
    %457 = arith.addf %453, %456 : vector<32x63xf32>
    %c0_515 = arith.constant 0 : index
    %c0_516 = arith.constant 0 : index
    %458 = vector.load %arg17[%c0_515, %c0_516] : memref<32x502xf32, #tpu.memory_space<vmem>>, vector<32x63xf32>
    tpu.vector_store %arg17[%c0_515, %c0_516], %457 {strides = array<i32>} : memref<32x502xf32, #tpu.memory_space<vmem>>, vector<32x63xf32>,
    %c0_517 = arith.constant 0 : index
    %c0_518 = arith.constant 0 : index
    %459 = vector.load %arg17[%c0_517, %c0_518] : memref<32x502xf32, #tpu.memory_space<vmem>>, vector<32x3xf32>
    %c0_519 = arith.constant 0 : index
    %c0_520 = arith.constant 0 : index
    %460 = vector.load %arg18[%c0_519, %c0_520] : memref<32x512xf32, #tpu.memory_space<vmem>>, vector<32x3xf32>
    tpu.vector_store %arg18[%c0_519, %c0_520], %459 {strides = array<i32>} : memref<32x512xf32, #tpu.memory_space<vmem>>, vector<32x3xf32>,
    %c0_521 = arith.constant 0 : index
    %c12_522 = arith.constant 12 : index
    %461 = vector.load %arg17[%c0_521, %c12_522] : memref<32x502xf32, #tpu.memory_space<vmem>>, vector<32x3xf32>
    %c0_523 = arith.constant 0 : index
    %c3_524 = arith.constant 3 : index
    %462 = vector.load %arg18[%c0_523, %c3_524] : memref<32x512xf32, #tpu.memory_space<vmem>>, vector<32x3xf32>
    tpu.vector_store %arg18[%c0_523, %c3_524], %461 {strides = array<i32>} : memref<32x512xf32, #tpu.memory_space<vmem>>, vector<32x3xf32>,
    %c0_525 = arith.constant 0 : index
    %c24_526 = arith.constant 24 : index
    %463 = vector.load %arg17[%c0_525, %c24_526] : memref<32x502xf32, #tpu.memory_space<vmem>>, vector<32x3xf32>
    %c0_527 = arith.constant 0 : index
    %c6_528 = arith.constant 6 : index
    %464 = vector.load %arg18[%c0_527, %c6_528] : memref<32x512xf32, #tpu.memory_space<vmem>>, vector<32x3xf32>
    tpu.vector_store %arg18[%c0_527, %c6_528], %463 {strides = array<i32>} : memref<32x512xf32, #tpu.memory_space<vmem>>, vector<32x3xf32>,
    %c0_529 = arith.constant 0 : index
    %c36_530 = arith.constant 36 : index
    %465 = vector.load %arg17[%c0_529, %c36_530] : memref<32x502xf32, #tpu.memory_space<vmem>>, vector<32x3xf32>
    %c0_531 = arith.constant 0 : index
    %c9_532 = arith.constant 9 : index
    %466 = vector.load %arg18[%c0_531, %c9_532] : memref<32x512xf32, #tpu.memory_space<vmem>>, vector<32x3xf32>
    tpu.vector_store %arg18[%c0_531, %c9_532], %465 {strides = array<i32>} : memref<32x512xf32, #tpu.memory_space<vmem>>, vector<32x3xf32>,
    %c0_533 = arith.constant 0 : index
    %c48_534 = arith.constant 48 : index
    %467 = vector.load %arg17[%c0_533, %c48_534] : memref<32x502xf32, #tpu.memory_space<vmem>>, vector<32x3xf32>
    %c0_535 = arith.constant 0 : index
    %c12_536 = arith.constant 12 : index
    %468 = vector.load %arg18[%c0_535, %c12_536] : memref<32x512xf32, #tpu.memory_space<vmem>>, vector<32x3xf32>
    tpu.vector_store %arg18[%c0_535, %c12_536], %467 {strides = array<i32>} : memref<32x512xf32, #tpu.memory_space<vmem>>, vector<32x3xf32>,
    %c0_537 = arith.constant 0 : index
    %c60_538 = arith.constant 60 : index
    %469 = vector.load %arg17[%c0_537, %c60_538] : memref<32x502xf32, #tpu.memory_space<vmem>>, vector<32x3xf32>
    %c0_539 = arith.constant 0 : index
    %c15_540 = arith.constant 15 : index
    %470 = vector.load %arg18[%c0_539, %c15_540] : memref<32x512xf32, #tpu.memory_space<vmem>>, vector<32x3xf32>
    tpu.vector_store %arg18[%c0_539, %c15_540], %469 {strides = array<i32>} : memref<32x512xf32, #tpu.memory_space<vmem>>, vector<32x3xf32>,
    %c0_541 = arith.constant 0 : index
    %c0_542 = arith.constant 0 : index
    %471 = vector.load %arg18[%c0_541, %c0_542] : memref<32x512xf32, #tpu.memory_space<vmem>>, vector<32x18xf32>
    %c0_543 = arith.constant 0 : index
    %c0_544 = arith.constant 0 : index
    %472 = vector.load %arg13[%c0_543, %c0_544] : memref<32x18xf32, #tpu.memory_space<vmem>>, vector<32x18xf32>
    %c0_545 = arith.constant 0 : index
    %c0_546 = arith.constant 0 : index
    %473 = vector.load %arg14[%c0_545, %c0_546] : memref<32x18xf32, #tpu.memory_space<vmem>>, vector<32x18xf32>
    %474 = vector.shape_cast %471 : vector<32x18xf32> to vector<1x32x18xf32>
    %cst_547 = arith.constant dense<0.000000e+00> : vector<1xf32>
    %475 = vector.multi_reduction <add>, %474, %cst_547 [1, 2] : vector<1x32x18xf32> to vector<1xf32>
    %476 = vector.shape_cast %475 : vector<1xf32> to vector<1x1x1xf32>
    %477 = vector.extract %476[0, 0, 0] : f32 from vector<1x1x1xf32>
    %cst_548 = arith.constant 0.00173611112 : f32
    %478 = arith.mulf %477, %cst_548 : f32
    %479 = vector.broadcast %478 : f32 to vector<32x18xf32>
    %480 = arith.subf %471, %479 : vector<32x18xf32>
    %481 = arith.mulf %480, %480 : vector<32x18xf32>
    %482 = vector.shape_cast %481 : vector<32x18xf32> to vector<1x32x18xf32>
    %cst_549 = arith.constant dense<0.000000e+00> : vector<1xf32>
    %483 = vector.multi_reduction <add>, %482, %cst_549 [1, 2] : vector<1x32x18xf32> to vector<1xf32>
    %484 = vector.shape_cast %483 : vector<1xf32> to vector<1x1x1xf32>
    %485 = vector.extract %484[0, 0, 0] : f32 from vector<1x1x1xf32>
    %cst_550 = arith.constant 0.00173611112 : f32
    %486 = arith.mulf %485, %cst_550 : f32
    %cst_551 = arith.constant 9.99999974E-6 : f32
    %487 = arith.addf %486, %cst_551 : f32
    %488 = math.rsqrt %487 : f32
    %489 = vector.broadcast %488 : f32 to vector<32x18xf32>
    %490 = arith.mulf %480, %489 : vector<32x18xf32>
    %491 = arith.mulf %490, %472 : vector<32x18xf32>
    %492 = arith.addf %491, %473 : vector<32x18xf32>
    %cst_552 = arith.constant 0.000000e+00 : f32
    %493 = vector.broadcast %cst_552 : f32 to vector<32x18xf32>
    %494 = arith.cmpf ogt, %492, %493 : vector<32x18xf32>
    %cst_553 = arith.constant 2.000000e-01 : f32
    %495 = vector.broadcast %cst_553 : f32 to vector<32x18xf32>
    %496 = arith.mulf %495, %492 : vector<32x18xf32>
    %497 = arith.select %494, %492, %496 : vector<32x18xi1>, vector<32x18xf32>
    %c0_554 = arith.constant 0 : index
    %c0_555 = arith.constant 0 : index
    %498 = vector.load %arg18[%c0_554, %c0_555] : memref<32x512xf32, #tpu.memory_space<vmem>>, vector<32x18xf32>
    tpu.vector_store %arg18[%c0_554, %c0_555], %497 {strides = array<i32>} : memref<32x512xf32, #tpu.memory_space<vmem>>, vector<32x18xf32>,
    %c0_556 = arith.constant 0 : index
    %c0_557 = arith.constant 0 : index
    %499 = vector.load %arg6[%c0_556, %c0_557] : memref<32x18xf32, #tpu.memory_space<vmem>>, vector<32x18xf32>
    %500 = arith.mulf %497, %499 : vector<32x18xf32>
    %501 = vector.shape_cast %500 : vector<32x18xf32> to vector<1x32x18xf32>
    %cst_558 = arith.constant dense<0.000000e+00> : vector<1xf32>
    %502 = vector.multi_reduction <add>, %501, %cst_558 [1, 2] : vector<1x32x18xf32> to vector<1xf32>
    %503 = vector.shape_cast %502 : vector<1xf32> to vector<1x1x1xf32>
    %504 = vector.extract %503[0, 0, 0] : f32 from vector<1x1x1xf32>
    %505 = vector.broadcast %504 : f32 to vector<1x1xf32>
    %cst_559 = arith.constant 0.000000e+00 : f32
    %506 = vector.broadcast %cst_559 : f32 to vector<1x1xf32>
    %507 = arith.subf %506, %505 : vector<1x1xf32>
    %508 = math.exp %507 : vector<1x1xf32>
    %cst_560 = arith.constant 1.000000e+00 : f32
    %509 = vector.broadcast %cst_560 : f32 to vector<1x1xf32>
    %510 = arith.addf %509, %508 : vector<1x1xf32>
    %cst_561 = arith.constant 1.000000e+00 : f32
    %511 = vector.broadcast %cst_561 : f32 to vector<1x1xf32>
    %512 = arith.divf %511, %510 : vector<1x1xf32>
    %c0_562 = arith.constant 0 : index
    %c0_563 = arith.constant 0 : index
    %c0_564 = arith.constant 0 : index
    %513 = vector.load %arg15[%c0_562, %c0_563, %c0_564] : memref<1x1x1xf32, #tpu.memory_space<vmem>>, vector<1x1x1xf32>
    %514 = vector.shape_cast %513 : vector<1x1x1xf32> to vector<1x1xf32>
    %515 = vector.shape_cast %512 : vector<1x1xf32> to vector<1x1x1xf32>
    tpu.vector_store %arg15[%c0_562, %c0_563, %c0_564], %515 {strides = array<i32>} : memref<1x1x1xf32, #tpu.memory_space<vmem>>, vector<1x1x1xf32>,
    return
  }
  func.func @transform_0(%arg0: i32) -> (i32, i32, i32) {
    %c0_i32 = arith.constant 0 : i32
    %c0_i32_0 = arith.constant 0 : i32
    %c0_i32_1 = arith.constant 0 : i32
    return %arg0, %c0_i32, %c0_i32_0 : i32, i32, i32
  }
  func.func @transform_1(%arg0: i32) -> (i32, i32) {
    %c0_i32 = arith.constant 0 : i32
    %c0_i32_0 = arith.constant 0 : i32
    %c0_i32_1 = arith.constant 0 : i32
    return %c0_i32, %c0_i32_0 : i32, i32
  }
  func.func @transform_2(%arg0: i32) -> (i32, i32) {
    %c0_i32 = arith.constant 0 : i32
    %c0_i32_0 = arith.constant 0 : i32
    %c0_i32_1 = arith.constant 0 : i32
    return %c0_i32, %c0_i32_0 : i32, i32
  }
  func.func @transform_3(%arg0: i32) -> (i32, i32) {
    %c0_i32 = arith.constant 0 : i32
    %c0_i32_0 = arith.constant 0 : i32
    %c0_i32_1 = arith.constant 0 : i32
    return %c0_i32, %c0_i32_0 : i32, i32
  }
  func.func @transform_4(%arg0: i32) -> (i32, i32) {
    %c0_i32 = arith.constant 0 : i32
    %c0_i32_0 = arith.constant 0 : i32
    %c0_i32_1 = arith.constant 0 : i32
    return %c0_i32, %c0_i32_0 : i32, i32
  }
  func.func @transform_5(%arg0: i32) -> (i32, i32) {
    %c0_i32 = arith.constant 0 : i32
    %c0_i32_0 = arith.constant 0 : i32
    %c0_i32_1 = arith.constant 0 : i32
    return %c0_i32, %c0_i32_0 : i32, i32
  }
  func.func @transform_6(%arg0: i32) -> (i32, i32) {
    %c0_i32 = arith.constant 0 : i32
    %c0_i32_0 = arith.constant 0 : i32
    %c0_i32_1 = arith.constant 0 : i32
    return %c0_i32, %c0_i32_0 : i32, i32
  }
  func.func @transform_7(%arg0: i32) -> (i32, i32) {
    %c0_i32 = arith.constant 0 : i32
    %c0_i32_0 = arith.constant 0 : i32
    %c0_i32_1 = arith.constant 0 : i32
    return %c0_i32, %c0_i32_0 : i32, i32
  }
  func.func @transform_8(%arg0: i32) -> (i32, i32) {
    %c0_i32 = arith.constant 0 : i32
    %c0_i32_0 = arith.constant 0 : i32
    %c0_i32_1 = arith.constant 0 : i32
    return %c0_i32, %c0_i32_0 : i32, i32
  }
  func.func @transform_9(%arg0: i32) -> (i32, i32) {
    %c0_i32 = arith.constant 0 : i32
    %c0_i32_0 = arith.constant 0 : i32
    %c0_i32_1 = arith.constant 0 : i32
    return %c0_i32, %c0_i32_0 : i32, i32
  }
  func.func @transform_10(%arg0: i32) -> (i32, i32) {
    %c0_i32 = arith.constant 0 : i32
    %c0_i32_0 = arith.constant 0 : i32
    %c0_i32_1 = arith.constant 0 : i32
    return %c0_i32, %c0_i32_0 : i32, i32
  }
  func.func @transform_11(%arg0: i32) -> (i32, i32) {
    %c0_i32 = arith.constant 0 : i32
    %c0_i32_0 = arith.constant 0 : i32
    %c0_i32_1 = arith.constant 0 : i32
    return %c0_i32, %c0_i32_0 : i32, i32
  }
  func.func @transform_12(%arg0: i32) -> (i32, i32) {
    %c0_i32 = arith.constant 0 : i32
    %c0_i32_0 = arith.constant 0 : i32
    %c0_i32_1 = arith.constant 0 : i32
    return %c0_i32, %c0_i32_0 : i32, i32
  }
  func.func @transform_13(%arg0: i32) -> (i32, i32) {
    %c0_i32 = arith.constant 0 : i32
    %c0_i32_0 = arith.constant 0 : i32
    %c0_i32_1 = arith.constant 0 : i32
    return %c0_i32, %c0_i32_0 : i32, i32
  }
  func.func @transform_14(%arg0: i32) -> (i32, i32, i32) {
    %c0_i32 = arith.constant 0 : i32
    %c0_i32_0 = arith.constant 0 : i32
    %c0_i32_1 = arith.constant 0 : i32
    return %arg0, %c0_i32, %c0_i32_0 : i32, i32, i32
  }
}

</mosaic_0001>

<bundles_post_ra>
// kernel: netD_forward.1
= control target key start
LH: loop header
LB: loop body
LE: loop exit
PB: predicated region body
PF: predicated region fallthrough
CT: control target
= control target key end

     0   :  { %s10142_s29 = smov 0   ;;  %s11664_s0 = inlined_call_operand.vmem [shape: f32[2,16,512], index: 0, kind: input, shape index: {}]   ;;  %s11665_s1 = inlined_call_operand.vmem [shape: f32[4,16], index: 1, kind: input, shape index: {}]   ;;  %s11666_s2 = inlined_call_operand.vmem [shape: f32[8,48], index: 2, kind: input, shape index: {}]   ;;  %s11667_s3 = inlined_call_operand.vmem [shape: f32[16,96], index: 3, kind: input, shape index: {}]   ;;  %s11668_s4 = inlined_call_operand.vmem [shape: f32[32,512], index: 4, kind: input, shape index: {}]   ;;  %s11669_s5 = inlined_call_operand.vmem [shape: f32[32,18], index: 5, kind: input, shape index: {}]   ;;  %s11670_s6 = inlined_call_operand.vmem [shape: f32[4,512], index: 6, kind: input, shape index: {}]   ;;  %s11671_s7 = inlined_call_operand.vmem [shape: f32[4,512], index: 7, kind: input, shape index: {}]   ;;  %s11672_s8 = inlined_call_operand.vmem [shape: f32[8,192], index: 8, kind: input, shape index: {}]   ;;  %s11673_s9 = inlined_call_operand.vmem [shape: f32[8,192], index: 9, kind: input, shape index: {}]   ;;  %s11674_s10 = inlined_call_operand.vmem [shape: f32[16,68], index: 10, kind: input, shape index: {}]   ;;  %s11675_s11 = inlined_call_operand.vmem [shape: f32[16,68], index: 11, kind: input, shape index: {}]   ;;  %s11676_s12 = inlined_call_operand.vmem [shape: f32[32,18], index: 12, kind: input, shape index: {}]   ;;  %s11677_s13 = inlined_call_operand.vmem [shape: f32[32,18], index: 13, kind: input, shape index: {}]   ;;  %s11678_s14 = inlined_call_operand.vmem [shape: f32[2,1,1], index: 14, kind: output, shape index: {}]  }
   0x1   :  { %11740 = sst [smem:[#allocation21_spill]] %s11664_s0 }
   0x2   :  { %11741 = sst [smem:[#allocation22_spill]] %s11665_s1 }
   0x3   :  { %11742 = sst [smem:[#allocation23_spill]] %s11666_s2 }
   0x4   :  { %11743 = sst [smem:[#allocation24_spill]] %s11667_s3 }
   0x5   :  { %11744 = sst [smem:[#allocation25_spill]] %s11670_s6 }
   0x6   :  { %11745 = sst [smem:[#allocation26_spill]] %s11671_s7 }
   0x7   :  { %11746 = sst [smem:[#allocation27_spill]] %s11672_s8 }
   0x8   :  { %11747 = sst [smem:[#allocation28_spill]] %s11673_s9 }
   0x9   :  { %11748 = sst [smem:[#allocation29_spill]] %s11678_s14 }
   0xa LB: > { %11749 = sst [smem:[#allocation5_spill]] %s9984_s29  ;;  %s8592_s30 = sadd.s32 4294967295, %s9984_s29   ;;  %s9984_s29 = sphi %s10142_s29, %s24_s29  }
   0xb   : > { %p8596_p0 = scmp.ge.s32.totalorder %s9984_s29, 1  ;;  %p412_p1 = scmp.lt.s32.totalorder %s9984_s29, 3 }
   0xd   : > { %p413_p2 = pnand %p8596_p0, %p412_p1 }
   0xf   : > { %416 = sbr.rel (%p413_p2) target bundleno = 4859 (0x12fb), region = 76 }
  0x16   : > { %p456_p3 = scmp.lt.s32.totalorder %s8592_s30, 1  ;;  %v9986_v0 = vmov 0.0   ;;  %s11750_s0 = sld [smem:[#allocation21_spill]]  ;;  %vm11705_vm0 = vcmask 130048   ;;  %vm623_vm1 = vcmask 1043456   ;;  %vm716_vm6 = vcmask 125952  }
  0x17   : > { %541 = vmatprep.mubr.f32.mxu0 %v9986_v0  ;;  %712 = vst [vmem:[#allocation2] sm:$0xf] %v9986_v0  ;;  %713 = vst [vmem:[#allocation2 + $0x8] sm:$0xf] %v9986_v0  ;;  %612 = vmatprep.mubr.f32.mxu1 %v9986_v0  ;;  %s11751_s1 = sld [smem:[#allocation22_spill]]  ;;  %s11752_s6 = sld [smem:[#allocation25_spill]] }
  0x18   : > { %714 = vst [vmem:[#allocation2 + $0x10] sm:$0xf] %v9986_v0  ;;  %715 = vst [vmem:[#allocation2 + $0x18] sm:$0xf] %v9986_v0  ;;  %s11947_s30 = smov (!%p456_p3, %s8592_s30), 1  ;;  %s11753_s7 = sld [smem:[#allocation26_spill]] }
  0x19   : > { %s8827_s15 = sshll.u32 %s11947_s30, 6  ;;  %717 = vst.msk [vmem:[#allocation2 + $0x20] sm:$0xf] %vm716_vm6, %v9986_v0  ;;  %s11754_s2 = sld [smem:[#allocation23_spill]]  ;;  %vm743_vm7 = vcmask 1043520   ;;  %vm734_vm8 = vcmask 64512  }
  0x1a   : > { %s9990_s26 = smov 124   ;;  %s11679_s27 = smov 120   ;;  %vm748_vm9 = vcmask 60416   ;;  %vm770_vm10 = vcmask 1039360   ;;  %vm11706_vm11 = vcmask 31744   ;;  %vm1089_vm12 = vcmask 1031168  }
  0x1b   : > { %s11683_s28 = smov 112   ;;  %s11721_s16 = smov 126   ;;  %vm11708_vm13 = vcmask 982016   ;;  %vm1429_vm14 = vcmask 973824   ;;  %vm1599_vm15 = vcmask 965632   ;;  %vm2473_vm6 = vcmask 842752  }
  0x1c   : > { %s460_s18 = scalar_lea.vmem %s11750_s0, %s8827_s15  ;;  %s11695_s15 = smov 104  }
  0x1d   : > { %v466_v1 = vld [vmem:[%s460_s18 + $0x8] sm:$0xff]  ;;  %v465_v3 = vld [vmem:[%s460_s18] sm:$0xff]  ;;  %v468_v6 = vld [vmem:[%s460_s18 + $0x18] sm:$0xff]  ;;  %s11691_s17 = smov 127   ;;  %s9997_s19 = smov 118  }
  0x1e   : > { %v470_v2 = vld [vmem:[%s460_s18 + $0x28] sm:$0xff]  ;;  %v469_v5 = vld [vmem:[%s460_s18 + $0x20] sm:$0xff]  ;;  %v472_v7 = vld [vmem:[%s460_s18 + $0x38] sm:$0xff]  ;;  %s11757_s8 = sld [smem:[#allocation27_spill]]  ;;  %s11758_s9 = sld [smem:[#allocation28_spill]] }
  0x1f   : > { %v9340_v4 = vpack.c.bf16 %v470_v2, %v466_v1  ;;  %v9342_v8 = vpack.c.bf16 %v469_v5, %v465_v3  ;;  %v9344_v9 = vpack.c.bf16 %v472_v7, %v468_v6  ;;  %v467_v10 = vld [vmem:[%s460_s18 + $0x10] sm:$0xff]  ;;  %v464_v13 = vld [vmem:[%s11751_s1] sm:$0xf]  ;;  %v620_v58 = vld [vmem:[%s11752_s6 + $0x8] sm:$0xff]  ;;  %s11760_s3 = sld [smem:[#allocation24_spill]]  ;;  %s11730_s0 = smov 40  }
  0x20   : > { %v471_v11 = vld [vmem:[%s460_s18 + $0x30] sm:$0xff]  ;;  %v619_v57 = vld [vmem:[%s11752_s6] sm:$0xff]  ;;  %v622_v60 = vld [vmem:[%s11753_s7 + $0x8] sm:$0xff]  ;;  %v679_v62 = vcombine.high %v620_v58, %v620_v58  ;;  %s11681_s18 = smov 119   ;;  %s11777_s1 = smov 64  }
  0x21   : > { %9341 = vmatprep.subr.bf16.mxu0 %v9340_v4  ;;  %v9346_v12 = vpack.c.bf16 %v471_v11, %v467_v10  ;;  %9345 = vmatprep.subr.bf16.mxu1 %v9344_v9  ;;  %v621_v59 = vld [vmem:[%s11753_s7] sm:$0xff]  ;;  %v678_v61 = vcombine.high %v619_v57, %v619_v57  ;;  %v689_v2 = vcombine.high %v622_v60, %v622_v60  ;;  %s11781_s6 = smov 32   ;;  %s10040_s14 = smov 9  }
  0x22   : > { %9343 = vmatpush1.bf16.msra.mxu0 %v9342_v8  ;;  %v688_v1 = vcombine.high %v621_v59, %v621_v59  ;;  %s10041_s29 = smov 11  }
  0x23   : > { %9347 = vmatpush1.bf16.msra.mxu1 %v9346_v12 }
  0x25   : > { %8599 = vmatmul.mubr.msk.f32.vlgmr.msra.gmra.mrb[0].mxu0 %vm11705_vm0, %v464_v13 }
  0x26   : > { %8600 = vmatmul.mubr.msk.f32.vlgmr.msra.gmra.mrb[0].mxu1 %vm11705_vm0, %v464_v13  ;;  %849 = vmatprep.mubr.f32.mxu0 %v9986_v0  ;;  %vm2917_vm0 = vcmask 786128  }
  0x27   : > { %920 = vmatprep.mubr.f32.mxu1 %v9986_v0 }
  0xf8   : > { %v543_v14 = vpop.f32.mrb[0].mxu0 }
  0xf9   : > { %v624_v15 = vsel %vm623_vm1, %v543_v14, 0.0  ;;  %v545_v16 = vpop.f32.mrb[1].mxu0  ;;  %v614_v17 = vpop.f32.mrb[0].mxu1 }
  0xfa   : > { %v625_v18 = vsel %vm623_vm1, %v545_v16, 0.0  ;;  %v627_v19 = vsel %vm623_vm1, %v614_v17, 0.0  ;;  %v616_v20 = vpop.f32.mrb[1].mxu1 }
  0xfb   : > { %v626_v21 = vadd.f32 %v625_v18, %v624_v15  ;;  %v629_v23 = vsel %vm623_vm1, %v616_v20, 0.0 }
  0xfd   : > { %v628_v22 = vadd.f32 %v627_v19, %v626_v21 }
  0xff   : > { %v630_v24 = vadd.f32 %v629_v23, %v628_v22 }
 0x101   : > { %631 = vadd.xlane.f32.xlu0 %v630_v24 }
 0x18e   : > { %v632_v25 = vpop.xlane.xlu0 %631 }
 0x18f   : > { %v633_v26 = vrot.slane %v632_v25, 4 }
 0x191   : > { %v634_v27 = vadd.f32 %v633_v26, %v632_v25  ;;  %v10195_v26 = vld [vmem:[%s11754_s2] sm:$0xff]  ;;  %s11778_s2 = smov 40  }
 0x193   : > { %v635_v28 = vrot.slane %v634_v27, 2 }
 0x195   : > { %v636_v29 = vadd.f32 %v635_v28, %v634_v27 }
 0x197   : > { %v637_v30 = vrot.slane %v636_v29, 1 }
 0x199   : > { %v638_v31 = vadd.f32 %v637_v30, %v636_v29 }
 0x19b   : > { %9688 = vpush %v638_v31 }
 0x1cc   : > { %s9689_s21 = spop %9688 }
 0x1cd   : > { %s640_s22 = smul.f32 0.00048828125, %s9689_s21  ;;  %s11701_s21 = smov 8  }
 0x1cf   : > { %v641_v32 = vstv %s640_s22  ;;  %s11689_s22 = smov 110  }
 0x1d0   : > { %v642_v33 = vsub.f32 %v543_v14, %v641_v32  ;;  %v643_v34 = vsub.f32 %v545_v16, %v641_v32  ;;  %v644_v35 = vsub.f32 %v614_v17, %v641_v32  ;;  %v645_v36 = vsub.f32 %v616_v20, %v641_v32 }
 0x1d2   : > { %v646_v37 = vmul.f32 %v642_v33, %v642_v33  ;;  %v647_v38 = vmul.f32 %v643_v34, %v643_v34  ;;  %v648_v39 = vmul.f32 %v644_v35, %v644_v35  ;;  %v649_v40 = vmul.f32 %v645_v36, %v645_v36 }
 0x1d4   : > { %v650_v41 = vsel %vm623_vm1, %v646_v37, 0.0  ;;  %v651_v42 = vsel %vm623_vm1, %v647_v38, 0.0  ;;  %v653_v44 = vsel %vm623_vm1, %v648_v39, 0.0  ;;  %v655_v46 = vsel %vm623_vm1, %v649_v40, 0.0 }
 0x1d5   : > { %v652_v43 = vadd.f32 %v651_v42, %v650_v41 }
 0x1d7   : > { %v654_v45 = vadd.f32 %v653_v44, %v652_v43 }
 0x1d9   : > { %v656_v47 = vadd.f32 %v655_v46, %v654_v45 }
 0x1db   : > { %657 = vadd.xlane.f32.xlu0 %v656_v47 }
 0x268   : > { %v658_v48 = vpop.xlane.xlu0 %657 }
 0x269   : > { %v659_v49 = vrot.slane %v658_v48, 4 }
 0x26b   : > { %v660_v50 = vadd.f32 %v659_v49, %v658_v48 }
 0x26d   : > { %v661_v51 = vrot.slane %v660_v50, 2 }
 0x26f   : > { %v662_v52 = vadd.f32 %v661_v51, %v660_v50 }
 0x271   : > { %v663_v53 = vrot.slane %v662_v52, 1 }
 0x273   : > { %v664_v54 = vadd.f32 %v663_v53, %v662_v52 }
 0x275   : > { %9690 = vpush %v664_v54 }
 0x2a6   : > { %s9691_s23 = spop %9690 }
 0x2a7   : > { %s666_s24 = smul.f32 0.00048828125, %s9691_s23  ;;  %s10000_s23 = smov 100  }
 0x2a9   : > { %s667_s25 = sadd.f32 1e-05, %s666_s24  ;;  %s11717_s24 = smov 116  }
 0x2ab   : > { %v668_v55 = vstv %s667_s25  ;;  %s11709_s25 = smov 108  }
 0x2ac   : > { %9962 = vrsqrt.f32 %v668_v55 }
 0x2b6   : > { %v9963_v56 = vpop.eup %9962 }
 0x2b7   : > { %9692 = vpush %v9963_v56 }
 0x2e8   : > { %s9693_s20 = spop %9692 }
 0x2e9   : > { %v671_v63 = vstv %s9693_s20  ;;  %s9998_s20 = smov 111  }
 0x2ea   : > { %v672_v3 = vmul.f32 %v671_v63, %v642_v33  ;;  %v673_v4 = vmul.f32 %v671_v63, %v643_v34  ;;  %v674_v5 = vmul.f32 %v671_v63, %v644_v35  ;;  %v675_v6 = vmul.f32 %v671_v63, %v645_v36 }
 0x2ec   : > { %v682_v7 = vmul.f32 %v672_v3, %v619_v57  ;;  %v683_v8 = vmul.f32 %v678_v61, %v673_v4  ;;  %v684_v9 = vmul.f32 %v674_v5, %v620_v58  ;;  %v685_v10 = vmul.f32 %v679_v62, %v675_v6 }
 0x2ee   : > { %v692_v11 = vadd.f32 %v682_v7, %v621_v59  ;;  %v693_v12 = vadd.f32 %v688_v1, %v683_v8  ;;  %v694_v13 = vadd.f32 %v684_v9, %v622_v60  ;;  %v695_v14 = vadd.f32 %v689_v2, %v685_v10 }
 0x2f0   : > { %vm696_vm2 = vcmp.gt.f32.partialorder %v692_v11, 0.0  ;;  %vm697_vm3 = vcmp.gt.f32.partialorder %v693_v12, 0.0  ;;  %vm698_vm4 = vcmp.gt.f32.partialorder %v694_v13, 0.0  ;;  %vm699_vm5 = vcmp.gt.f32.partialorder %v695_v14, 0.0 }
 0x2f1   : > { %v700_v15 = vmul.f32 0.2, %v692_v11  ;;  %v701_v16 = vmul.f32 0.2, %v693_v12  ;;  %v702_v17 = vmul.f32 0.2, %v694_v13 }
 0x2f2   : > { %v703_v18 = vmul.f32 0.2, %v695_v14 }
 0x2f3   : > { %v704_v19 = vsel %vm696_vm2, %v692_v11, %v700_v15  ;;  %v705_v20 = vsel %vm697_vm3, %v693_v12, %v701_v16  ;;  %v706_v21 = vsel %vm698_vm4, %v694_v13, %v702_v17  ;;  %vm1781_vm2 = vcmask 916480  }
 0x2f4   : > { %v707_v22 = vsel %vm699_vm5, %v695_v14, %v703_v18  ;;  %708 = vst [vmem:[#allocation4] sm:$0xf] %v704_v19  ;;  %709 = vst [vmem:[#allocation4 + $0x8] sm:$0xf] %v705_v20  ;;  %vm1954_vm3 = vcmask 908288   ;;  %vm11707_vm4 = vcmask 900096  }
 0x2f5   : > { %710 = vst [vmem:[#allocation4 + $0x10] sm:$0xf] %v706_v21  ;;  %711 = vst [vmem:[#allocation4 + $0x18] sm:$0xf] %v707_v22  ;;  %vm2300_vm5 = vcmask 850944  }
 0x2fb   : > { %v718_v24 = vld [vmem:[#allocation4] sm:$0xf]  ;;  %v719_v25 = vld [vmem:[#allocation4 + $0x8] sm:$0xf] }
 0x2fc   : > { %v720_v23 = vld [vmem:[#allocation4 + $0x10] sm:$0xf]  ;;  %726 = vrot.lane.b32.xlu1 %v718_v24, %s11701_s21  ;;  %v721_v27 = vld [vmem:[#allocation4 + $0x18] sm:$0xf] }
 0x2fd   : > { %730 = vrot.lane.b32.xlu0 %v720_v23, %s11701_s21 }
 0x300   : > { %728 = vrot.lane.b32.xlu1 %v719_v25, %s11701_s21 }
 0x301   : > { %1249 = vrot.lane.b32.xlu0 %v10195_v26, %s11717_s24 }
 0x304   : > { %732 = vrot.lane.b32.xlu1 %v721_v27, %s11701_s21 }
 0x305   : > { %1589 = vrot.lane.b32.xlu0 %v10195_v26, %s11709_s25 }
 0x308   : > { %756 = vrot.lane.b32.xlu1 %v10195_v26, %s9990_s26 }
 0x30c   : > { %1079 = vrot.lane.b32.xlu1 %v10195_v26, %s11679_s27 }
 0x310   : > { %1419 = vrot.lane.b32.xlu1 %v10195_v26, %s11683_s28 }
 0x314   : > { %1764 = vrot.lane.b32.xlu1 %v10195_v26, %s11695_s15 }
 0x36e   : > { %v727_v28 = vpop.permute.xlu1 %726 }
 0x36f   : > { %744 = vst.msk [vmem:[#allocation2] sm:$0xf] %vm743_vm7, %v727_v28  ;;  %v731_v29 = vpop.permute.xlu0 %730  ;;  %vm2646_vm7 = vcmask 834560  }
 0x372   : > { %v729_v30 = vpop.permute.xlu1 %728 }
 0x373   : > { %v735_v31 = vsel %vm734_vm8, %v727_v28, %v729_v30  ;;  %v736_v32 = vsel %vm734_vm8, %v729_v30, %v731_v29  ;;  %v10308_v46 = vpop.permute.xlu0 %1249 }
 0x374   : > { %745 = vst [vmem:[#allocation2 + $0x8] sm:$0xf] %v735_v31  ;;  %746 = vst [vmem:[#allocation2 + $0x10] sm:$0xf] %v736_v32 }
 0x376   : > { %v733_v33 = vpop.permute.xlu1 %732  ;;  %v10213_v34 = vld [vmem:[#allocation2] sm:$0xf] }
 0x377   : > { %v10215_v35 = vld [vmem:[#allocation2] sm:$0xf]  ;;  %v737_v36 = vsel %vm734_vm8, %v731_v29, %v733_v33  ;;  %749 = vst.msk [vmem:[#allocation2 + $0x20] sm:$0xf] %vm748_vm9, %v733_v33  ;;  %1081 = vrot.lane.b32.xlu0 %v10213_v34, %s11721_s16  ;;  %762 = vrot.lane.b32.xlu1 %v10213_v34, %s11691_s17  ;;  %v10315_v48 = vpop.permute.xlu0 %1589  ;;  %vm2812_vm9 = vcmask 48128  }
 0x378   : > { %3087 = vst [vmem:[#allocation2] sm:$0xff] %v9986_v0  ;;  %747 = vst [vmem:[#allocation2 + $0x18] sm:$0xf] %v737_v36 }
 0x37a   : > { %v757_v44 = vpop.permute.xlu1 %756 }
 0x37b   : > { %1251 = vrot.lane.b32.xlu0 %v10213_v34, %s11679_s27  ;;  %1421 = vrot.lane.b32.xlu1 %v10213_v34, %s11681_s18  ;;  %v10231_v37 = vld [vmem:[#allocation2 + $0x8] sm:$0xf]  ;;  %v10237_v38 = vld [vmem:[#allocation2 + $0x10] sm:$0xf] }
 0x37c   : > { %v1761_v41 = vld [vmem:[#allocation2 + $0x10] sm:$0xf]  ;;  %v1760_v42 = vld [vmem:[#allocation2 + $0x8] sm:$0xf] }
 0x37e   : > { %v1763_v39 = vld [vmem:[#allocation2 + $0x20] sm:$0xf]  ;;  %v10304_v45 = vpop.permute.xlu1 %1079 }
 0x37f   : > { %1591 = vrot.lane.b32.xlu0 %v10213_v34, %s9997_s19  ;;  %1771 = vrot.lane.b32.xlu1 %v10215_v35, %s11683_s28  ;;  %v10246_v40 = vld [vmem:[#allocation2 + $0x18] sm:$0xf] }
 0x380   : > { %v1762_v43 = vld [vmem:[#allocation2 + $0x18] sm:$0xf] }
 0x382   : > { %v10310_v47 = vpop.permute.xlu1 %1419 }
 0x383   : > { %1944 = vrot.lane.b32.xlu0 %v10215_v35, %s9998_s20  ;;  %764 = vrot.lane.b32.xlu1 %v10231_v37, %s11691_s17 }
 0x386   : > { %v10317_v49 = vpop.permute.xlu1 %1764 }
 0x387   : > { %1083 = vrot.lane.b32.xlu0 %v10231_v37, %s11721_s16  ;;  %766 = vrot.lane.b32.xlu1 %v10237_v38, %s11691_s17 }
 0x38b   : > { %1253 = vrot.lane.b32.xlu0 %v10231_v37, %s11679_s27  ;;  %1779 = vrot.lane.b32.xlu1 %v1763_v39, %s11683_s28 }
 0x38f   : > { %2117 = vrot.lane.b32.xlu0 %v10215_v35, %s11689_s22  ;;  %768 = vrot.lane.b32.xlu1 %v10246_v40, %s11691_s17  ;;  %s10010_s17 = smov 26  }
 0x393   : > { %1425 = vrot.lane.b32.xlu0 %v10237_v38, %s11681_s18  ;;  %1942 = vrot.lane.b32.xlu1 %v10195_v26, %s10000_s23  ;;  %s11697_s23 = smov 96  }
 0x397   : > { %1257 = vrot.lane.b32.xlu0 %v10246_v40, %s11679_s27  ;;  %1085 = vrot.lane.b32.xlu1 %v10237_v38, %s11721_s16 }
 0x39b   : > { %1593 = vrot.lane.b32.xlu0 %v10231_v37, %s9997_s19  ;;  %1255 = vrot.lane.b32.xlu1 %v10237_v38, %s11679_s27  ;;  %s11688_s27 = smov 103  }
 0x39f   : > { %2290 = vrot.lane.b32.xlu0 %v10215_v35, %s11695_s15  ;;  %1087 = vrot.lane.b32.xlu1 %v10246_v40, %s11721_s16 }
 0x3a3   : > { %1775 = vrot.lane.b32.xlu0 %v1761_v41, %s11683_s28  ;;  %1952 = vrot.lane.b32.xlu1 %v1763_v39, %s9998_s20 }
 0x3a7   : > { %1597 = vrot.lane.b32.xlu0 %v10246_v40, %s9997_s19  ;;  %1423 = vrot.lane.b32.xlu1 %v10231_v37, %s11681_s18 }
 0x3ab   : > { %1946 = vrot.lane.b32.xlu0 %v1760_v42, %s9998_s20  ;;  %1595 = vrot.lane.b32.xlu1 %v10237_v38, %s9997_s19 }
 0x3af   : > { %1777 = vrot.lane.b32.xlu0 %v1762_v43, %s11683_s28  ;;  %1427 = vrot.lane.b32.xlu1 %v10246_v40, %s11681_s18  ;;  %s11685_s18 = smov 92  }
 0x3b3   : > { %2119 = vrot.lane.b32.xlu0 %v1760_v42, %s11689_s22  ;;  %2115 = vrot.lane.b32.xlu1 %v10195_v26, %s11697_s23 }
 0x3b7   : > { %2463 = vrot.lane.b32.xlu0 %v10215_v35, %s11688_s27  ;;  %1773 = vrot.lane.b32.xlu1 %v1760_v42, %s11683_s28  ;;  %s11687_s28 = smov 102  }
 0x3bb   : > { %1950 = vrot.lane.b32.xlu0 %v1762_v43, %s9998_s20  ;;  %2125 = vrot.lane.b32.xlu1 %v1763_v39, %s11689_s22 }
 0x3bf   : > { %2292 = vrot.lane.b32.xlu0 %v1760_v42, %s11695_s15  ;;  %1948 = vrot.lane.b32.xlu1 %v1761_v41, %s9998_s20  ;;  %s11724_s20 = smov 88  }
 0x3c3   : > { %2123 = vrot.lane.b32.xlu0 %v1762_v43, %s11689_s22  ;;  %2288 = vrot.lane.b32.xlu1 %v10195_v26, %s11685_s18  ;;  %s11693_s18 = smov 84  }
 0x3c7   : > { %2465 = vrot.lane.b32.xlu0 %v1760_v42, %s11688_s27  ;;  %2121 = vrot.lane.b32.xlu1 %v1761_v41, %s11689_s22  ;;  %s11699_s22 = smov 86  }
 0x3cb   : > { %2296 = vrot.lane.b32.xlu0 %v1762_v43, %s11695_s15  ;;  %2298 = vrot.lane.b32.xlu1 %v1763_v39, %s11695_s15 }
 0x3cf   : > { %2638 = vrot.lane.b32.xlu0 %v1760_v42, %s11687_s28  ;;  %2294 = vrot.lane.b32.xlu1 %v1761_v41, %s11695_s15  ;;  %s11700_s15 = smov 98  }
 0x3d3   : > { %2469 = vrot.lane.b32.xlu0 %v1762_v43, %s11688_s27  ;;  %2461 = vrot.lane.b32.xlu1 %v10195_v26, %s11724_s20 }
 0x3d7   : > { %2636 = vrot.lane.b32.xlu0 %v10215_v35, %s11687_s28  ;;  %2467 = vrot.lane.b32.xlu1 %v1761_v41, %s11688_s27 }
 0x3db   : > { %2642 = vrot.lane.b32.xlu0 %v1762_v43, %s11687_s28  ;;  %2471 = vrot.lane.b32.xlu1 %v1763_v39, %s11688_s27  ;;  %s10008_s27 = smov 36  }
 0x3df   : > { %2640 = vrot.lane.b32.xlu1 %v1761_v41, %s11687_s28 }
 0x3e3   : > { %2634 = vrot.lane.b32.xlu1 %v10195_v26, %s11693_s18  ;;  %s10011_s18 = smov 76  }
 0x3e7   : > { %2644 = vrot.lane.b32.xlu1 %v1763_v39, %s11687_s28  ;;  %s10007_s28 = smov 46  }
 0x3e9   : > { %v1082_v50 = vpop.permute.xlu0 %1081  ;;  %v763_v51 = vpop.permute.xlu1 %762 }
 0x3ed   : > { %v1252_v52 = vpop.permute.xlu0 %1251  ;;  %v10320_v53 = vpop.permute.xlu1 %1421 }
 0x3f1   : > { %v10322_v54 = vpop.permute.xlu0 %1591  ;;  %v10324_v55 = vpop.permute.xlu1 %1771 }
 0x3f5   : > { %v10326_v56 = vpop.permute.xlu0 %1944  ;;  %v765_v57 = vpop.permute.xlu1 %764 }
 0x3f6   : > { %v771_v61 = vsel %vm770_vm10, %v763_v51, %v765_v57 }
 0x3f9   : > { %v1084_v58 = vpop.permute.xlu0 %1083  ;;  %v767_v59 = vpop.permute.xlu1 %766 }
 0x3fa   : > { %v772_v60 = vsel %vm770_vm10, %v765_v57, %v767_v59  ;;  %v1090_v9 = vsel %vm1089_vm12, %v1082_v50, %v1084_v58 }
 0x3fb   : > { %8601 = vmatprep.subr.msk.mxu0 %vm623_vm1, %v772_v60 }
 0x3fc   : > { %8602 = vmatpush1.msk.msra.mxu0 %vm623_vm1, %v771_v61 }
 0x3fd   : > { %v1254_v62 = vpop.permute.xlu0 %1253  ;;  %8603 = vmatmul.mubr.msk.f32.vlgmr.msra.gmra.mrb[2].mxu0 %vm11706_vm11, %v757_v44  ;;  %8607 = vmatprep.subr.msk.mxu0 %vm623_vm1, %v10231_v37  ;;  %v10335_v63 = vpop.permute.xlu1 %1779 }
 0x3fe   : > { %8608 = vmatpush1.msk.msra.mxu0 %vm623_vm1, %v10213_v34  ;;  %1001 = vmatprep.mubr.f32.mxu0 %v9986_v0  ;;  %v1260_v13 = vsel %vm11708_vm13, %v1252_v52, %v1254_v62 }
 0x401   : > { %v10340_v1 = vpop.permute.xlu0 %2117  ;;  %v769_v2 = vpop.permute.xlu1 %768 }
 0x402   : > { %v773_v3 = vsel %vm770_vm10, %v767_v59, %v769_v2  ;;  %8604 = vmatprep.subr.msk.mxu1 %vm623_vm1, %v769_v2 }
 0x403   : > { %8605 = vmatpush1.msk.msra.mxu1 %vm623_vm1, %v773_v3 }
 0x404   : > { %8606 = vmatmul.mubr.msk.f32.vlgmr.msra.gmra.mrb[2].mxu1 %vm11706_vm11, %v757_v44  ;;  %8610 = vmatprep.subr.msk.mxu1 %vm623_vm1, %v10246_v40 }
 0x405   : > { %v1426_v4 = vpop.permute.xlu0 %1425  ;;  %8609 = vmatmul.mubr.msk.f32.vlgmr.msra.gmra.mrb[2].mxu0 %vm11706_vm11, %v10195_v26  ;;  %8611 = vmatpush1.msk.msra.mxu1 %vm623_vm1, %v10237_v38  ;;  %v10352_v5 = vpop.permute.xlu1 %1942 }
 0x406   : > { %1072 = vmatprep.mubr.f32.mxu1 %v9986_v0  ;;  %1167 = vmatprep.mubr.f32.mxu0 %v9986_v0 }
 0x409   : > { %v1258_v6 = vpop.permute.xlu0 %1257  ;;  %v1086_v7 = vpop.permute.xlu1 %1085 }
 0x40a   : > { %v1091_v8 = vsel %vm1089_vm12, %v1084_v58, %v1086_v7 }
 0x40b   : > { %8613 = vmatprep.subr.msk.mxu0 %vm623_vm1, %v1091_v8 }
 0x40c   : > { %8612 = vmatmul.mubr.msk.f32.vlgmr.msra.gmra.mrb[2].mxu1 %vm11706_vm11, %v10195_v26  ;;  %8614 = vmatpush1.msk.msra.mxu0 %vm623_vm1, %v1090_v9 }
 0x40d   : > { %v1594_v10 = vpop.permute.xlu0 %1593  ;;  %8615 = vmatmul.mubr.msk.f32.vlgmr.msra.gmra.mrb[2].mxu0 %vm11706_vm11, %v10304_v45  ;;  %v1256_v11 = vpop.permute.xlu1 %1255  ;;  %1238 = vmatprep.mubr.f32.mxu1 %v9986_v0 }
 0x40e   : > { %v1261_v12 = vsel %vm11708_vm13, %v1254_v62, %v1256_v11  ;;  %1337 = vmatprep.mubr.f32.mxu0 %v9986_v0  ;;  %v1262_v17 = vsel %vm11708_vm13, %v1256_v11, %v1258_v6  ;;  %v1600_v27 = vsel %vm1599_vm15, %v10322_v54, %v1594_v10  ;;  %vm2945_vm13 = vcmask 982928  }
 0x40f   : > { %8619 = vmatprep.subr.msk.mxu0 %vm623_vm1, %v1261_v12 }
 0x410   : > { %8620 = vmatpush1.msk.msra.mxu0 %vm623_vm1, %v1260_v13 }
 0x411   : > { %v10370_v14 = vpop.permute.xlu0 %2290  ;;  %v1088_v15 = vpop.permute.xlu1 %1087 }
 0x412   : > { %v1092_v16 = vsel %vm1089_vm12, %v1086_v7, %v1088_v15  ;;  %8616 = vmatprep.subr.msk.mxu1 %vm623_vm1, %v1088_v15 }
 0x413   : > { %8617 = vmatpush1.msk.msra.mxu1 %vm623_vm1, %v1092_v16 }
 0x414   : > { %8618 = vmatmul.mubr.msk.f32.vlgmr.msra.gmra.mrb[2].mxu1 %vm11706_vm11, %v10304_v45  ;;  %8622 = vmatprep.subr.msk.mxu1 %vm623_vm1, %v1258_v6 }
 0x415   : > { %v1776_v18 = vpop.permute.xlu0 %1775  ;;  %8621 = vmatmul.mubr.msk.f32.vlgmr.msra.gmra.mrb[2].mxu0 %vm11706_vm11, %v10308_v46  ;;  %8623 = vmatpush1.msk.msra.mxu1 %vm623_vm1, %v1262_v17  ;;  %v1953_v19 = vpop.permute.xlu1 %1952 }
 0x416   : > { %1408 = vmatprep.mubr.f32.mxu1 %v9986_v0  ;;  %1507 = vmatprep.mubr.f32.mxu0 %v9986_v0 }
 0x419   : > { %v1598_v20 = vpop.permute.xlu0 %1597  ;;  %v1424_v21 = vpop.permute.xlu1 %1423 }
 0x41a   : > { %v1430_v22 = vsel %vm1429_vm14, %v10320_v53, %v1424_v21  ;;  %v1431_v23 = vsel %vm1429_vm14, %v1424_v21, %v1426_v4 }
 0x41b   : > { %8625 = vmatprep.subr.msk.mxu0 %vm623_vm1, %v1431_v23 }
 0x41c   : > { %8624 = vmatmul.mubr.msk.f32.vlgmr.msra.gmra.mrb[2].mxu1 %vm11706_vm11, %v10308_v46  ;;  %8626 = vmatpush1.msk.msra.mxu0 %vm623_vm1, %v1430_v22 }
 0x41d   : > { %v1947_v24 = vpop.permute.xlu0 %1946  ;;  %8627 = vmatmul.mubr.msk.f32.vlgmr.msra.gmra.mrb[2].mxu0 %vm11706_vm11, %v10310_v47  ;;  %v1596_v25 = vpop.permute.xlu1 %1595  ;;  %1578 = vmatprep.mubr.f32.mxu1 %v9986_v0 }
 0x41e   : > { %v1601_v26 = vsel %vm1599_vm15, %v1594_v10, %v1596_v25  ;;  %1677 = vmatprep.mubr.f32.mxu0 %v9986_v0  ;;  %v1602_v31 = vsel %vm1599_vm15, %v1596_v25, %v1598_v20 }
 0x41f   : > { %8631 = vmatprep.subr.msk.mxu0 %vm623_vm1, %v1601_v26 }
 0x420   : > { %8632 = vmatpush1.msk.msra.mxu0 %vm623_vm1, %v1600_v27 }
 0x421   : > { %v1778_v28 = vpop.permute.xlu0 %1777  ;;  %v1428_v29 = vpop.permute.xlu1 %1427 }
 0x422   : > { %v1432_v30 = vsel %vm1429_vm14, %v1426_v4, %v1428_v29  ;;  %8628 = vmatprep.subr.msk.mxu1 %vm623_vm1, %v1428_v29  ;;  %v1785_v34 = vsel %vm1781_vm2, %v1778_v28, %v10335_v63  ;;  %v1784_v39 = vsel %vm1781_vm2, %v1776_v18, %v1778_v28  ;;  %vm2974_vm14 = vcmask 130128  }
 0x423   : > { %8629 = vmatpush1.msk.msra.mxu1 %vm623_vm1, %v1432_v30 }
 0x424   : > { %8630 = vmatmul.mubr.msk.f32.vlgmr.msra.gmra.mrb[2].mxu1 %vm11706_vm11, %v10310_v47  ;;  %8634 = vmatprep.subr.msk.mxu1 %vm623_vm1, %v1598_v20  ;;  %v1955_v47 = vsel %vm1954_vm3, %v10326_v56, %v1947_v24 }
 0x425   : > { %v2120_v32 = vpop.permute.xlu0 %2119  ;;  %8633 = vmatmul.mubr.msk.f32.vlgmr.msra.gmra.mrb[2].mxu0 %vm11706_vm11, %v10315_v48  ;;  %8635 = vmatpush1.msk.msra.mxu1 %vm623_vm1, %v1602_v31  ;;  %v2116_v33 = vpop.permute.xlu1 %2115 }
 0x426   : > { %8640 = vmatprep.subr.msk.mxu1 %vm623_vm1, %v1785_v34  ;;  %1748 = vmatprep.mubr.f32.mxu1 %v9986_v0 }
 0x427   : > { %1860 = vmatprep.mubr.f32.mxu0 %v9986_v0 }
 0x429   : > { %v10415_v35 = vpop.permute.xlu0 %2463  ;;  %v1774_v36 = vpop.permute.xlu1 %1773 }
 0x42a   : > { %v1782_v37 = vsel %vm1781_vm2, %v10324_v55, %v1774_v36  ;;  %v1783_v38 = vsel %vm1781_vm2, %v1774_v36, %v1776_v18  ;;  %v2128_v55 = vsel %vm11707_vm4, %v10340_v1, %v2120_v32  ;;  %vm2826_vm2 = vcmask 146528  }
 0x42b   : > { %8637 = vmatprep.subr.msk.mxu0 %vm623_vm1, %v1783_v38 }
 0x42c   : > { %8636 = vmatmul.mubr.msk.f32.vlgmr.msra.gmra.mrb[2].mxu1 %vm11706_vm11, %v10315_v48  ;;  %8638 = vmatpush1.msk.msra.mxu0 %vm623_vm1, %v1782_v37 }
 0x42d   : > { %8641 = vmatpush1.msk.msra.mxu1 %vm623_vm1, %v1784_v39  ;;  %v1951_v40 = vpop.permute.xlu0 %1950  ;;  %8639 = vmatmul.mubr.msk.f32.vlgmr.msra.gmra.mrb[2].mxu0 %vm11706_vm11, %v10317_v49  ;;  %v2126_v41 = vpop.permute.xlu1 %2125 }
 0x42e   : > { %v1958_v42 = vsel %vm1954_vm3, %v1951_v40, %v1953_v19  ;;  %1931 = vmatprep.mubr.f32.mxu1 %v9986_v0  ;;  %2033 = vmatprep.mubr.f32.mxu0 %v9986_v0 }
 0x42f   : > { %8646 = vmatprep.subr.msk.mxu1 %vm623_vm1, %v1958_v42 }
 0x431   : > { %v2293_v43 = vpop.permute.xlu0 %2292  ;;  %v1949_v44 = vpop.permute.xlu1 %1948 }
 0x432   : > { %v1957_v45 = vsel %vm1954_vm3, %v1949_v44, %v1951_v40  ;;  %v1956_v46 = vsel %vm1954_vm3, %v1947_v24, %v1949_v44  ;;  %v2301_v62 = vsel %vm2300_vm5, %v10370_v14, %v2293_v43  ;;  %vm2833_vm3 = vcmask 195728  }
 0x433   : > { %8643 = vmatprep.subr.msk.mxu0 %vm623_vm1, %v1956_v46 }
 0x434   : > { %8642 = vmatmul.mubr.msk.f32.vlgmr.msra.gmra.mrb[2].mxu1 %vm11706_vm11, %v10317_v49  ;;  %8644 = vmatpush1.msk.msra.mxu0 %vm623_vm1, %v1955_v47 }
 0x435   : > { %8647 = vmatpush1.msk.msra.mxu1 %vm623_vm1, %v1957_v45  ;;  %v2124_v48 = vpop.permute.xlu0 %2123  ;;  %8645 = vmatmul.mubr.msk.f32.vlgmr.msra.gmra.mrb[2].mxu0 %vm11706_vm11, %v10352_v5  ;;  %v2289_v50 = vpop.permute.xlu1 %2288 }
 0x436   : > { %v2131_v51 = vsel %vm11707_vm4, %v2124_v48, %v2126_v41  ;;  %2104 = vmatprep.mubr.f32.mxu1 %v9986_v0  ;;  %2206 = vmatprep.mubr.f32.mxu0 %v9986_v0 }
 0x437   : > { %8652 = vmatprep.subr.msk.mxu1 %vm623_vm1, %v2131_v51 }
 0x439   : > { %v2466_v52 = vpop.permute.xlu0 %2465  ;;  %v2122_v49 = vpop.permute.xlu1 %2121 }
 0x43a   : > { %v2130_v53 = vsel %vm11707_vm4, %v2122_v49, %v2124_v48  ;;  %v2129_v54 = vsel %vm11707_vm4, %v2120_v32, %v2122_v49  ;;  %vm2938_vm4 = vcmask 933728  }
 0x43b   : > { %8649 = vmatprep.subr.msk.mxu0 %vm623_vm1, %v2129_v54 }
 0x43c   : > { %8648 = vmatmul.mubr.msk.f32.vlgmr.msra.gmra.mrb[2].mxu1 %vm11706_vm11, %v10352_v5  ;;  %8650 = vmatpush1.msk.msra.mxu0 %vm623_vm1, %v2128_v55  ;;  %v2474_v5 = vsel %vm2473_vm6, %v10415_v35, %v2466_v52 }
 0x43d   : > { %8653 = vmatpush1.msk.msra.mxu1 %vm623_vm1, %v2130_v53  ;;  %v2297_v56 = vpop.permute.xlu0 %2296  ;;  %8651 = vmatmul.mubr.msk.f32.vlgmr.msra.gmra.mrb[2].mxu0 %vm11706_vm11, %v2116_v33  ;;  %v2299_v57 = vpop.permute.xlu1 %2298 }
 0x43e   : > { %v2304_v58 = vsel %vm2300_vm5, %v2297_v56, %v2299_v57  ;;  %2277 = vmatprep.mubr.f32.mxu1 %v9986_v0  ;;  %2379 = vmatprep.mubr.f32.mxu0 %v9986_v0 }
 0x43f   : > { %8658 = vmatprep.subr.msk.mxu1 %vm623_vm1, %v2304_v58 }
 0x441   : > { %v2295_v59 = vpop.permute.xlu1 %2294  ;;  %v2639_v63 = vpop.permute.xlu0 %2638 }
 0x442   : > { %v2303_v60 = vsel %vm2300_vm5, %v2295_v59, %v2297_v56  ;;  %v2302_v61 = vsel %vm2300_vm5, %v2293_v43, %v2295_v59  ;;  %vm2840_vm5 = vcmask 244928  }
 0x443   : > { %8655 = vmatprep.subr.msk.mxu0 %vm623_vm1, %v2302_v61 }
 0x444   : > { %8654 = vmatmul.mubr.msk.f32.vlgmr.msra.gmra.mrb[2].mxu1 %vm11706_vm11, %v2116_v33  ;;  %8656 = vmatpush1.msk.msra.mxu0 %vm623_vm1, %v2301_v62 }
 0x445   : > { %8659 = vmatpush1.msk.msra.mxu1 %vm623_vm1, %v2303_v60  ;;  %8657 = vmatmul.mubr.msk.f32.vlgmr.msra.gmra.mrb[2].mxu0 %vm11706_vm11, %v2289_v50  ;;  %v2462_v1 = vpop.permute.xlu1 %2461  ;;  %v2470_v3 = vpop.permute.xlu0 %2469 }
 0x446   : > { %2450 = vmatprep.mubr.f32.mxu1 %v9986_v0  ;;  %2552 = vmatprep.mubr.f32.mxu0 %v9986_v0 }
 0x449   : > { %v2468_v2 = vpop.permute.xlu1 %2467  ;;  %v2637_v9 = vpop.permute.xlu0 %2636 }
 0x44a   : > { %v2475_v4 = vsel %vm2473_vm6, %v2466_v52, %v2468_v2  ;;  %v2476_v8 = vsel %vm2473_vm6, %v2468_v2, %v2470_v3  ;;  %v2647_v12 = vsel %vm2646_vm7, %v2637_v9, %v2639_v63 }
 0x44b   : > { %8661 = vmatprep.subr.msk.mxu0 %vm623_vm1, %v2475_v4 }
 0x44c   : > { %8660 = vmatmul.mubr.msk.f32.vlgmr.msra.gmra.mrb[2].mxu1 %vm11706_vm11, %v2289_v50  ;;  %8662 = vmatpush1.msk.msra.mxu0 %vm623_vm1, %v2474_v5 }
 0x44d   : > { %8663 = vmatmul.mubr.msk.f32.vlgmr.msra.gmra.mrb[2].mxu0 %vm11706_vm11, %v2462_v1  ;;  %v2472_v6 = vpop.permute.xlu1 %2471  ;;  %2623 = vmatprep.mubr.f32.mxu1 %v9986_v0  ;;  %v2643_v14 = vpop.permute.xlu0 %2642 }
 0x44e   : > { %v2477_v7 = vsel %vm2473_vm6, %v2470_v3, %v2472_v6  ;;  %2725 = vmatprep.mubr.f32.mxu0 %v9986_v0  ;;  %vm2847_vm6 = vcmask 294128  }
 0x44f   : > { %8664 = vmatprep.subr.msk.mxu1 %vm623_vm1, %v2477_v7 }
 0x450   : > { %8665 = vmatpush1.msk.msra.mxu1 %vm623_vm1, %v2476_v8 }
 0x451   : > { %v2641_v10 = vpop.permute.xlu1 %2640 }
 0x452   : > { %v2648_v11 = vsel %vm2646_vm7, %v2639_v63, %v2641_v10  ;;  %v2649_v17 = vsel %vm2646_vm7, %v2641_v10, %v2643_v14 }
 0x453   : > { %8667 = vmatprep.subr.msk.mxu0 %vm623_vm1, %v2648_v11 }
 0x454   : > { %8666 = vmatmul.mubr.msk.f32.vlgmr.msra.gmra.mrb[2].mxu1 %vm11706_vm11, %v2462_v1  ;;  %8668 = vmatpush1.msk.msra.mxu0 %vm623_vm1, %v2647_v12 }
 0x455   : > { %v2635_v13 = vpop.permute.xlu1 %2634  ;;  %2796 = vmatprep.mubr.f32.mxu1 %v9986_v0 }
 0x456   : > { %8669 = vmatmul.mubr.msk.f32.vlgmr.msra.gmra.mrb[2].mxu0 %vm11706_vm11, %v2635_v13 }
 0x457   : > { %3193 = vmatprep.mubr.f32.mxu0 %v9986_v0 }
 0x459   : > { %v2645_v15 = vpop.permute.xlu1 %2644 }
 0x45a   : > { %v2650_v16 = vsel %vm2646_vm7, %v2643_v14, %v2645_v15  ;;  %vm2854_vm7 = vcmask 343328  }
 0x45b   : > { %8670 = vmatprep.subr.msk.mxu1 %vm623_vm1, %v2650_v16 }
 0x45c   : > { %8671 = vmatpush1.msk.msra.mxu1 %vm623_vm1, %v2649_v17  ;;  %vm2967_vm1 = vcmask 80928  }
 0x45d   : > { %8672 = vmatmul.mubr.msk.f32.vlgmr.msra.gmra.mrb[2].mxu1 %vm11706_vm11, %v2635_v13 }
 0x529   : > { %v2727_v18 = vpop.f32.mrb[2].mxu0 }
 0x52a   : > { %v2729_v19 = vpop.f32.mrb[3].mxu0  ;;  %2813 = vst.msk [vmem:[#allocation4] sm:$0xff] %vm2812_vm9, %v2727_v18  ;;  %vm2861_vm9 = vcmask 392528  }
 0x52b   : > { %2808 = vst [vmem:[#allocation3 + $0x8] sm:$0xff] %v2729_v19 }
 0x530   : > { %v2798_v20 = vpop.f32.mrb[2].mxu1 }
 0x531   : > { %v2800_v21 = vpop.f32.mrb[3].mxu1  ;;  %2956 = vrot.lane.b32.xlu0 %v2798_v20, %s10007_s28  ;;  %2921 = vrot.lane.b32.xlu1 %v2798_v20, %s11697_s23  ;;  %s10013_s28 = smov 78   ;;  %s10014_s23 = smov 68  }
 0x532   : > { %2810 = vst.msk [vmem:[#allocation3 + $0x18] sm:$0xff] %vm1599_vm15, %v2800_v21  ;;  %vm2819_vm15 = vcmask 97328  }
 0x535   : > { %2964 = vrot.lane.b32.xlu0 %v2798_v20, %s10008_s27  ;;  %2928 = vrot.lane.b32.xlu1 %v2798_v20, %s11699_s22  ;;  %s10015_s27 = smov 58   ;;  %s11711_s22 = smov 48  }
 0x539   : > { %2971 = vrot.lane.b32.xlu0 %v2798_v20, %s10010_s17  ;;  %2935 = vrot.lane.b32.xlu1 %v2798_v20, %s10011_s18  ;;  %v2976_v22 = vld [vmem:[#allocation3 + $0x18] sm:$0xff]  ;;  %s10017_s17 = smov 28   ;;  %s11703_s18 = smov 16  }
 0x53d   : > { %2816 = vrot.lane.b32.xlu0 %v2727_v18, %s9997_s19  ;;  %2823 = vrot.lane.b32.xlu1 %v2727_v18, %s11709_s25  ;;  %s10019_s19 = smov 18   ;;  %s11764_s25 = smov 116  }
 0x541   : > { %2830 = vrot.lane.b32.xlu0 %v2727_v18, %s11700_s15  ;;  %2837 = vrot.lane.b32.xlu1 %v2727_v18, %s11724_s20  ;;  %s10020_s15 = smov 6  }
 0x545   : > { %2844 = vrot.lane.b32.xlu0 %v2727_v18, %s10013_s28  ;;  %2851 = vrot.lane.b32.xlu1 %v2727_v18, %s10014_s23  ;;  %s11715_s23 = smov 114   ;;  %s11755_s28 = smov 104  }
 0x549   : > { %2858 = vrot.lane.b32.xlu0 %v2727_v18, %s10015_s27  ;;  %2865 = vrot.lane.b32.xlu1 %v2729_v19, %s11711_s22  ;;  %s10022_s27 = smov 106   ;;  %v3034_v18 = vld [vmem:[%s11757_s8] sm:$0xff]  ;;  %s11722_s22 = smov 80  }
 0x54d   : > { %2879 = vrot.lane.b32.xlu1 %v2729_v19, %s10017_s17  ;;  %2978 = vrot.lane.b32.xlu0 %v2976_v22, %s11703_s18  ;;  %s10023_s17 = smov 38   ;;  %s10027_s18 = smov 74  }
 0x551   : > { %2886 = vrot.lane.b32.xlu1 %v2729_v19, %s10019_s19  ;;  %2985 = vrot.lane.b32.xlu0 %v2976_v22, %s10020_s15  ;;  %s10024_s19 = smov 66   ;;  %s10025_s15 = smov 94  }
 0x555   : > { %2893 = vrot.lane.b32.xlu1 %v2729_v19, %s11701_s21  ;;  %2992 = vrot.lane.b32.xlu0 %v2976_v22, %s9990_s26  ;;  %s11713_s21 = smov 56   ;;  %s11756_s26 = smov 84  }
 0x559   : > { %2900 = vrot.lane.b32.xlu1 %v2729_v19, %s11721_s16  ;;  %2999 = vrot.lane.b32.xlu0 %v2976_v22, %s11715_s23  ;;  %s11761_s23 = smov 120  }
 0x55d   : > { %2907 = vrot.lane.b32.xlu1 %v2729_v19, %s11717_s24  ;;  %3006 = vrot.lane.b32.xlu0 %v2976_v22, %s11755_s28  ;;  %s11759_s24 = smov 127  }
 0x561   : > { %2914 = vrot.lane.b32.xlu1 %v2729_v19, %s10022_s27  ;;  %2872 = vrot.lane.b32.xlu0 %v2729_v19, %s10023_s17  ;;  %v3035_v19 = vld [vmem:[%s11757_s8 + $0x8] sm:$0xff] }
 0x565   : > { %2942 = vrot.lane.b32.xlu1 %v2798_v20, %s10024_s19  ;;  %3013 = vrot.lane.b32.xlu0 %v2976_v22, %s10025_s15 }
 0x569   : > { %2949 = vrot.lane.b32.xlu1 %v2798_v20, %s11713_s21  ;;  %3020 = vrot.lane.b32.xlu0 %v2976_v22, %s11756_s26  ;;  %s10028_s21 = smov 12  }
 0x56d   : > { %3027 = vrot.lane.b32.xlu0 %v2976_v22, %s10027_s18 }
 0x5a3   : > { %v10503_v23 = vpop.permute.xlu0 %2956  ;;  %v10505_v24 = vpop.permute.xlu1 %2921 }
 0x5a4   : > { %2961 = vst.msk [vmem:[#allocation4 + $0x8] sm:$0xff] %vm11706_vm11, %v10503_v23  ;;  %vm3023_vm11 = vcmask 474528  }
 0x5a7   : > { %v2965_v25 = vpop.permute.xlu0 %2964  ;;  %v10509_v26 = vpop.permute.xlu1 %2928 }
 0x5a8   : > { %2968 = vst.msk [vmem:[#allocation4 + $0x8] sm:$0xff] %vm2967_vm1, %v2965_v25  ;;  %vm2868_vm1 = vcmask 441728  }
 0x5ab   : > { %v2972_v27 = vpop.permute.xlu0 %2971  ;;  %v10511_v28 = vpop.permute.xlu1 %2935 }
 0x5ac   : > { %2975 = vst.msk [vmem:[#allocation4 + $0x8] sm:$0xff] %vm2974_vm14, %v2972_v27  ;;  %vm2981_vm14 = vcmask 179328  }
 0x5af   : > { %v2817_v29 = vpop.permute.xlu0 %2816  ;;  %v2824_v30 = vpop.permute.xlu1 %2823 }
 0x5b0   : > { %2820 = vst.msk [vmem:[#allocation4] sm:$0xff] %vm2819_vm15, %v2817_v29  ;;  %vm2988_vm15 = vcmask 228528  }
 0x5b1   : > { %2827 = vst.msk [vmem:[#allocation4] sm:$0xff] %vm2826_vm2, %v2824_v30  ;;  %vm2995_vm2 = vcmask 277728  }
 0x5b3   : > { %v2831_v31 = vpop.permute.xlu0 %2830  ;;  %v2838_v32 = vpop.permute.xlu1 %2837 }
 0x5b4   : > { %2834 = vst.msk [vmem:[#allocation4] sm:$0xff] %vm2833_vm3, %v2831_v31  ;;  %vm3002_vm3 = vcmask 326928  }
 0x5b5   : > { %2841 = vst.msk [vmem:[#allocation4] sm:$0xff] %vm2840_vm5, %v2838_v32  ;;  %vm3009_vm5 = vcmask 376128  }
 0x5b7   : > { %v2845_v33 = vpop.permute.xlu0 %2844  ;;  %v2852_v34 = vpop.permute.xlu1 %2851 }
 0x5b8   : > { %2848 = vst.msk [vmem:[#allocation4] sm:$0xff] %vm2847_vm6, %v2845_v33  ;;  %vm2875_vm6 = vcmask 490928  }
 0x5b9   : > { %2855 = vst.msk [vmem:[#allocation4] sm:$0xff] %vm2854_vm7, %v2852_v34  ;;  %vm2882_vm7 = vcmask 540128  }
 0x5bb   : > { %v2859_v35 = vpop.permute.xlu0 %2858  ;;  %v2866_v36 = vpop.permute.xlu1 %2865 }
 0x5bc   : > { %2862 = vst.msk [vmem:[#allocation4] sm:$0xff] %vm2861_vm9, %v2859_v35  ;;  %vm2889_vm9 = vcmask 589328  }
 0x5bd   : > { %2869 = vst.msk [vmem:[#allocation4] sm:$0xff] %vm2868_vm1, %v2866_v36  ;;  %vm2896_vm1 = vcmask 638528  }
 0x5bf   : > { %v2880_v37 = vpop.permute.xlu1 %2879  ;;  %v2979_v38 = vpop.permute.xlu0 %2978 }
 0x5c0   : > { %2982 = vst.msk [vmem:[#allocation4 + $0x8] sm:$0xff] %vm2981_vm14, %v2979_v38  ;;  %vm2903_vm14 = vcmask 687728   ;;  %v10540_v38 = vld [vmem:[%s11760_s3] sm:$0xff] }
 0x5c3   : > { %v2887_v39 = vpop.permute.xlu1 %2886  ;;  %v2986_v40 = vpop.permute.xlu0 %2985 }
 0x5c4   : > { %2989 = vst.msk [vmem:[#allocation4 + $0x8] sm:$0xff] %vm2988_vm15, %v2986_v40  ;;  %vm3016_vm15 = vcmask 425328   ;;  %v10550_v40 = vld [vmem:[%s11760_s3 + $0x8] sm:$0xff]  ;;  %s11780_s3 = smov 8  }
 0x5c7   : > { %v2894_v41 = vpop.permute.xlu1 %2893  ;;  %v2993_v42 = vpop.permute.xlu0 %2992 }
 0x5c8   : > { %2996 = vst.msk [vmem:[#allocation4 + $0x8] sm:$0xff] %vm2995_vm2, %v2993_v42  ;;  %vm2910_vm2 = vcmask 736928  }
 0x5cb   : > { %v2901_v43 = vpop.permute.xlu1 %2900  ;;  %v3000_v44 = vpop.permute.xlu0 %2999 }
 0x5cc   : > { %3003 = vst.msk [vmem:[#allocation4 + $0x8] sm:$0xff] %vm3002_vm3, %v3000_v44  ;;  %vm2924_vm3 = vcmask 835328  }
 0x5cf   : > { %v2908_v45 = vpop.permute.xlu1 %2907  ;;  %v3007_v46 = vpop.permute.xlu0 %3006 }
 0x5d0   : > { %3010 = vst.msk [vmem:[#allocation4 + $0x8] sm:$0xff] %vm3009_vm5, %v3007_v46  ;;  %vm2931_vm5 = vcmask 884528  }
 0x5d3   : > { %v2915_v47 = vpop.permute.xlu1 %2914  ;;  %v2873_v48 = vpop.permute.xlu0 %2872 }
 0x5d4   : > { %2876 = vst.msk [vmem:[#allocation4] sm:$0xff] %vm2875_vm6, %v2873_v48  ;;  %vm2952_vm6 = vcmask 1032128  }
 0x5d5   : > { %2883 = vst.msk [vmem:[#allocation4] sm:$0xff] %vm2882_vm7, %v2880_v37  ;;  %vm2959_vm7 = vcmask 1048560  }
 0x5d6   : > { %2890 = vst.msk [vmem:[#allocation4] sm:$0xff] %vm2889_vm9, %v2887_v39  ;;  %vm3030_vm9 = vcmask 523728  }
 0x5d7   : > { %2897 = vst.msk [vmem:[#allocation4] sm:$0xff] %vm2896_vm1, %v2894_v41  ;;  %v3014_v50 = vpop.permute.xlu0 %3013  ;;  %v2943_v51 = vpop.permute.xlu1 %2942  ;;  %vm3102_vm1 = vcmask 1047648  }
 0x5d8   : > { %2904 = vst.msk [vmem:[#allocation4] sm:$0xff] %vm2903_vm14, %v2901_v43  ;;  %vm3098_vm14 = vcmask 97280  }
 0x5d9   : > { %3017 = vst.msk [vmem:[#allocation4 + $0x8] sm:$0xff] %vm3016_vm15, %v3014_v50  ;;  %vm3104_vm15 = vcmask 621568  }
 0x5da   : > { %2911 = vst.msk [vmem:[#allocation4] sm:$0xff] %vm2910_vm2, %v2908_v45  ;;  %vm3875_vm2 = vcmask 932864  }
 0x5db   : > { %2918 = vst.msk [vmem:[#allocation4] sm:$0xff] %vm2917_vm0, %v2915_v47  ;;  %v3021_v52 = vpop.permute.xlu0 %3020  ;;  %v2950_v49 = vpop.permute.xlu1 %2949  ;;  %vm3038_vm0 = vcmask 523264  }
 0x5dc   : > { %2925 = vst.msk [vmem:[#allocation4] sm:$0xff] %vm2924_vm3, %v10505_v24  ;;  %v3037_v24 = vld [vmem:[%s11758_s9 + $0x8] sm:$0xff]  ;;  %vm11770_vm3 = vcmask 982016  }
 0x5dd   : > { %2932 = vst.msk [vmem:[#allocation4] sm:$0xff] %vm2931_vm5, %v10509_v26  ;;  %vm3681_vm5 = vcmask 949248  }
 0x5de   : > { %3024 = vst.msk [vmem:[#allocation4 + $0x8] sm:$0xff] %vm3023_vm11, %v3021_v52  ;;  %vm3088_vm11 = vcmask 719872  }
 0x5df   : > { %2939 = vst.msk [vmem:[#allocation4] sm:$0xff] %vm2938_vm4, %v10511_v28  ;;  %v3028_v53 = vpop.permute.xlu0 %3027 }
 0x5e0   : > { %2946 = vst.msk [vmem:[#allocation4] sm:$0xff] %vm2945_vm13, %v2943_v51 }
 0x5e1   : > { %2953 = vst.msk [vmem:[#allocation4] sm:$0xff] %vm2952_vm6, %v2950_v49  ;;  %vm3778_vm6 = vcmask 941056  }
 0x5e2   : > { %2960 = vst.msk [vmem:[#allocation4] sm:$0xff] %vm2959_vm7, %v10503_v23  ;;  %v3036_v23 = vld [vmem:[%s11758_s9] sm:$0xff]  ;;  %vm11771_vm7 = vcmask 900096   ;;  %s10039_s9 = smov 7  }
 0x5e3   : > { %3031 = vst.msk [vmem:[#allocation4 + $0x8] sm:$0xff] %vm3030_vm9, %v3028_v53  ;;  %vm4068_vm9 = vcmask 891904  }
 0x5e4   : > { %3089 = vst.msk [vmem:[#allocation2 + $0x8] sm:$0xff] %vm3088_vm11, %v9986_v0  ;;  %vm4255_vm11 = vcmask 556032  }
 0x5e5   : > { %4520 = vst.msk [vmem:[#allocation2 + $0x28] sm:$0xff] %vm3875_vm2, %v9986_v0 }
 0x5e9   : > { %v3032_v54 = vld [vmem:[#allocation4] sm:$0xff] }
 0x5ea   : > { %v3033_v55 = vld [vmem:[#allocation4 + $0x8] sm:$0xff] }
 0x5eb   : > { %v3039_v56 = vsel %vm3038_vm0, %v3033_v55, 0.0 }
 0x5ec   : > { %v3040_v57 = vadd.f32 %v3039_v56, %v3032_v54 }
 0x5ee   : > { %3041 = vadd.xlane.f32.xlu1 %v3040_v57 }
 0x67b   : > { %v3042_v58 = vpop.xlane.xlu1 %3041 }
 0x67c   : > { %v3043_v59 = vrot.slane %v3042_v58, 4 }
 0x67e   : > { %v3044_v60 = vadd.f32 %v3043_v59, %v3042_v58 }
 0x680   : > { %v3045_v61 = vrot.slane %v3044_v60, 2 }
 0x682   : > { %v3046_v62 = vadd.f32 %v3045_v61, %v3044_v60 }
 0x684   : > { %v3047_v63 = vrot.slane %v3046_v62, 1 }
 0x686   : > { %v3048_v1 = vadd.f32 %v3047_v63, %v3046_v62 }
 0x688   : > { %9694 = vpush %v3048_v1 }
 0x6b9   : > { %s9695_s18 = spop %9694 }
 0x6ba   : > { %s3050_s27 = smul.f32 0.0006510417, %s9695_s18 }
 0x6bc   : > { %v3051_v2 = vstv %s3050_s27  ;;  %s11762_s27 = smov 112  }
 0x6bd   : > { %v3052_v3 = vsub.f32 %v3032_v54, %v3051_v2  ;;  %v3053_v4 = vsub.f32 %v3033_v55, %v3051_v2 }
 0x6bf   : > { %v3055_v5 = vmul.f32 %v3053_v4, %v3053_v4  ;;  %v3054_v6 = vmul.f32 %v3052_v3, %v3052_v3 }
 0x6c1   : > { %v3056_v7 = vsel %vm3038_vm0, %v3055_v5, 0.0 }
 0x6c2   : > { %v3057_v8 = vadd.f32 %v3056_v7, %v3054_v6 }
 0x6c4   : > { %3058 = vadd.xlane.f32.xlu0 %v3057_v8 }
 0x751   : > { %v3059_v9 = vpop.xlane.xlu0 %3058 }
 0x752   : > { %v3060_v10 = vrot.slane %v3059_v9, 4 }
 0x754   : > { %v3061_v11 = vadd.f32 %v3060_v10, %v3059_v9 }
 0x756   : > { %v3062_v12 = vrot.slane %v3061_v11, 2 }
 0x758   : > { %v3063_v13 = vadd.f32 %v3062_v12, %v3061_v11 }
 0x75a   : > { %v3064_v14 = vrot.slane %v3063_v13, 1 }
 0x75c   : > { %v3065_v15 = vadd.f32 %v3064_v14, %v3063_v13 }
 0x75e   : > { %9696 = vpush %v3065_v15 }
 0x78f   : > { %s9697_s17 = spop %9696 }
 0x790   : > { %s3067_s19 = smul.f32 0.0006510417, %s9697_s17  ;;  %s11720_s17 = smov 122  }
 0x792   : > { %s3068_s15 = sadd.f32 1e-05, %s3067_s19  ;;  %s11719_s19 = smov 121  }
 0x794   : > { %v3069_v16 = vstv %s3068_s15  ;;  %s11726_s15 = smov 115  }
 0x795   : > { %9964 = vrsqrt.f32 %v3069_v16 }
 0x79f   : > { %v9965_v17 = vpop.eup %9964 }
 0x7a0   : > { %9698 = vpush %v9965_v17 }
 0x7d1   : > { %s9699_s18 = spop %9698 }
 0x7d2   : > { %v3072_v20 = vstv %s9699_s18  ;;  %s11727_s18 = smov 72  }
 0x7d3   : > { %v3073_v21 = vmul.f32 %v3072_v20, %v3052_v3  ;;  %v3074_v22 = vmul.f32 %v3072_v20, %v3053_v4 }
 0x7d5   : > { %v3075_v25 = vmul.f32 %v3073_v21, %v3034_v18  ;;  %v3076_v26 = vmul.f32 %v3074_v22, %v3035_v19 }
 0x7d7   : > { %v3077_v27 = vadd.f32 %v3075_v25, %v3036_v23  ;;  %v3078_v28 = vadd.f32 %v3076_v26, %v3037_v24 }
 0x7d9   : > { %vm3079_vm13 = vcmp.gt.f32.partialorder %v3077_v27, 0.0  ;;  %vm3080_vm4 = vcmp.gt.f32.partialorder %v3078_v28, 0.0  ;;  %v3081_v29 = vmul.f32 0.2, %v3077_v27  ;;  %v3082_v30 = vmul.f32 0.2, %v3078_v28 }
 0x7db   : > { %v3083_v31 = vsel %vm3079_vm13, %v3077_v27, %v3081_v29  ;;  %v3084_v32 = vsel %vm3080_vm4, %v3078_v28, %v3082_v30  ;;  %vm11772_vm13 = vcmask 31744  }
 0x7dc   : > { %3085 = vst [vmem:[#allocation4] sm:$0xff] %v3083_v31  ;;  %3086 = vst.msk [vmem:[#allocation4 + $0x8] sm:$0xff] %vm3038_vm0, %v3084_v32  ;;  %3094 = vrot.lane.b32.xlu0 %v3083_v31, %s10028_s21  ;;  %vm4165_vm0 = vcmask 883712  }
 0x7dd   : > { %vm11773_vm4 = vmmov %vm11772_vm13 }
 0x7e3   : > { %v3091_v33 = vld [vmem:[#allocation4 + $0x8] sm:$0xff] }
 0x7e4   : > { %3096 = vrot.lane.b32.xlu1 %v3091_v33, %s10028_s21  ;;  %s11763_s21 = smov 96  }
 0x84e   : > { %v3095_v34 = vpop.permute.xlu0 %3094 }
 0x84f   : > { %3103 = vst.msk [vmem:[#allocation2] sm:$0xff] %vm3102_vm1, %v3095_v34  ;;  %vm4286_vm1 = vcmask 97344  }
 0x856   : > { %v3097_v35 = vpop.permute.xlu1 %3096  ;;  %v10533_v36 = vld [vmem:[#allocation2] sm:$0xff] }
 0x857   : > { %v3099_v37 = vsel %vm3098_vm14, %v3095_v34, %v3097_v35  ;;  %3118 = vrot.lane.b32.xlu1 %v10533_v36, %s11759_s24  ;;  %4519 = vst.msk [vmem:[#allocation2] sm:$0xff] %vm3875_vm2, %v9986_v0  ;;  %vm4299_vm14 = vcmask 130144  }
 0x858   : > { %3105 = vst.msk [vmem:[#allocation2 + $0x8] sm:$0xff] %vm3104_vm15, %v3099_v37  ;;  %vm4312_vm15 = vcmask 162944  }
 0x85b   : > { %3112 = vrot.lane.b32.xlu1 %v10540_v38, %s11761_s23 }
 0x85f   : > { %v3109_v39 = vld [vmem:[#allocation2 + $0x8] sm:$0xff]  ;;  %3291 = vrot.lane.b32.xlu1 %v10533_v36, %s11721_s16 }
 0x860   : > { %3120 = vrot.lane.b32.xlu0 %v3109_v39, %s11759_s24 }
 0x863   : > { %3287 = vrot.lane.b32.xlu1 %v10540_v38, %s11762_s27 }
 0x864   : > { %3114 = vrot.lane.b32.xlu0 %v10550_v40, %s11761_s23 }
 0x867   : > { %3387 = vrot.lane.b32.xlu1 %v10533_v36, %s11720_s17 }
 0x868   : > { %3293 = vrot.lane.b32.xlu0 %v3109_v39, %s11721_s16  ;;  %s11766_s16 = smov 110  }
 0x86b   : > { %3383 = vrot.lane.b32.xlu1 %v10540_v38, %s11755_s28 }
 0x86c   : > { %3289 = vrot.lane.b32.xlu0 %v10550_v40, %s11762_s27 }
 0x86f   : > { %3484 = vrot.lane.b32.xlu1 %v10533_v36, %s11719_s19 }
 0x870   : > { %3389 = vrot.lane.b32.xlu0 %v3109_v39, %s11720_s17  ;;  %s11732_s17 = smov 64  }
 0x873   : > { %3480 = vrot.lane.b32.xlu1 %v10540_v38, %s11763_s21 }
 0x874   : > { %3385 = vrot.lane.b32.xlu0 %v10550_v40, %s11755_s28 }
 0x877   : > { %3581 = vrot.lane.b32.xlu1 %v10533_v36, %s11761_s23 }
 0x878   : > { %3486 = vrot.lane.b32.xlu0 %v3109_v39, %s11719_s19  ;;  %s11765_s19 = smov 114  }
 0x87b   : > { %3577 = vrot.lane.b32.xlu1 %v10540_v38, %s11724_s20 }
 0x87c   : > { %3482 = vrot.lane.b32.xlu0 %v10550_v40, %s11763_s21 }
 0x87f   : > { %3677 = vrot.lane.b32.xlu1 %v10533_v36, %s11764_s25 }
 0x880   : > { %3583 = vrot.lane.b32.xlu0 %v3109_v39, %s11761_s23 }
 0x883   : > { %3673 = vrot.lane.b32.xlu1 %v10540_v38, %s11722_s22 }
 0x884   : > { %3579 = vrot.lane.b32.xlu0 %v10550_v40, %s11724_s20  ;;  %s11729_s20 = smov 109  }
 0x887   : > { %3774 = vrot.lane.b32.xlu1 %v10533_v36, %s11726_s15 }
 0x888   : > { %3679 = vrot.lane.b32.xlu0 %v3109_v39, %s11764_s25 }
 0x88b   : > { %3770 = vrot.lane.b32.xlu1 %v10540_v38, %s11727_s18 }
 0x88c   : > { %3675 = vrot.lane.b32.xlu0 %v10550_v40, %s11722_s22  ;;  %s11767_s22 = smov 56  }
 0x88f   : > { %3871 = vrot.lane.b32.xlu1 %v10533_v36, %s11765_s19 }
 0x890   : > { %3776 = vrot.lane.b32.xlu0 %v3109_v39, %s11726_s15  ;;  %s11768_s15 = smov 48  }
 0x893   : > { %3867 = vrot.lane.b32.xlu1 %v10540_v38, %s11732_s17 }
 0x894   : > { %3772 = vrot.lane.b32.xlu0 %v10550_v40, %s11727_s18  ;;  %s11769_s18 = smov 108  }
 0x897   : > { %3968 = vrot.lane.b32.xlu1 %v10533_v36, %s11766_s16 }
 0x898   : > { %3873 = vrot.lane.b32.xlu0 %v3109_v39, %s11765_s19 }
 0x89b   : > { %3964 = vrot.lane.b32.xlu1 %v10540_v38, %s11767_s22 }
 0x89c   : > { %3869 = vrot.lane.b32.xlu0 %v10550_v40, %s11732_s17  ;;  %s11776_s17 = smov 72  }
 0x89f   : > { %4064 = vrot.lane.b32.xlu1 %v10533_v36, %s11729_s20 }
 0x8a0   : > { %3970 = vrot.lane.b32.xlu0 %v3109_v39, %s11766_s16 }
 0x8a3   : > { %4060 = vrot.lane.b32.xlu1 %v10540_v38, %s11768_s15 }
 0x8a4   : > { %3966 = vrot.lane.b32.xlu0 %v10550_v40, %s11767_s22 }
 0x8a7   : > { %4161 = vrot.lane.b32.xlu1 %v10533_v36, %s11769_s18 }
 0x8a8   : > { %4066 = vrot.lane.b32.xlu0 %v3109_v39, %s11729_s20  ;;  %s11774_s20 = smov 88  }
 0x8ab   : > { %4157 = vrot.lane.b32.xlu1 %v10540_v38, %s11730_s0 }
 0x8ac   : > { %4062 = vrot.lane.b32.xlu0 %v10550_v40, %s11768_s15 }
 0x8b0   : > { %4163 = vrot.lane.b32.xlu0 %v3109_v39, %s11769_s18 }
 0x8b4   : > { %4159 = vrot.lane.b32.xlu0 %v10550_v40, %s11730_s0  ;;  %s11775_s0 = smov 80  }
 0x8c9   : > { %v3119_v41 = vpop.permute.xlu1 %3118 }
 0x8cd   : > { %v3113_v42 = vpop.permute.xlu1 %3112 }
 0x8d1   : > { %v3292_v43 = vpop.permute.xlu1 %3291 }
 0x8d2   : > { %v3121_v44 = vpop.permute.xlu0 %3120 }
 0x8d3   : > { %3129 = vmatprep.subr.mxu0 %v3121_v44  ;;  %v3122_v45 = vsel %vm770_vm10, %v3119_v41, %v3121_v44  ;;  %vm3391_vm10 = vcmask 998400  }
 0x8d4   : > { %3130 = vmatpush1.msra.mxu0 %v3122_v45 }
 0x8d5   : > { %3210 = vmatprep.subr.mxu0 %v3109_v39  ;;  %8673 = vmatmul.mubr.msk.f32.vlgmr.msra.gmra.mrb[4].mxu0 %vm734_vm8, %v3113_v42  ;;  %v3288_v46 = vpop.permute.xlu1 %3287 }
 0x8d6   : > { %3211 = vmatpush1.msra.mxu0 %v10533_v36  ;;  %v3115_v47 = vpop.permute.xlu0 %3114  ;;  %3199 = vmatprep.mubr.f32.mxu0 %v9986_v0 }
 0x8d9   : > { %8674 = vmatmul.mubr.msk.f32.gmra.mrb[6].mxu0 %vm734_vm8, %v3115_v47  ;;  %v3388_v48 = vpop.permute.xlu1 %3387 }
 0x8da   : > { %v3294_v50 = vpop.permute.xlu0 %3293  ;;  %3274 = vmatprep.mubr.f32.mxu0 %v9986_v0 }
 0x8db   : > { %3302 = vmatprep.subr.mxu0 %v3294_v50  ;;  %v3295_v51 = vsel %vm1089_vm12, %v3292_v43, %v3294_v50  ;;  %vm3488_vm12 = vcmask 990208  }
 0x8dd   : > { %8675 = vmatmul.mubr.msk.f32.vlgmr.msra.gmra.mrb[4].mxu0 %vm734_vm8, %v10540_v38  ;;  %v3384_v52 = vpop.permute.xlu1 %3383 }
 0x8de   : > { %3303 = vmatpush1.msra.mxu0 %v3295_v51  ;;  %v3290_v49 = vpop.permute.xlu0 %3289  ;;  %3280 = vmatprep.mubr.f32.mxu0 %v9986_v0 }
 0x8e1   : > { %8676 = vmatmul.mubr.msk.f32.gmra.mrb[6].mxu0 %vm734_vm8, %v10550_v40  ;;  %v3485_v53 = vpop.permute.xlu1 %3484 }
 0x8e2   : > { %v3390_v54 = vpop.permute.xlu0 %3389  ;;  %3366 = vmatprep.mubr.f32.mxu0 %v9986_v0 }
 0x8e3   : > { %3399 = vmatprep.subr.mxu0 %v3390_v54  ;;  %v3392_v55 = vsel %vm3391_vm10, %v3388_v48, %v3390_v54  ;;  %vm4338_vm10 = vcmask 228544  }
 0x8e5   : > { %8677 = vmatmul.mubr.msk.f32.vlgmr.msra.gmra.mrb[4].mxu0 %vm734_vm8, %v3288_v46  ;;  %v3481_v56 = vpop.permute.xlu1 %3480 }
 0x8e6   : > { %3400 = vmatpush1.msra.mxu0 %v3392_v55  ;;  %v3386_v57 = vpop.permute.xlu0 %3385  ;;  %3372 = vmatprep.mubr.f32.mxu0 %v9986_v0 }
 0x8e9   : > { %8678 = vmatmul.mubr.msk.f32.gmra.mrb[6].mxu0 %vm734_vm8, %v3290_v49  ;;  %v3582_v58 = vpop.permute.xlu1 %3581 }
 0x8ea   : > { %v3487_v59 = vpop.permute.xlu0 %3486  ;;  %3463 = vmatprep.mubr.f32.mxu0 %v9986_v0 }
 0x8eb   : > { %3496 = vmatprep.subr.mxu0 %v3487_v59  ;;  %v3489_v60 = vsel %vm3488_vm12, %v3485_v53, %v3487_v59  ;;  %vm4351_vm12 = vcmask 261344  }
 0x8ed   : > { %8679 = vmatmul.mubr.msk.f32.vlgmr.msra.gmra.mrb[4].mxu0 %vm734_vm8, %v3384_v52  ;;  %v3578_v61 = vpop.permute.xlu1 %3577 }
 0x8ee   : > { %3497 = vmatpush1.msra.mxu0 %v3489_v60  ;;  %v3483_v62 = vpop.permute.xlu0 %3482  ;;  %3469 = vmatprep.mubr.f32.mxu0 %v9986_v0 }
 0x8f1   : > { %8680 = vmatmul.mubr.msk.f32.gmra.mrb[6].mxu0 %vm734_vm8, %v3386_v57  ;;  %v3678_v63 = vpop.permute.xlu1 %3677 }
 0x8f2   : > { %v3584_v1 = vpop.permute.xlu0 %3583  ;;  %3560 = vmatprep.mubr.f32.mxu0 %v9986_v0 }
 0x8f3   : > { %3592 = vmatprep.subr.mxu0 %v3584_v1  ;;  %v3585_v2 = vsel %vm11770_vm3, %v3582_v58, %v3584_v1  ;;  %vm4364_vm3 = vcmask 294144  }
 0x8f5   : > { %8681 = vmatmul.mubr.msk.f32.vlgmr.msra.gmra.mrb[4].mxu0 %vm734_vm8, %v3481_v56  ;;  %v3674_v3 = vpop.permute.xlu1 %3673 }
 0x8f6   : > { %3593 = vmatpush1.msra.mxu0 %v3585_v2  ;;  %v3580_v4 = vpop.permute.xlu0 %3579  ;;  %3566 = vmatprep.mubr.f32.mxu0 %v9986_v0 }
 0x8f9   : > { %8682 = vmatmul.mubr.msk.f32.gmra.mrb[6].mxu0 %vm734_vm8, %v3483_v62  ;;  %v3775_v5 = vpop.permute.xlu1 %3774 }
 0x8fa   : > { %v3680_v6 = vpop.permute.xlu0 %3679  ;;  %3656 = vmatprep.mubr.f32.mxu0 %v9986_v0 }
 0x8fb   : > { %3689 = vmatprep.subr.mxu0 %v3680_v6  ;;  %v3682_v7 = vsel %vm3681_vm5, %v3678_v63, %v3680_v6  ;;  %vm4377_vm5 = vcmask 326944  }
 0x8fd   : > { %8683 = vmatmul.mubr.msk.f32.vlgmr.msra.gmra.mrb[4].mxu0 %vm734_vm8, %v3578_v61  ;;  %v3771_v8 = vpop.permute.xlu1 %3770 }
 0x8fe   : > { %3690 = vmatpush1.msra.mxu0 %v3682_v7  ;;  %v3676_v9 = vpop.permute.xlu0 %3675  ;;  %3662 = vmatprep.mubr.f32.mxu0 %v9986_v0 }
 0x901   : > { %8684 = vmatmul.mubr.msk.f32.gmra.mrb[6].mxu0 %vm734_vm8, %v3580_v4  ;;  %v3872_v10 = vpop.permute.xlu1 %3871 }
 0x902   : > { %v3777_v11 = vpop.permute.xlu0 %3776  ;;  %3753 = vmatprep.mubr.f32.mxu0 %v9986_v0 }
 0x903   : > { %3786 = vmatprep.subr.mxu0 %v3777_v11  ;;  %v3779_v12 = vsel %vm3778_vm6, %v3775_v5, %v3777_v11  ;;  %vm4390_vm6 = vcmask 359744  }
 0x905   : > { %8685 = vmatmul.mubr.msk.f32.vlgmr.msra.gmra.mrb[4].mxu0 %vm734_vm8, %v3674_v3  ;;  %v3868_v13 = vpop.permute.xlu1 %3867 }
 0x906   : > { %3787 = vmatpush1.msra.mxu0 %v3779_v12  ;;  %v3773_v14 = vpop.permute.xlu0 %3772  ;;  %3759 = vmatprep.mubr.f32.mxu0 %v9986_v0 }
 0x909   : > { %8686 = vmatmul.mubr.msk.f32.gmra.mrb[6].mxu0 %vm734_vm8, %v3676_v9  ;;  %v3969_v16 = vpop.permute.xlu1 %3968 }
 0x90a   : > { %v3874_v15 = vpop.permute.xlu0 %3873  ;;  %3850 = vmatprep.mubr.f32.mxu0 %v9986_v0 }
 0x90b   : > { %3883 = vmatprep.subr.mxu0 %v3874_v15  ;;  %v3876_v17 = vsel %vm3875_vm2, %v3872_v10, %v3874_v15  ;;  %vm4325_vm2 = vcmask 195744  }
 0x90d   : > { %8687 = vmatmul.mubr.msk.f32.vlgmr.msra.gmra.mrb[4].mxu0 %vm734_vm8, %v3771_v8  ;;  %v3965_v19 = vpop.permute.xlu1 %3964 }
 0x90e   : > { %3884 = vmatpush1.msra.mxu0 %v3876_v17  ;;  %v3870_v18 = vpop.permute.xlu0 %3869  ;;  %3856 = vmatprep.mubr.f32.mxu0 %v9986_v0 }
 0x911   : > { %8688 = vmatmul.mubr.msk.f32.gmra.mrb[6].mxu0 %vm734_vm8, %v3773_v14  ;;  %v4065_v23 = vpop.permute.xlu1 %4064 }
 0x912   : > { %v3971_v20 = vpop.permute.xlu0 %3970  ;;  %3947 = vmatprep.mubr.f32.mxu0 %v9986_v0 }
 0x913   : > { %3979 = vmatprep.subr.mxu0 %v3971_v20  ;;  %v3972_v21 = vsel %vm11771_vm7, %v3969_v16, %v3971_v20  ;;  %vm4403_vm7 = vcmask 392544  }
 0x915   : > { %8689 = vmatmul.mubr.msk.f32.vlgmr.msra.gmra.mrb[4].mxu0 %vm734_vm8, %v3868_v13  ;;  %v4061_v26 = vpop.permute.xlu1 %4060 }
 0x916   : > { %3980 = vmatpush1.msra.mxu0 %v3972_v21  ;;  %v3967_v22 = vpop.permute.xlu0 %3966  ;;  %3953 = vmatprep.mubr.f32.mxu0 %v9986_v0 }
 0x919   : > { %8690 = vmatmul.mubr.msk.f32.gmra.mrb[6].mxu0 %vm734_vm8, %v3870_v18  ;;  %v4162_v28 = vpop.permute.xlu1 %4161 }
 0x91a   : > { %v4067_v24 = vpop.permute.xlu0 %4066  ;;  %4043 = vmatprep.mubr.f32.mxu0 %v9986_v0 }
 0x91b   : > { %4076 = vmatprep.subr.mxu0 %v4067_v24  ;;  %v4069_v25 = vsel %vm4068_vm9, %v4065_v23, %v4067_v24  ;;  %vm4416_vm9 = vcmask 425344  }
 0x91d   : > { %8691 = vmatmul.mubr.msk.f32.vlgmr.msra.gmra.mrb[4].mxu0 %vm734_vm8, %v3965_v19  ;;  %v4158_v31 = vpop.permute.xlu1 %4157 }
 0x91e   : > { %4077 = vmatpush1.msra.mxu0 %v4069_v25  ;;  %v4063_v27 = vpop.permute.xlu0 %4062  ;;  %4049 = vmatprep.mubr.f32.mxu0 %v9986_v0  ;;  %v10736_v25 = vld [vmem:[%s11668_s4 + $0x28] sm:$0xff] }
 0x921   : > { %8692 = vmatmul.mubr.msk.f32.gmra.mrb[6].mxu0 %vm734_vm8, %v3967_v22 }
 0x922   : > { %v4164_v29 = vpop.permute.xlu0 %4163  ;;  %4140 = vmatprep.mubr.f32.mxu0 %v9986_v0 }
 0x923   : > { %4173 = vmatprep.subr.mxu0 %v4164_v29  ;;  %v4166_v30 = vsel %vm4165_vm0, %v4162_v28, %v4164_v29  ;;  %vm4429_vm0 = vcmask 458144   ;;  %v10755_v28 = vld [vmem:[%s11668_s4 + $0x68] sm:$0xff] }
 0x925   : > { %8693 = vmatmul.mubr.msk.f32.vlgmr.msra.gmra.mrb[4].mxu0 %vm734_vm8, %v4061_v26  ;;  %v10741_v26 = vld [vmem:[%s11668_s4 + $0x8] sm:$0xff] }
 0x926   : > { %4174 = vmatpush1.msra.mxu0 %v4166_v30  ;;  %4146 = vmatprep.mubr.f32.mxu0 %v9986_v0  ;;  %v4160_v32 = vpop.permute.xlu0 %4159 }
 0x929   : > { %8694 = vmatmul.mubr.msk.f32.gmra.mrb[6].mxu0 %vm734_vm8, %v4063_v27  ;;  %v10750_v27 = vld [vmem:[%s11668_s4 + $0x48] sm:$0xff] }
 0x92a   : > { %4237 = vmatprep.mubr.f32.mxu0 %v9986_v0 }
 0x92d   : > { %8695 = vmatmul.mubr.msk.f32.vlgmr.msra.gmra.mrb[4].mxu0 %vm734_vm8, %v4158_v31 }
 0x92e   : > { %4243 = vmatprep.mubr.f32.mxu0 %v9986_v0 }
 0x931   : > { %8696 = vmatmul.mubr.msk.f32.gmra.mrb[6].mxu0 %vm734_vm8, %v4160_v32  ;;  %vm4273_vm8 = vcmask 64544  }
 0xa00   : > { %v4239_v33 = vpop.f32.mrb[4].mxu0 }
 0xa01   : > { %4254 = vst [vmem:[#allocation3] sm:$0xff] %v4239_v33  ;;  %v4241_v34 = vpop.f32.mrb[5].mxu0  ;;  %4267 = vrot.lane.b32.xlu1 %v4239_v33, %s11761_s23  ;;  %4261 = vst.msk [vmem:[#allocation4] sm:$0xff] %vm11772_vm13, %v4239_v33  ;;  %vm4442_vm13 = vcmask 490944  }
 0xa02   : > { %4256 = vst.msk [vmem:[#allocation3 + $0x8] sm:$0xff] %vm4255_vm11, %v4241_v34 }
 0xa04   : > { %v4245_v35 = vpop.f32.mrb[6].mxu0 }
 0xa05   : > { %4257 = vst [vmem:[#allocation3 + $0x20] sm:$0xff] %v4245_v35  ;;  %v4247_v36 = vpop.f32.mrb[7].mxu0  ;;  %4280 = vrot.lane.b32.xlu1 %v4239_v33, %s11762_s27  ;;  %4269 = vrot.lane.b32.xlu0 %v4245_v35, %s11761_s23  ;;  %4262 = vst.msk [vmem:[#allocation4 + $0x20] sm:$0xff] %vm11773_vm4, %v4245_v35  ;;  %vm4455_vm4 = vcmask 523744  }
 0xa06   : > { %4258 = vst.msk [vmem:[#allocation3 + $0x28] sm:$0xff] %vm4255_vm11, %v4247_v36 }
 0xa09   : > { %4293 = vrot.lane.b32.xlu1 %v4239_v33, %s11755_s28  ;;  %4282 = vrot.lane.b32.xlu0 %v4245_v35, %s11762_s27  ;;  %v10704_v0 = vld [vmem:[#allocation3 + $0x8] sm:$0xff] }
 0xa0d   : > { %4306 = vrot.lane.b32.xlu1 %v4239_v33, %s11763_s21  ;;  %4295 = vrot.lane.b32.xlu0 %v4245_v35, %s11755_s28  ;;  %v10709_v37 = vld [vmem:[#allocation3 + $0x28] sm:$0xff] }
 0xa11   : > { %4319 = vrot.lane.b32.xlu1 %v4239_v33, %s11774_s20  ;;  %4308 = vrot.lane.b32.xlu0 %v4245_v35, %s11763_s21 }
 0xa15   : > { %4332 = vrot.lane.b32.xlu1 %v4239_v33, %s11775_s0  ;;  %4321 = vrot.lane.b32.xlu0 %v4245_v35, %s11774_s20  ;;  %s11734_s20 = smov 32  }
 0xa19   : > { %4345 = vrot.lane.b32.xlu1 %v4239_v33, %s11776_s17  ;;  %4334 = vrot.lane.b32.xlu0 %v4245_v35, %s11775_s0 }
 0xa1d   : > { %4358 = vrot.lane.b32.xlu1 %v4239_v33, %s11777_s1  ;;  %4347 = vrot.lane.b32.xlu0 %v4245_v35, %s11776_s17  ;;  %s10038_s17 = smov 24  }
 0xa21   : > { %4371 = vrot.lane.b32.xlu1 %v4239_v33, %s11767_s22  ;;  %4360 = vrot.lane.b32.xlu0 %v4245_v35, %s11777_s1 }
 0xa25   : > { %4384 = vrot.lane.b32.xlu1 %v4239_v33, %s11768_s15  ;;  %4373 = vrot.lane.b32.xlu0 %v4245_v35, %s11767_s22  ;;  %s11779_s22 = smov 16  }
 0xa29   : > { %4397 = vrot.lane.b32.xlu1 %v10704_v0, %s11778_s2  ;;  %4386 = vrot.lane.b32.xlu0 %v4245_v35, %s11768_s15 }
 0xa2d   : > { %4410 = vrot.lane.b32.xlu1 %v10704_v0, %s11734_s20  ;;  %4399 = vrot.lane.b32.xlu0 %v10709_v37, %s11778_s2 }
 0xa31   : > { %4423 = vrot.lane.b32.xlu1 %v10704_v0, %s10038_s17  ;;  %4412 = vrot.lane.b32.xlu0 %v10709_v37, %s11734_s20  ;;  %s10044_s20 = smov 17  }
 0xa35   : > { %4436 = vrot.lane.b32.xlu1 %v10704_v0, %s11779_s22  ;;  %4425 = vrot.lane.b32.xlu0 %v10709_v37, %s10038_s17 }
 0xa39   : > { %4449 = vrot.lane.b32.xlu1 %v10704_v0, %s11780_s3  ;;  %4438 = vrot.lane.b32.xlu0 %v10709_v37, %s11779_s22 }
 0xa3d   : > { %4451 = vrot.lane.b32.xlu0 %v10709_v37, %s11780_s3 }
 0xa73   : > { %v4268_v38 = vpop.permute.xlu1 %4267 }
 0xa74   : > { %4274 = vst.msk [vmem:[#allocation4] sm:$0xff] %vm4273_vm8, %v4268_v38  ;;  %v4465_v38 = vld [vmem:[%s11674_s10] sm:$0xff] }
 0xa77   : > { %v4281_v39 = vpop.permute.xlu1 %4280  ;;  %v4270_v40 = vpop.permute.xlu0 %4269 }
 0xa78   : > { %4287 = vst.msk [vmem:[#allocation4] sm:$0xff] %vm4286_vm1, %v4281_v39  ;;  %v4466_v39 = vld [vmem:[%s11674_s10 + $0x8] sm:$0xff] }
 0xa79   : > { %4275 = vst.msk [vmem:[#allocation4 + $0x20] sm:$0xff] %vm4273_vm8, %v4270_v40  ;;  %vm4460_vm8 = vcmask 556544  }
 0xa7b   : > { %v4294_v41 = vpop.permute.xlu1 %4293  ;;  %v4283_v42 = vpop.permute.xlu0 %4282 }
 0xa7c   : > { %4300 = vst.msk [vmem:[#allocation4] sm:$0xff] %vm4299_vm14, %v4294_v41 }
 0xa7d   : > { %4288 = vst.msk [vmem:[#allocation4 + $0x20] sm:$0xff] %vm4286_vm1, %v4283_v42  ;;  %vm11782_vm1 = vcmask 130048  }
 0xa7f   : > { %v4307_v43 = vpop.permute.xlu1 %4306  ;;  %v4296_v44 = vpop.permute.xlu0 %4295 }
 0xa80   : > { %4313 = vst.msk [vmem:[#allocation4] sm:$0xff] %vm4312_vm15, %v4307_v43  ;;  %v4467_v43 = vld [vmem:[%s11675_s11] sm:$0xff] }
 0xa81   : > { %4301 = vst.msk [vmem:[#allocation4 + $0x20] sm:$0xff] %vm4299_vm14, %v4296_v44  ;;  %v4468_v44 = vld [vmem:[%s11675_s11 + $0x8] sm:$0xff] }
 0xa83   : > { %v4320_v45 = vpop.permute.xlu1 %4319  ;;  %v4309_v46 = vpop.permute.xlu0 %4308 }
 0xa84   : > { %4326 = vst.msk [vmem:[#allocation4] sm:$0xff] %vm4325_vm2, %v4320_v45 }
 0xa85   : > { %4314 = vst.msk [vmem:[#allocation4 + $0x20] sm:$0xff] %vm4312_vm15, %v4309_v46 }
 0xa87   : > { %v4333_v47 = vpop.permute.xlu1 %4332  ;;  %v4322_v48 = vpop.permute.xlu0 %4321 }
 0xa88   : > { %4339 = vst.msk [vmem:[#allocation4] sm:$0xff] %vm4338_vm10, %v4333_v47 }
 0xa89   : > { %4327 = vst.msk [vmem:[#allocation4 + $0x20] sm:$0xff] %vm4325_vm2, %v4322_v48  ;;  %vm4544_vm2 = vcmask 138344  }
 0xa8b   : > { %v4346_v50 = vpop.permute.xlu1 %4345  ;;  %v4335_v51 = vpop.permute.xlu0 %4334 }
 0xa8c   : > { %4352 = vst.msk [vmem:[#allocation4] sm:$0xff] %vm4351_vm12, %v4346_v50 }
 0xa8d   : > { %4340 = vst.msk [vmem:[#allocation4 + $0x20] sm:$0xff] %vm4338_vm10, %v4335_v51  ;;  %vm4557_vm10 = vcmask 187544  }
 0xa8f   : > { %v4359_v52 = vpop.permute.xlu1 %4358  ;;  %v4348_v49 = vpop.permute.xlu0 %4347 }
 0xa90   : > { %4365 = vst.msk [vmem:[#allocation4] sm:$0xff] %vm4364_vm3, %v4359_v52 }
 0xa91   : > { %4353 = vst.msk [vmem:[#allocation4 + $0x20] sm:$0xff] %vm4351_vm12, %v4348_v49  ;;  %vm4570_vm12 = vcmask 236744  }
 0xa93   : > { %v4372_v53 = vpop.permute.xlu1 %4371  ;;  %v4361_v54 = vpop.permute.xlu0 %4360 }
 0xa94   : > { %4378 = vst.msk [vmem:[#allocation4] sm:$0xff] %vm4377_vm5, %v4372_v53 }
 0xa95   : > { %4366 = vst.msk [vmem:[#allocation4 + $0x20] sm:$0xff] %vm4364_vm3, %v4361_v54  ;;  %vm4583_vm3 = vcmask 285944  }
 0xa97   : > { %v4385_v55 = vpop.permute.xlu1 %4384  ;;  %v4374_v56 = vpop.permute.xlu0 %4373 }
 0xa98   : > { %4391 = vst.msk [vmem:[#allocation4] sm:$0xff] %vm4390_vm6, %v4385_v55 }
 0xa99   : > { %4379 = vst.msk [vmem:[#allocation4 + $0x20] sm:$0xff] %vm4377_vm5, %v4374_v56  ;;  %vm4596_vm5 = vcmask 335144  }
 0xa9b   : > { %v4398_v57 = vpop.permute.xlu1 %4397  ;;  %v4387_v58 = vpop.permute.xlu0 %4386 }
 0xa9c   : > { %4404 = vst.msk [vmem:[#allocation4] sm:$0xff] %vm4403_vm7, %v4398_v57 }
 0xa9d   : > { %4392 = vst.msk [vmem:[#allocation4 + $0x20] sm:$0xff] %vm4390_vm6, %v4387_v58  ;;  %vm4609_vm6 = vcmask 384344  }
 0xa9f   : > { %v4411_v59 = vpop.permute.xlu1 %4410  ;;  %v4400_v60 = vpop.permute.xlu0 %4399 }
 0xaa0   : > { %4417 = vst.msk [vmem:[#allocation4] sm:$0xff] %vm4416_vm9, %v4411_v59 }
 0xaa1   : > { %4405 = vst.msk [vmem:[#allocation4 + $0x20] sm:$0xff] %vm4403_vm7, %v4400_v60  ;;  %vm4622_vm7 = vcmask 433544  }
 0xaa3   : > { %v4424_v61 = vpop.permute.xlu1 %4423  ;;  %v4413_v62 = vpop.permute.xlu0 %4412 }
 0xaa4   : > { %4430 = vst.msk [vmem:[#allocation4] sm:$0xff] %vm4429_vm0, %v4424_v61  ;;  %v10829_v61 = vld [vmem:[%s11668_s4 + $0x10] sm:$0xff] }
 0xaa5   : > { %4418 = vst.msk [vmem:[#allocation4 + $0x20] sm:$0xff] %vm4416_vm9, %v4413_v62  ;;  %vm4635_vm9 = vcmask 482744  }
 0xaa7   : > { %v4437_v63 = vpop.permute.xlu1 %4436  ;;  %v4426_v1 = vpop.permute.xlu0 %4425 }
 0xaa8   : > { %4443 = vst.msk [vmem:[#allocation4] sm:$0xff] %vm4442_vm13, %v4437_v63 }
 0xaa9   : > { %4431 = vst.msk [vmem:[#allocation4 + $0x20] sm:$0xff] %vm4429_vm0, %v4426_v1  ;;  %v10842_v1 = vld [vmem:[%s11668_s4 + $0x30] sm:$0xff]  ;;  %vm4648_vm0 = vcmask 531944  }
 0xaab   : > { %v4450_v2 = vpop.permute.xlu1 %4449  ;;  %v4439_v3 = vpop.permute.xlu0 %4438 }
 0xaac   : > { %4456 = vst.msk [vmem:[#allocation4] sm:$0xff] %vm4455_vm4, %v4450_v2  ;;  %v10847_v2 = vld [vmem:[%s11668_s4 + $0x70] sm:$0xff] }
 0xaad   : > { %4444 = vst.msk [vmem:[#allocation4 + $0x20] sm:$0xff] %vm4442_vm13, %v4439_v3  ;;  %v10856_v3 = vld [vmem:[%s11668_s4 + $0x50] sm:$0xff]  ;;  %vm4661_vm13 = vcmask 581144  }
 0xaae   : > { %4461 = vst.msk [vmem:[#allocation4] sm:$0xff] %vm4460_vm8, %v10704_v0 }
 0xaaf   : > { %v4452_v4 = vpop.permute.xlu0 %4451 }
 0xab0   : > { %4457 = vst.msk [vmem:[#allocation4 + $0x20] sm:$0xff] %vm4455_vm4, %v4452_v4  ;;  %vm4674_vm4 = vcmask 630344  }
 0xab1   : > { %4462 = vst.msk [vmem:[#allocation4 + $0x20] sm:$0xff] %vm4460_vm8, %v10709_v37  ;;  %vm4687_vm8 = vcmask 679544  }
 0xab5   : > { %v4463_v5 = vld [vmem:[#allocation4] sm:$0xff] }
 0xab6   : > { %v4469_v7 = vsel %vm4255_vm11, %v4463_v5, 0.0 }
 0xab8   : > { %v4464_v6 = vld [vmem:[#allocation4 + $0x20] sm:$0xff] }
 0xab9   : > { %v4470_v8 = vsel %vm4255_vm11, %v4464_v6, 0.0 }
 0xaba   : > { %v4471_v9 = vadd.f32 %v4470_v8, %v4469_v7 }
 0xabc   : > { %4472 = vadd.xlane.f32.xlu1 %v4471_v9 }
 0xacd   : > { %5844 = vrot.lane.b32.xlu1 %v10736_v25, %s11763_s21 }
 0xad1   : > { %5846 = vrot.lane.b32.xlu1 %v10750_v27, %s11763_s21 }
 0xad5   : > { %5953 = vrot.lane.b32.xlu1 %v10741_v26, %s11775_s0 }
 0xad9   : > { %5959 = vrot.lane.b32.xlu1 %v10755_v28, %s11775_s0 }
 0xadd   : > { %6066 = vrot.lane.b32.xlu1 %v10736_v25, %s11777_s1 }
 0xae1   : > { %6068 = vrot.lane.b32.xlu1 %v10750_v27, %s11777_s1 }
 0xae5   : > { %6175 = vrot.lane.b32.xlu1 %v10741_v26, %s11768_s15 }
 0xae9   : > { %6181 = vrot.lane.b32.xlu1 %v10755_v28, %s11768_s15 }
 0xaed   : > { %6288 = vrot.lane.b32.xlu1 %v10736_v25, %s11781_s6 }
 0xaf1   : > { %6290 = vrot.lane.b32.xlu1 %v10750_v27, %s11781_s6 }
 0xaf5   : > { %6397 = vrot.lane.b32.xlu1 %v10741_v26, %s11779_s22 }
 0xb49   : > { %v4473_v10 = vpop.xlane.xlu1 %4472 }
 0xb4a   : > { %v4474_v11 = vrot.slane %v4473_v10, 4 }
 0xb4c   : > { %v4475_v12 = vadd.f32 %v4474_v11, %v4473_v10 }
 0xb4d   : > { %v10810_v55 = vpop.permute.xlu1 %5844 }
 0xb4e   : > { %v4476_v13 = vrot.slane %v4475_v12, 2 }
 0xb50   : > { %v4477_v14 = vadd.f32 %v4476_v13, %v4475_v12 }
 0xb51   : > { %v10812_v56 = vpop.permute.xlu1 %5846 }
 0xb52   : > { %v4478_v15 = vrot.slane %v4477_v14, 1 }
 0xb54   : > { %v4479_v16 = vadd.f32 %v4478_v15, %v4477_v14 }
 0xb55   : > { %v10816_v58 = vpop.permute.xlu1 %5953 }
 0xb56   : > { %9700 = vpush %v4479_v16  ;;  %v10917_v16 = vld [vmem:[%s11668_s4] sm:$0xff] }
 0xb57   : > { %11783 = vst [vmem:[#allocation6_spill] sm:$0xff] %v10917_v16 }
 0xb59   : > { %v10820_v60 = vpop.permute.xlu1 %5959 }
 0xb5d   : > { %v10833_v63 = vpop.permute.xlu1 %6066 }
 0xb87   : > { %s9701_s2 = spop %9700 }
 0xb88   : > { %s4481_s3 = smul.f32 0.00091911765, %s9701_s2 }
 0xb8a   : > { %v4482_v17 = vstv %s4481_s3  ;;  %s10043_s3 = smov 15  }
 0xb8b   : > { %v4483_v18 = vsub.f32 %v4463_v5, %v4482_v17  ;;  %v4484_v19 = vsub.f32 %v4464_v6, %v4482_v17  ;;  %v10860_v5 = vpop.permute.xlu1 %6068  ;;  %v10926_v17 = vld [vmem:[%s11668_s4 + $0x20] sm:$0xff] }
 0xb8c   : > { %11784 = vst [vmem:[#allocation7_spill] sm:$0xff] %v10926_v17 }
 0xb8d   : > { %v4485_v20 = vmul.f32 %v4483_v18, %v4483_v18  ;;  %v4486_v21 = vmul.f32 %v4484_v19, %v4484_v19 }
 0xb8f   : > { %v4487_v22 = vsel %vm4255_vm11, %v4485_v20, 0.0  ;;  %v4488_v23 = vsel %vm4255_vm11, %v4486_v21, 0.0  ;;  %v10868_v7 = vpop.permute.xlu1 %6175 }
 0xb90   : > { %v4489_v24 = vadd.f32 %v4488_v23, %v4487_v22  ;;  %v10939_v22 = vld [vmem:[%s11668_s4 + $0x40] sm:$0xff] }
 0xb92   : > { %4490 = vadd.xlane.f32.xlu0 %v4489_v24 }
 0xb93   : > { %v10880_v9 = vpop.permute.xlu1 %6181 }
 0xb97   : > { %v10888_v11 = vpop.permute.xlu1 %6288 }
 0xb9b   : > { %v10900_v13 = vpop.permute.xlu1 %6290 }
 0xb9f   : > { %v10908_v15 = vpop.permute.xlu1 %6397 }
 0xba8   : > { %5842 = vrot.lane.b32.xlu0 %v10741_v26, %s11763_s21 }
 0xbac   : > { %5848 = vrot.lane.b32.xlu0 %v10755_v28, %s11763_s21 }
 0xbb0   : > { %5955 = vrot.lane.b32.xlu0 %v10736_v25, %s11775_s0 }
 0xbb4   : > { %5957 = vrot.lane.b32.xlu0 %v10750_v27, %s11775_s0 }
 0xbb8   : > { %6064 = vrot.lane.b32.xlu0 %v10741_v26, %s11777_s1 }
 0xbbc   : > { %6070 = vrot.lane.b32.xlu0 %v10755_v28, %s11777_s1 }
 0xbc0   : > { %6177 = vrot.lane.b32.xlu0 %v10736_v25, %s11768_s15 }
 0xbc4   : > { %6179 = vrot.lane.b32.xlu0 %v10750_v27, %s11768_s15 }
 0xbc8   : > { %6286 = vrot.lane.b32.xlu0 %v10741_v26, %s11781_s6 }
 0xbcc   : > { %6292 = vrot.lane.b32.xlu0 %v10755_v28, %s11781_s6 }
 0xc1f   : > { %v4491_v29 = vpop.xlane.xlu0 %4490 }
 0xc20   : > { %v4492_v30 = vrot.slane %v4491_v29, 4 }
 0xc22   : > { %v4493_v31 = vadd.f32 %v4492_v30, %v4491_v29 }
 0xc23   : > { %v5843_v37 = vpop.permute.xlu0 %5842 }
 0xc24   : > { %v4494_v32 = vrot.slane %v4493_v31, 2  ;;  %9124 = vmatprep.mubr.msk.f32.mxu1 %vm11782_vm1, %v5843_v37  ;;  %vm4700_vm1 = vcmask 728744  }
 0xc26   : > { %v4495_v33 = vadd.f32 %v4494_v32, %v4493_v31 }
 0xc27   : > { %v10814_v57 = vpop.permute.xlu0 %5848 }
 0xc28   : > { %v4496_v34 = vrot.slane %v4495_v33, 1 }
 0xc2a   : > { %v4497_v35 = vadd.f32 %v4496_v34, %v4495_v33 }
 0xc2b   : > { %v10818_v59 = vpop.permute.xlu0 %5955 }
 0xc2c   : > { %9702 = vpush %v4497_v35 }
 0xc2f   : > { %v10831_v62 = vpop.permute.xlu0 %5957 }
 0xc33   : > { %v10858_v4 = vpop.permute.xlu0 %6064 }
 0xc37   : > { %v10866_v6 = vpop.permute.xlu0 %6070 }
 0xc3b   : > { %v10878_v8 = vpop.permute.xlu0 %6177 }
 0xc3f   : > { %v10886_v10 = vpop.permute.xlu0 %6179 }
 0xc43   : > { %v10898_v12 = vpop.permute.xlu0 %6286 }
 0xc47   : > { %v10906_v14 = vpop.permute.xlu0 %6292 }
 0xc5d   : > { %s9703_s7 = spop %9702 }
 0xc5e   : > { %s4499_s8 = smul.f32 0.00091911765, %s9703_s7  ;;  %s10045_s7 = smov 19  }
 0xc60   : > { %s4500_s17 = sadd.f32 1e-05, %s4499_s8  ;;  %s10046_s8 = smov 21  }
 0xc62   : > { %v4501_v36 = vstv %s4500_s17  ;;  %s10047_s17 = smov 23  }
 0xc63   : > { %9966 = vrsqrt.f32 %v4501_v36 }
 0xc6d   : > { %v9967_v0 = vpop.eup %9966 }
 0xc6e   : > { %9704 = vpush %v9967_v0 }
 0xc9f   : > { %s9705_s2 = spop %9704 }
 0xca0   : > { %v4504_v40 = vstv %s9705_s2  ;;  %s10042_s2 = smov 13  }
 0xca1   : > { %v4505_v41 = vmul.f32 %v4504_v40, %v4483_v18  ;;  %v4506_v42 = vmul.f32 %v4504_v40, %v4484_v19 }
 0xca3   : > { %v4507_v45 = vmul.f32 %v4505_v41, %v4465_v38  ;;  %v4508_v46 = vmul.f32 %v4506_v42, %v4466_v39 }
 0xca5   : > { %v4509_v47 = vadd.f32 %v4507_v45, %v4467_v43  ;;  %v4510_v48 = vadd.f32 %v4508_v46, %v4468_v44 }
 0xca7   : > { %vm4511_vm14 = vcmp.gt.f32.partialorder %v4509_v47, 0.0  ;;  %vm4512_vm15 = vcmp.gt.f32.partialorder %v4510_v48, 0.0  ;;  %v4513_v50 = vmul.f32 0.2, %v4509_v47  ;;  %v4514_v51 = vmul.f32 0.2, %v4510_v48 }
 0xca9   : > { %v4515_v52 = vsel %vm4511_vm14, %v4509_v47, %v4513_v50  ;;  %v4516_v49 = vsel %vm4512_vm15, %v4510_v48, %v4514_v51  ;;  %vm4713_vm14 = vcmask 777944   ;;  %vm4726_vm15 = vcmask 827144  }
 0xcaa   : > { %4517 = vst.msk [vmem:[#allocation4] sm:$0xff] %vm4255_vm11, %v4515_v52  ;;  %4518 = vst.msk [vmem:[#allocation4 + $0x20] sm:$0xff] %vm4255_vm11, %v4516_v49  ;;  %vm4531_vm11 = vcmask 89144  }
 0xcb1   : > { %v4522_v53 = vld [vmem:[#allocation4 + $0x20] sm:$0xff] }
 0xcb2   : > { %v4521_v54 = vld [vmem:[#allocation4] sm:$0xff]  ;;  %4527 = vrot.lane.b32.xlu1 %v4522_v53, %s10039_s9 }
 0xcb3   : > { %4525 = vrot.lane.b32.xlu0 %v4521_v54, %s10039_s9  ;;  %s10048_s9 = smov 25  }
 0xcb6   : > { %4538 = vrot.lane.b32.xlu1 %v4521_v54, %s10040_s14 }
 0xcb7   : > { %4540 = vrot.lane.b32.xlu0 %v4522_v53, %s10040_s14  ;;  %s10049_s14 = smov 27  }
 0xcba   : > { %4551 = vrot.lane.b32.xlu1 %v4521_v54, %s10041_s29 }
 0xcbb   : > { %4553 = vrot.lane.b32.xlu0 %v4522_v53, %s10041_s29  ;;  %s10050_s29 = smov 29  }
 0xcbe   : > { %4564 = vrot.lane.b32.xlu1 %v4521_v54, %s10042_s2 }
 0xcbf   : > { %4566 = vrot.lane.b32.xlu0 %v4522_v53, %s10042_s2  ;;  %s10051_s2 = smov 31  }
 0xcc2   : > { %4577 = vrot.lane.b32.xlu1 %v4521_v54, %s10043_s3 }
 0xcc3   : > { %4579 = vrot.lane.b32.xlu0 %v4522_v53, %s10043_s3  ;;  %s10052_s3 = smov 33  }
 0xcc6   : > { %4590 = vrot.lane.b32.xlu1 %v4521_v54, %s10044_s20 }
 0xcc7   : > { %4592 = vrot.lane.b32.xlu0 %v4522_v53, %s10044_s20  ;;  %s10053_s20 = smov 35  }
 0xcca   : > { %4603 = vrot.lane.b32.xlu1 %v4521_v54, %s10045_s7 }
 0xccb   : > { %4605 = vrot.lane.b32.xlu0 %v4522_v53, %s10045_s7  ;;  %s10054_s7 = smov 37  }
 0xcce   : > { %4616 = vrot.lane.b32.xlu1 %v4521_v54, %s10046_s8 }
 0xccf   : > { %4618 = vrot.lane.b32.xlu0 %v4522_v53, %s10046_s8  ;;  %s10055_s8 = smov 39  }
 0xcd2   : > { %4629 = vrot.lane.b32.xlu1 %v4521_v54, %s10047_s17 }
 0xcd3   : > { %4631 = vrot.lane.b32.xlu0 %v4522_v53, %s10047_s17  ;;  %s11793_s17 = smov 98  }
 0xcd6   : > { %4642 = vrot.lane.b32.xlu1 %v4521_v54, %s10048_s9 }
 0xcd7   : > { %4644 = vrot.lane.b32.xlu0 %v4522_v53, %s10048_s9  ;;  %s11803_s9 = smov 92  }
 0xcda   : > { %4655 = vrot.lane.b32.xlu1 %v4521_v54, %s10049_s14 }
 0xcdb   : > { %4657 = vrot.lane.b32.xlu0 %v4522_v53, %s10049_s14  ;;  %s10062_s14 = smov 91  }
 0xcde   : > { %4668 = vrot.lane.b32.xlu1 %v4521_v54, %s10050_s29 }
 0xcdf   : > { %4670 = vrot.lane.b32.xlu0 %v4522_v53, %s10050_s29  ;;  %s10057_s29 = smov 107  }
 0xce2   : > { %4681 = vrot.lane.b32.xlu1 %v4521_v54, %s10051_s2 }
 0xce3   : > { %4683 = vrot.lane.b32.xlu0 %v4522_v53, %s10051_s2  ;;  %s10063_s2 = smov 90  }
 0xce6   : > { %4694 = vrot.lane.b32.xlu1 %v4521_v54, %s10052_s3 }
 0xce7   : > { %4696 = vrot.lane.b32.xlu0 %v4522_v53, %s10052_s3  ;;  %s10064_s3 = smov 89  }
 0xcea   : > { %4707 = vrot.lane.b32.xlu1 %v4521_v54, %s10053_s20 }
 0xceb   : > { %4709 = vrot.lane.b32.xlu0 %v4522_v53, %s10053_s20  ;;  %s11819_s20 = smov 86  }
 0xcee   : > { %4720 = vrot.lane.b32.xlu1 %v4521_v54, %s10054_s7 }
 0xcef   : > { %4722 = vrot.lane.b32.xlu0 %v4522_v53, %s10054_s7  ;;  %s10056_s7 = smov 113  }
 0xcf2   : > { %4733 = vrot.lane.b32.xlu1 %v4521_v54, %s10055_s8 }
 0xcf3   : > { %4735 = vrot.lane.b32.xlu0 %v4522_v53, %s10055_s8  ;;  %s10059_s8 = smov 97  }
 0xcf6   : > { %6403 = vrot.lane.b32.xlu1 %v10755_v28, %s11779_s22  ;;  %v10948_v28 = vld [vmem:[%s11668_s4 + $0x60] sm:$0xff] }
 0xcf7   : > { %6399 = vrot.lane.b32.xlu0 %v10736_v25, %s11779_s22 }
 0xcfa   : > { %6619 = vrot.lane.b32.xlu1 %v10829_v61, %s11762_s27 }
 0xcfb   : > { %6401 = vrot.lane.b32.xlu0 %v10750_v27, %s11779_s22 }
 0xcfe   : > { %6625 = vrot.lane.b32.xlu1 %v10847_v2, %s11762_s27 }
 0xcff   : > { %6621 = vrot.lane.b32.xlu0 %v10842_v1, %s11762_s27 }
 0xd02   : > { %6732 = vrot.lane.b32.xlu1 %v10842_v1, %s11763_s21 }
 0xd03   : > { %6623 = vrot.lane.b32.xlu0 %v10856_v3, %s11762_s27 }
 0xd06   : > { %6734 = vrot.lane.b32.xlu1 %v10856_v3, %s11763_s21 }
 0xd07   : > { %6730 = vrot.lane.b32.xlu0 %v10829_v61, %s11763_s21 }
 0xd0a   : > { %6841 = vrot.lane.b32.xlu1 %v10829_v61, %s11775_s0 }
 0xd0b   : > { %6736 = vrot.lane.b32.xlu0 %v10847_v2, %s11763_s21 }
 0xd0e   : > { %6847 = vrot.lane.b32.xlu1 %v10847_v2, %s11775_s0 }
 0xd0f   : > { %6843 = vrot.lane.b32.xlu0 %v10842_v1, %s11775_s0 }
 0xd12   : > { %6954 = vrot.lane.b32.xlu1 %v10842_v1, %s11777_s1 }
 0xd13   : > { %6845 = vrot.lane.b32.xlu0 %v10856_v3, %s11775_s0 }
 0xd16   : > { %6956 = vrot.lane.b32.xlu1 %v10856_v3, %s11777_s1 }
 0xd17   : > { %6952 = vrot.lane.b32.xlu0 %v10829_v61, %s11777_s1 }
 0xd1a   : > { %7063 = vrot.lane.b32.xlu1 %v10829_v61, %s11768_s15 }
 0xd1b   : > { %6958 = vrot.lane.b32.xlu0 %v10847_v2, %s11777_s1 }
 0xd1e   : > { %7067 = vrot.lane.b32.xlu1 %v10856_v3, %s11768_s15 }
 0xd1f   : > { %7065 = vrot.lane.b32.xlu0 %v10842_v1, %s11768_s15 }
 0xd22   : > { %4752 = vrot.lane.b32.xlu1 %v10917_v16, %s11762_s27 }
 0xd23   : > { %7069 = vrot.lane.b32.xlu0 %v10847_v2, %s11768_s15 }
 0xd24   : > { %v4528_v19 = vpop.permute.xlu1 %4527 }
 0xd25   : > { %v4526_v18 = vpop.permute.xlu0 %4525  ;;  %4533 = vst.msk [vmem:[#allocation2 + $0x28] sm:$0xff] %vm4531_vm11, %v4528_v19 }
 0xd26   : > { %4532 = vst.msk [vmem:[#allocation2] sm:$0xff] %vm4531_vm11, %v4526_v18  ;;  %4754 = vrot.lane.b32.xlu1 %v10926_v17, %s11762_s27  ;;  %vm4739_vm11 = vcmask 876344  }
 0xd27   : > { %7174 = vrot.lane.b32.xlu0 %v10829_v61, %s11781_s6 }
 0xd28   : > { %v4539_v21 = vpop.permute.xlu1 %4538 }
 0xd29   : > { %v4541_v20 = vpop.permute.xlu0 %4540  ;;  %4545 = vst.msk [vmem:[#allocation2] sm:$0xff] %vm4544_vm2, %v4539_v21 }
 0xd2a   : > { %4546 = vst.msk [vmem:[#allocation2 + $0x28] sm:$0xff] %vm4544_vm2, %v4541_v20  ;;  %7178 = vrot.lane.b32.xlu1 %v10856_v3, %s11781_s6  ;;  %vm11788_vm2 = vcmask 130048  }
 0xd2b   : > { %7176 = vrot.lane.b32.xlu0 %v10842_v1, %s11781_s6 }
 0xd2c   : > { %v4552_v24 = vpop.permute.xlu1 %4551 }
 0xd2d   : > { %v4554_v23 = vpop.permute.xlu0 %4553  ;;  %4558 = vst.msk [vmem:[#allocation2] sm:$0xff] %vm4557_vm10, %v4552_v24 }
 0xd2e   : > { %4559 = vst.msk [vmem:[#allocation2 + $0x28] sm:$0xff] %vm4557_vm10, %v4554_v23  ;;  %7180 = vrot.lane.b32.xlu1 %v10847_v2, %s11781_s6  ;;  %vm11805_vm10 = vmmov %vm11788_vm2 }
 0xd2f   : > { %4756 = vrot.lane.b32.xlu0 %v10939_v22, %s11762_s27 }
 0xd30   : > { %v4565_v30 = vpop.permute.xlu1 %4564 }
 0xd31   : > { %v4567_v29 = vpop.permute.xlu0 %4566  ;;  %4571 = vst.msk [vmem:[#allocation2] sm:$0xff] %vm4570_vm12, %v4565_v30 }
 0xd32   : > { %4572 = vst.msk [vmem:[#allocation2 + $0x28] sm:$0xff] %vm4570_vm12, %v4567_v29  ;;  %vm11806_vm12 = vmmov %vm11788_vm2 }
 0xd33   : > { %4758 = vrot.lane.b32.xlu0 %v10948_v28, %s11762_s27 }
 0xd34   : > { %v4578_v32 = vpop.permute.xlu1 %4577 }
 0xd35   : > { %v4580_v31 = vpop.permute.xlu0 %4579  ;;  %4584 = vst.msk [vmem:[#allocation2] sm:$0xff] %vm4583_vm3, %v4578_v32 }
 0xd36   : > { %4585 = vst.msk [vmem:[#allocation2 + $0x28] sm:$0xff] %vm4583_vm3, %v4580_v31  ;;  %vm11808_vm3 = vmmov %vm11788_vm2 }
 0xd37   : > { %7285 = vrot.lane.b32.xlu0 %v10829_v61, %s11779_s22 }
 0xd38   : > { %v4591_v34 = vpop.permute.xlu1 %4590 }
 0xd39   : > { %v4593_v33 = vpop.permute.xlu0 %4592  ;;  %4597 = vst.msk [vmem:[#allocation2] sm:$0xff] %vm4596_vm5, %v4591_v34 }
 0xd3a   : > { %4598 = vst.msk [vmem:[#allocation2 + $0x28] sm:$0xff] %vm4596_vm5, %v4593_v33  ;;  %vm11810_vm5 = vmmov %vm11788_vm2 }
 0xd3c   : > { %v4604_v36 = vpop.permute.xlu1 %4603 }
 0xd3d   : > { %v4606_v35 = vpop.permute.xlu0 %4605  ;;  %4610 = vst.msk [vmem:[#allocation2] sm:$0xff] %vm4609_vm6, %v4604_v36 }
 0xd3e   : > { %4611 = vst.msk [vmem:[#allocation2 + $0x28] sm:$0xff] %vm4609_vm6, %v4606_v35  ;;  %vm11811_vm6 = vmmov %vm11788_vm2 }
 0xd40   : > { %v4617_v37 = vpop.permute.xlu1 %4616 }
 0xd41   : > { %v4619_v0 = vpop.permute.xlu0 %4618  ;;  %4623 = vst.msk [vmem:[#allocation2] sm:$0xff] %vm4622_vm7, %v4617_v37 }
 0xd42   : > { %4624 = vst.msk [vmem:[#allocation2 + $0x28] sm:$0xff] %vm4622_vm7, %v4619_v0  ;;  %v11002_v0 = vld [vmem:[%s11668_s4 + $0x18] sm:$0xff]  ;;  %vm11812_vm7 = vmmov %vm11788_vm2 }
 0xd44   : > { %v4630_v39 = vpop.permute.xlu1 %4629 }
 0xd45   : > { %v4632_v38 = vpop.permute.xlu0 %4631  ;;  %4636 = vst.msk [vmem:[#allocation2] sm:$0xff] %vm4635_vm9, %v4630_v39  ;;  %v11015_v39 = vld [vmem:[%s11668_s4 + $0x38] sm:$0xff] }
 0xd46   : > { %4637 = vst.msk [vmem:[#allocation2 + $0x28] sm:$0xff] %vm4635_vm9, %v4632_v38  ;;  %vm11813_vm9 = vmmov %vm11788_vm2 }
 0xd48   : > { %v4643_v41 = vpop.permute.xlu1 %4642 }
 0xd49   : > { %v4645_v40 = vpop.permute.xlu0 %4644  ;;  %4649 = vst.msk [vmem:[#allocation2] sm:$0xff] %vm4648_vm0, %v4643_v41 }
 0xd4a   : > { %4650 = vst.msk [vmem:[#allocation2 + $0x28] sm:$0xff] %vm4648_vm0, %v4645_v40  ;;  %vm11814_vm0 = vmmov %vm11788_vm2 }
 0xd4c   : > { %v4656_v43 = vpop.permute.xlu1 %4655 }
 0xd4d   : > { %v4658_v42 = vpop.permute.xlu0 %4657  ;;  %4662 = vst.msk [vmem:[#allocation2] sm:$0xff] %vm4661_vm13, %v4656_v43  ;;  %v11033_v43 = vld [vmem:[%s11668_s4 + $0x58] sm:$0xff] }
 0xd4e   : > { %4663 = vst.msk [vmem:[#allocation2 + $0x28] sm:$0xff] %vm4661_vm13, %v4658_v42  ;;  %vm11815_vm13 = vmmov %vm11814_vm0 }
 0xd50   : > { %v4669_v45 = vpop.permute.xlu1 %4668 }
 0xd51   : > { %v4671_v44 = vpop.permute.xlu0 %4670  ;;  %4675 = vst.msk [vmem:[#allocation2] sm:$0xff] %vm4674_vm4, %v4669_v45 }
 0xd52   : > { %4676 = vst.msk [vmem:[#allocation2 + $0x28] sm:$0xff] %vm4674_vm4, %v4671_v44  ;;  %vm11816_vm4 = vmmov %vm11814_vm0 }
 0xd54   : > { %v4682_v47 = vpop.permute.xlu1 %4681 }
 0xd55   : > { %v4684_v46 = vpop.permute.xlu0 %4683  ;;  %4688 = vst.msk [vmem:[#allocation2] sm:$0xff] %vm4687_vm8, %v4682_v47 }
 0xd56   : > { %4689 = vst.msk [vmem:[#allocation2 + $0x28] sm:$0xff] %vm4687_vm8, %v4684_v46  ;;  %v11046_v46 = vld [vmem:[%s11668_s4 + $0x78] sm:$0xff]  ;;  %vm11817_vm8 = vmmov %vm11814_vm0 }
 0xd58   : > { %v4695_v50 = vpop.permute.xlu1 %4694 }
 0xd59   : > { %v4697_v48 = vpop.permute.xlu0 %4696  ;;  %4701 = vst.msk [vmem:[#allocation2] sm:$0xff] %vm4700_vm1, %v4695_v50 }
 0xd5a   : > { %4702 = vst.msk [vmem:[#allocation2 + $0x28] sm:$0xff] %vm4700_vm1, %v4697_v48  ;;  %vm11820_vm1 = vmmov %vm11814_vm0 }
 0xd5c   : > { %v4708_v52 = vpop.permute.xlu1 %4707 }
 0xd5d   : > { %v4710_v51 = vpop.permute.xlu0 %4709  ;;  %4714 = vst.msk [vmem:[#allocation2] sm:$0xff] %vm4713_vm14, %v4708_v52 }
 0xd5e   : > { %4715 = vst.msk [vmem:[#allocation2 + $0x28] sm:$0xff] %vm4713_vm14, %v4710_v51  ;;  %vm11821_vm14 = vmmov %vm11814_vm0 }
 0xd60   : > { %v4721_v53 = vpop.permute.xlu1 %4720 }
 0xd61   : > { %v4723_v49 = vpop.permute.xlu0 %4722  ;;  %4727 = vst.msk [vmem:[#allocation2] sm:$0xff] %vm4726_vm15, %v4721_v53 }
 0xd62   : > { %4728 = vst.msk [vmem:[#allocation2 + $0x28] sm:$0xff] %vm4726_vm15, %v4723_v49  ;;  %vm11822_vm15 = vmmov %vm11814_vm0 }
 0xd64   : > { %v4734_v18 = vpop.permute.xlu1 %4733 }
 0xd65   : > { %v4736_v54 = vpop.permute.xlu0 %4735  ;;  %4740 = vst.msk [vmem:[#allocation2] sm:$0xff] %vm4739_vm11, %v4734_v18 }
 0xd66   : > { %4741 = vst.msk [vmem:[#allocation2 + $0x28] sm:$0xff] %vm4739_vm11, %v4736_v54  ;;  %vm11823_vm11 = vmmov %vm11814_vm0 }
 0xd68   : > { %v10954_v19 = vpop.permute.xlu1 %6403 }
 0xd69   : > { %v10983_v33 = vpop.permute.xlu0 %6399 }
 0xd6c   : > { %v4746_v21 = vld [vmem:[#allocation2] sm:$0xff]  ;;  %v10956_v23 = vpop.permute.xlu1 %6619 }
 0xd6d   : > { %v4747_v20 = vld [vmem:[#allocation2 + $0x28] sm:$0xff]  ;;  %v10993_v36 = vpop.permute.xlu0 %6401 }
 0xd6e   : > { %v10958_v24 = vpack.i.bf16 %v4747_v20, %v4746_v21  ;;  %v10971_v31 = vpack.c.bf16 %v4747_v20, %v4746_v21 }
 0xd70   : > { %9809 = vrot.lane.b32.xlu0 %v10958_v24, %s10056_s7  ;;  %9804 = vrot.lane.b32.xlu1 %v10958_v24, %s11765_s19  ;;  %v10963_v29 = vpop.permute.xlu1 %6625  ;;  %11785 = vst [vmem:[#allocation8_spill] sm:$0xff] %v10971_v31  ;;  %s11786_s19 = smov 109  }
 0xd71   : > { %v11010_v38 = vpop.permute.xlu0 %6621 }
 0xd74   : > { %7289 = vrot.lane.b32.xlu0 %v10856_v3, %s11779_s22  ;;  %7287 = vrot.lane.b32.xlu1 %v10842_v1, %s11779_s22  ;;  %v10969_v30 = vpop.permute.xlu1 %6732 }
 0xd75   : > { %v11025_v42 = vpop.permute.xlu0 %6623 }
 0xd78   : > { %4954 = vrot.lane.b32.xlu0 %v10917_v16, %s11763_s21  ;;  %7291 = vrot.lane.b32.xlu1 %v10847_v2, %s11779_s22  ;;  %v10977_v32 = vpop.permute.xlu1 %6734 }
 0xd79   : > { %v11041_v45 = vpop.permute.xlu0 %6730 }
 0xd7c   : > { %4958 = vrot.lane.b32.xlu0 %v10939_v22, %s11763_s21  ;;  %4956 = vrot.lane.b32.xlu1 %v10926_v17, %s11763_s21  ;;  %v10985_v34 = vpop.permute.xlu1 %6841 }
 0xd7d   : > { %v11053_v48 = vpop.permute.xlu0 %6736 }
 0xd80   : > { %9819 = vrot.lane.b32.xlu0 %v10958_v24, %s11786_s19  ;;  %9814 = vrot.lane.b32.xlu1 %v10958_v24, %s11766_s16  ;;  %v10991_v35 = vpop.permute.xlu1 %6847  ;;  %s11790_s19 = smov 102  }
 0xd81   : > { %v11063_v50 = vpop.permute.xlu0 %6843 }
 0xd84   : > { %5065 = vrot.lane.b32.xlu0 %v10917_v16, %s11775_s0  ;;  %4960 = vrot.lane.b32.xlu1 %v10948_v28, %s11763_s21  ;;  %v11004_v37 = vpop.permute.xlu1 %6954 }
 0xd85   : > { %v11069_v51 = vpop.permute.xlu0 %6845 }
 0xd88   : > { %5067 = vrot.lane.b32.xlu0 %v10926_v17, %s11775_s0  ;;  %7507 = vrot.lane.b32.xlu1 %v11002_v0, %s11762_s27  ;;  %v11017_v40 = vpop.permute.xlu1 %6956 }
 0xd89   : > { %v11079_v52 = vpop.permute.xlu0 %6952 }
 0xd8c   : > { %5069 = vrot.lane.b32.xlu0 %v10939_v22, %s11775_s0  ;;  %7509 = vrot.lane.b32.xlu1 %v11015_v39, %s11762_s27  ;;  %v11023_v41 = vpop.permute.xlu1 %7063 }
 0xd8d   : > { %v11085_v49 = vpop.permute.xlu0 %6958 }
 0xd90   : > { %9829 = vrot.lane.b32.xlu0 %v10958_v24, %s10057_s29  ;;  %9824 = vrot.lane.b32.xlu1 %v10958_v24, %s11769_s18  ;;  %v11035_v44 = vpop.permute.xlu1 %7067  ;;  %s11789_s18 = smov 103   ;;  %s11809_s29 = smov 121  }
 0xd91   : > { %11787 = vst [vmem:[#allocation9_spill] sm:$0xff] %v11035_v44  ;;  %v11095_v53 = vpop.permute.xlu0 %7065 }
 0xd92   : > { %11791 = vst [vmem:[#allocation10_spill] sm:$0xff] %v11095_v53 }
 0xd94   : > { %5071 = vrot.lane.b32.xlu0 %v10948_v28, %s11775_s0  ;;  %7511 = vrot.lane.b32.xlu1 %v11033_v43, %s11762_s27  ;;  %v4753_v47 = vpop.permute.xlu1 %4752 }
 0xd95   : > { %9024 = vmatprep.mubr.msk.f32.mxu0 %vm11788_vm2, %v4753_v47  ;;  %v11101_v54 = vpop.permute.xlu0 %7069  ;;  %vm11824_vm2 = vmmov %vm11814_vm0 }
 0xd96   : > { %11792 = vst [vmem:[#allocation11_spill] sm:$0xff] %v11101_v54 }
 0xd98   : > { %5176 = vrot.lane.b32.xlu0 %v10917_v16, %s11777_s1  ;;  %7513 = vrot.lane.b32.xlu1 %v11046_v46, %s11762_s27  ;;  %v11128_v47 = vpop.permute.xlu1 %4754 }
 0xd99   : > { %v11110_v18 = vpop.permute.xlu0 %7174  ;;  %11797 = vst [vmem:[#allocation15_spill] sm:$0xff] %v11128_v47 }
 0xd9a   : > { %11794 = vst [vmem:[#allocation12_spill] sm:$0xff] %v11110_v18 }
 0xd9c   : > { %5178 = vrot.lane.b32.xlu0 %v10926_v17, %s11777_s1  ;;  %7618 = vrot.lane.b32.xlu1 %v11002_v0, %s11763_s21  ;;  %v11136_v18 = vpop.permute.xlu1 %7178 }
 0xd9d   : > { %v11116_v20 = vpop.permute.xlu0 %7176  ;;  %11799 = vst [vmem:[#allocation17_spill] sm:$0xff] %v11136_v18 }
 0xd9e   : > { %11795 = vst [vmem:[#allocation13_spill] sm:$0xff] %v11116_v20 }
 0xda0   : > { %9839 = vrot.lane.b32.xlu0 %v10958_v24, %s11789_s18  ;;  %9834 = vrot.lane.b32.xlu1 %v10958_v24, %s11755_s28  ;;  %s10058_s28 = smov 101   ;;  %v11147_v54 = vpop.permute.xlu1 %7180 }
 0xda1   : > { %v11126_v21 = vpop.permute.xlu0 %4756  ;;  %11802 = vst [vmem:[#allocation19_spill] sm:$0xff] %v11147_v54 }
 0xda2   : > { %11796 = vst [vmem:[#allocation14_spill] sm:$0xff] %v11126_v21 }
 0xda4   : > { %5180 = vrot.lane.b32.xlu0 %v10939_v22, %s11777_s1  ;;  %7620 = vrot.lane.b32.xlu1 %v11015_v39, %s11763_s21 }
 0xda5   : > { %v11134_v20 = vpop.permute.xlu0 %4758 }
 0xda6   : > { %11798 = vst [vmem:[#allocation16_spill] sm:$0xff] %v11134_v20 }
 0xda8   : > { %5182 = vrot.lane.b32.xlu0 %v10948_v28, %s11777_s1  ;;  %7622 = vrot.lane.b32.xlu1 %v11033_v43, %s11763_s21 }
 0xda9   : > { %v11145_v21 = vpop.permute.xlu0 %7285 }
 0xdaa   : > { %11801 = vst [vmem:[#allocation18_spill] sm:$0xff] %v11145_v21 }
 0xdac   : > { %5287 = vrot.lane.b32.xlu0 %v10917_v16, %s11768_s15  ;;  %7624 = vrot.lane.b32.xlu1 %v11046_v46, %s11763_s21 }
 0xdb0   : > { %9849 = vrot.lane.b32.xlu0 %v10958_v24, %s10058_s28  ;;  %9844 = vrot.lane.b32.xlu1 %v10958_v24, %s11790_s19 }
 0xdb4   : > { %5289 = vrot.lane.b32.xlu0 %v10926_v17, %s11768_s15  ;;  %7729 = vrot.lane.b32.xlu1 %v11002_v0, %s11775_s0 }
 0xdb8   : > { %5291 = vrot.lane.b32.xlu0 %v10939_v22, %s11768_s15  ;;  %7731 = vrot.lane.b32.xlu1 %v11015_v39, %s11775_s0 }
 0xdbc   : > { %5293 = vrot.lane.b32.xlu0 %v10948_v28, %s11768_s15  ;;  %7733 = vrot.lane.b32.xlu1 %v11033_v43, %s11775_s0 }
 0xdc0   : > { %9859 = vrot.lane.b32.xlu0 %v10958_v24, %s10059_s8  ;;  %9854 = vrot.lane.b32.xlu1 %v10958_v24, %s11793_s17 }
 0xdc4   : > { %5398 = vrot.lane.b32.xlu0 %v10917_v16, %s11781_s6  ;;  %7735 = vrot.lane.b32.xlu1 %v11046_v46, %s11775_s0  ;;  %s11800_s0 = smov 126  }
 0xdc8   : > { %9869 = vrot.lane.b32.xlu0 %v10958_v24, %s11763_s21  ;;  %7840 = vrot.lane.b32.xlu1 %v11002_v0, %s11777_s1  ;;  %s10061_s21 = smov 125  }
 0xdcc   : > { %5400 = vrot.lane.b32.xlu0 %v10926_v17, %s11781_s6  ;;  %9864 = vrot.lane.b32.xlu1 %v10958_v24, %s11759_s24  ;;  %s10060_s24 = smov 95  }
 0xdd0   : > { %5402 = vrot.lane.b32.xlu0 %v10939_v22, %s11781_s6  ;;  %7842 = vrot.lane.b32.xlu1 %v11015_v39, %s11777_s1 }
 0xdd4   : > { %5404 = vrot.lane.b32.xlu0 %v10948_v28, %s11781_s6  ;;  %7844 = vrot.lane.b32.xlu1 %v11033_v43, %s11777_s1 }
 0xdd8   : > { %9879 = vrot.lane.b32.xlu0 %v10958_v24, %s11800_s0  ;;  %9874 = vrot.lane.b32.xlu1 %v10958_v24, %s10060_s24 }
 0xddc   : > { %5509 = vrot.lane.b32.xlu0 %v10917_v16, %s11779_s22  ;;  %7846 = vrot.lane.b32.xlu1 %v11046_v46, %s11777_s1  ;;  %s11804_s1 = smov 122  }
 0xde0   : > { %9889 = vrot.lane.b32.xlu0 %v10958_v24, %s10061_s21  ;;  %9884 = vrot.lane.b32.xlu1 %v10958_v24, %s11803_s9 }
 0xde2   : > { %v9810_v18 = vpop.permute.xlu0 %9809  ;;  %v9805_v20 = vpop.permute.xlu1 %9804 }
 0xde3   : > { %v9807_v47 = vunpack.i.h.bf16 %v9805_v20  ;;  %v9806_v31 = vunpack.i.l.bf16 %v9805_v20  ;;  %v9812_v44 = vunpack.i.h.bf16 %v9810_v18  ;;  %v9811_v53 = vunpack.i.l.bf16 %v9810_v18 }
 0xde4   : > { %5511 = vrot.lane.b32.xlu0 %v10926_v17, %s11779_s22  ;;  %7951 = vrot.lane.b32.xlu1 %v11002_v0, %s11768_s15 }
 0xde5   : > { %v9388_v21 = vpack.c.bf16 %v9807_v47, %v9806_v31  ;;  %v9392_v20 = vpack.c.bf16 %v9812_v44, %v9811_v53 }
 0xde6   : > { %v11156_v54 = vpop.permute.xlu0 %7289  ;;  %v11158_v16 = vpop.permute.xlu1 %7287 }
 0xde7   : > { %9389 = vmatprep.subr.bf16.mxu1 %v9388_v21 }
 0xde8   : > { %9899 = vrot.lane.b32.xlu0 %v10958_v24, %s11804_s1  ;;  %9894 = vrot.lane.b32.xlu1 %v10958_v24, %s10062_s14 }
 0xde9   : > { %9391 = vmatpush3.bf16.msra.mxu1 %v9388_v21 }
 0xdea   : > { %9393 = vmatprep.subr.bf16.mxu1 %v9392_v20  ;;  %v11163_v18 = vpop.permute.xlu0 %4954  ;;  %v11165_v17 = vpop.permute.xlu1 %7291 }
 0xdec   : > { %9125 = vmatmul.mubr.msk.f32.vlgmr.msra.gmra.mrb[4].mxu1 %vm11805_vm10, %v10810_v55  ;;  %5513 = vrot.lane.b32.xlu0 %v10939_v22, %s11779_s22  ;;  %vm11825_vm10 = vmmov %vm11814_vm0 }
 0xded   : > { %7953 = vrot.lane.b32.xlu1 %v11015_v39, %s11768_s15  ;;  %9127 = vmatprep.mubr.msk.f32.mxu1 %vm11806_vm12, %v10812_v56  ;;  %vm11826_vm12 = vmmov %vm11814_vm0 }
 0xdee   : > { %9395 = vmatpush3.bf16.msra.mxu1 %v9392_v20  ;;  %v11175_v31 = vpop.permute.xlu0 %4958  ;;  %v11177_v44 = vpop.permute.xlu1 %4956 }
 0xdef   : > { %11807 = vst [vmem:[#allocation20_spill] sm:$0xff] %v11175_v31 }
 0xdf0   : > { %9128 = vmatmul.mubr.msk.f32.gmra.mrb[6].mxu1 %vm11808_vm3, %v10814_v57  ;;  %9909 = vrot.lane.b32.xlu0 %v10958_v24, %s11809_s29  ;;  %vm11827_vm3 = vmmov %vm11814_vm0 }
 0xdf1   : > { %9904 = vrot.lane.b32.xlu1 %v10958_v24, %s10063_s2  ;;  %9134 = vmatprep.mubr.msk.f32.mxu1 %vm11810_vm5, %v10816_v58  ;;  %vm11829_vm5 = vmmov %vm11814_vm0  ;;  %s11944_s2 = sld [smem:[#allocation29_spill]] }
 0xdf2   : > { %v9820_v55 = vpop.permute.xlu0 %9819  ;;  %v9815_v53 = vpop.permute.xlu1 %9814 }
 0xdf3   : > { %v9817_v56 = vunpack.i.h.bf16 %v9815_v53  ;;  %v9816_v21 = vunpack.i.l.bf16 %v9815_v53  ;;  %v9822_v47 = vunpack.i.h.bf16 %v9820_v55  ;;  %v9821_v20 = vunpack.i.l.bf16 %v9820_v55 }
 0xdf4   : > { %9135 = vmatmul.mubr.msk.f32.vlgmr.msra.gmra.mrb[4].mxu1 %vm11811_vm6, %v10818_v59  ;;  %5515 = vrot.lane.b32.xlu0 %v10948_v28, %s11779_s22  ;;  %vm11830_vm6 = vmmov %vm11814_vm0 }
 0xdf5   : > { %7955 = vrot.lane.b32.xlu1 %v11033_v43, %s11768_s15  ;;  %9137 = vmatprep.mubr.msk.f32.mxu1 %vm11812_vm7, %v10831_v62  ;;  %v9396_v57 = vpack.c.bf16 %v9817_v56, %v9816_v21  ;;  %v9400_v59 = vpack.c.bf16 %v9822_v47, %v9821_v20  ;;  %vm11831_vm7 = vmmov %vm11814_vm0 }
 0xdf6   : > { %v11194_v58 = vpop.permute.xlu0 %5065  ;;  %v11196_v31 = vpop.permute.xlu1 %4960 }
 0xdf7   : > { %9397 = vmatprep.subr.bf16.mxu1 %v9396_v57 }
 0xdf8   : > { %9138 = vmatmul.mubr.msk.f32.gmra.mrb[6].mxu1 %vm11813_vm9, %v10820_v60  ;;  %9919 = vrot.lane.b32.xlu0 %v10958_v24, %s11761_s23  ;;  %s11818_s23 = smov 119   ;;  %vm11832_vm9 = vmmov %vm11814_vm0 }
 0xdf9   : > { %9914 = vrot.lane.b32.xlu1 %v10958_v24, %s10064_s3  ;;  %9399 = vmatpush3.bf16.msra.mxu1 %v9396_v57  ;;  %s463_s3 = scalar_lea.vmem %s11944_s2, %s11947_s30 }
 0xdfa   : > { %9144 = vmatprep.mubr.msk.f32.mxu1 %vm11814_vm0, %v10858_v4  ;;  %9401 = vmatprep.subr.bf16.mxu1 %v9400_v59  ;;  %v11205_v62 = vpop.permute.xlu0 %5067  ;;  %v11207_v55 = vpop.permute.xlu1 %7507 }
 0xdfc   : > { %9145 = vmatmul.mubr.msk.f32.vlgmr.msra.gmra.mrb[4].mxu1 %vm11815_vm13, %v10833_v63  ;;  %8062 = vrot.lane.b32.xlu0 %v11002_v0, %s11781_s6  ;;  %vm11833_vm13 = vmmov %vm11814_vm0 }
 0xdfd   : > { %7957 = vrot.lane.b32.xlu1 %v11046_v46, %s11768_s15  ;;  %9147 = vmatprep.mubr.msk.f32.mxu1 %vm11816_vm4, %v10860_v5  ;;  %s10065_s15 = smov 85   ;;  %vm11834_vm4 = vmmov %vm11814_vm0 }
 0xdfe   : > { %9403 = vmatpush3.bf16.msra.mxu1 %v9400_v59  ;;  %v11217_v60 = vpop.permute.xlu0 %5069  ;;  %v11219_v4 = vpop.permute.xlu1 %7509 }
 0xe00   : > { %9148 = vmatmul.mubr.msk.f32.gmra.mrb[6].mxu1 %vm11817_vm8, %v10866_v6  ;;  %9929 = vrot.lane.b32.xlu0 %v10958_v24, %s11818_s23  ;;  %vm11835_vm8 = vmmov %vm11814_vm0 }
 0xe01   : > { %9924 = vrot.lane.b32.xlu1 %v10958_v24, %s11819_s20  ;;  %9154 = vmatprep.mubr.msk.f32.mxu1 %vm11820_vm1, %v10868_v7  ;;  %vm11836_vm1 = vmmov %vm11814_vm0 }
 0xe02   : > { %v9830_v63 = vpop.permute.xlu0 %9829  ;;  %v9825_v53 = vpop.permute.xlu1 %9824 }
 0xe03   : > { %v9827_v5 = vunpack.i.h.bf16 %v9825_v53  ;;  %v9826_v56 = vunpack.i.l.bf16 %v9825_v53  ;;  %v9832_v21 = vunpack.i.h.bf16 %v9830_v63  ;;  %v9831_v47 = vunpack.i.l.bf16 %v9830_v63 }
 0xe04   : > { %9155 = vmatmul.mubr.msk.f32.vlgmr.msra.gmra.mrb[4].mxu1 %vm11821_vm14, %v10878_v8  ;;  %8066 = vrot.lane.b32.xlu0 %v11033_v43, %s11781_s6  ;;  %vm11837_vm14 = vmmov %vm11814_vm0 }
 0xe05   : > { %v9404_v6 = vpack.c.bf16 %v9827_v5, %v9826_v56  ;;  %8064 = vrot.lane.b32.xlu1 %v11015_v39, %s11781_s6  ;;  %9157 = vmatprep.mubr.msk.f32.mxu1 %vm11822_vm15, %v10886_v10  ;;  %v9408_v57 = vpack.c.bf16 %v9832_v21, %v9831_v47  ;;  %vm11838_vm15 = vmmov %vm11814_vm0 }
 0xe06   : > { %v11237_v7 = vpop.permute.xlu0 %5071  ;;  %v11239_v20 = vpop.permute.xlu1 %7511 }
 0xe07   : > { %9405 = vmatprep.subr.bf16.mxu1 %v9404_v6 }
 0xe08   : > { %9158 = vmatmul.mubr.msk.f32.gmra.mrb[6].mxu1 %vm11823_vm11, %v10880_v9  ;;  %9939 = vrot.lane.b32.xlu0 %v10958_v24, %s11764_s25  ;;  %s11828_s25 = smov 115   ;;  %vm11839_vm11 = vmmov %vm11814_vm0 }
 0xe09   : > { %9934 = vrot.lane.b32.xlu1 %v10958_v24, %s10065_s15  ;;  %9407 = vmatpush3.bf16.msra.mxu1 %v9404_v6 }
 0xe0a   : > { %9164 = vmatprep.mubr.msk.f32.mxu1 %vm11824_vm2, %v10898_v12  ;;  %9409 = vmatprep.subr.bf16.mxu1 %v9408_v57  ;;  %v11248_v8 = vpop.permute.xlu0 %5176  ;;  %v11250_v10 = vpop.permute.xlu1 %7513  ;;  %vm11840_vm2 = vmmov %vm11814_vm0 }
 0xe0c   : > { %9165 = vmatmul.mubr.msk.f32.vlgmr.msra.gmra.mrb[4].mxu1 %vm11825_vm10, %v10888_v11  ;;  %5731 = vrot.lane.b32.xlu0 %v10741_v26, %s11762_s27  ;;  %vm11841_vm10 = vmmov %vm11814_vm0 }
 0xe0d   : > { %8068 = vrot.lane.b32.xlu1 %v11046_v46, %s11781_s6  ;;  %9167 = vmatprep.mubr.msk.f32.mxu1 %vm11826_vm12, %v10900_v13  ;;  %vm11842_vm12 = vmmov %vm11814_vm0 }
 0xe0e   : > { %9411 = vmatpush3.bf16.msra.mxu1 %v9408_v57  ;;  %v11260_v9 = vpop.permute.xlu0 %5178  ;;  %v11262_v12 = vpop.permute.xlu1 %7618 }
 0xe10   : > { %9168 = vmatmul.mubr.msk.f32.gmra.mrb[6].mxu1 %vm11827_vm3, %v10906_v14  ;;  %9949 = vrot.lane.b32.xlu0 %v10958_v24, %s11828_s25  ;;  %vm11843_vm3 = vmmov %vm11814_vm0 }
 0xe11   : > { %9944 = vrot.lane.b32.xlu1 %v10958_v24, %s11756_s26  ;;  %9174 = vmatprep.mubr.msk.f32.mxu1 %vm11829_vm5, %v10908_v15  ;;  %s10066_s26 = smov 83   ;;  %vm11844_vm5 = vmmov %vm11814_vm0 }
 0xe12   : > { %v9840_v26 = vpop.permute.xlu0 %9839  ;;  %v9835_v11 = vpop.permute.xlu1 %9834 }
 0xe13   : > { %v9837_v13 = vunpack.i.h.bf16 %v9835_v11  ;;  %v9836_v59 = vunpack.i.l.bf16 %v9835_v11  ;;  %v9842_v63 = vunpack.i.h.bf16 %v9840_v26  ;;  %v9841_v53 = vunpack.i.l.bf16 %v9840_v26 }
 0xe14   : > { %9175 = vmatmul.mubr.msk.f32.vlgmr.msra.gmra.mrb[4].mxu1 %vm11830_vm6, %v10983_v33  ;;  %5733 = vrot.lane.b32.xlu0 %v10736_v25, %s11762_s27  ;;  %vm11845_vm6 = vmmov %vm11814_vm0 }
 0xe15   : > { %v9412_v14 = vpack.c.bf16 %v9837_v13, %v9836_v59  ;;  %8173 = vrot.lane.b32.xlu1 %v11002_v0, %s11779_s22  ;;  %9177 = vmatprep.mubr.msk.f32.mxu1 %vm11831_vm7, %v10993_v36  ;;  %v9416_v56 = vpack.c.bf16 %v9842_v63, %v9841_v53  ;;  %vm11846_vm7 = vmmov %vm11814_vm0 }
 0xe16   : > { %v11280_v15 = vpop.permute.xlu0 %5180  ;;  %v11282_v5 = vpop.permute.xlu1 %7620 }
 0xe17   : > { %9413 = vmatprep.subr.bf16.mxu1 %v9412_v14 }
 0xe18   : > { %9178 = vmatmul.mubr.msk.f32.gmra.mrb[6].mxu1 %vm11832_vm9, %v10954_v19  ;;  %5735 = vrot.lane.b32.xlu0 %v10750_v27, %s11762_s27  ;;  %v11301_v27 = vld [vmem:[%s11668_s4 + $0x68] sm:$0xff]  ;;  %vm11847_vm9 = vmmov %vm11814_vm0 }
 0xe19   : > { %9954 = vrot.lane.b32.xlu1 %v10958_v24, %s10066_s26  ;;  %9415 = vmatpush3.bf16.msra.mxu1 %v9412_v14 }
 0xe1a   : > { %9417 = vmatprep.subr.bf16.mxu1 %v9416_v56  ;;  %v11290_v25 = vpop.permute.xlu0 %5182  ;;  %v11292_v33 = vpop.permute.xlu1 %7622  ;;  %9184 = vmatprep.mubr.msk.f32.mxu1 %vm11814_vm0, %v10829_v61 }
 0xe1c   : > { %9185 = vmatmul.mubr.msk.f32.vlgmr.msra.gmra.mrb[4].mxu1 %vm11833_vm13, %v10842_v1  ;;  %5737 = vrot.lane.b32.xlu0 %v11301_v27, %s11762_s27  ;;  %vm11848_vm13 = vmmov %vm11814_vm0 }
 0xe1d   : > { %8175 = vrot.lane.b32.xlu1 %v11015_v39, %s11779_s22  ;;  %9419 = vmatpush3.bf16.msra.mxu1 %v9416_v56 }
 0xe1e   : > { %v11307_v19 = vpop.permute.xlu0 %5287  ;;  %v11309_v24 = vpop.permute.xlu1 %7624  ;;  %9187 = vmatprep.mubr.msk.f32.mxu1 %vm11834_vm4, %v10856_v3  ;;  %vm11849_vm4 = vmmov %vm11814_vm0 }
 0xe20   : > { %9188 = vmatmul.mubr.msk.f32.gmra.mrb[6].mxu1 %vm11835_vm8, %v10847_v2  ;;  %vm11850_vm8 = vmmov %vm11814_vm0 }
 0xe21   : > { %8177 = vrot.lane.b32.xlu1 %v11033_v43, %s11779_s22  ;;  %9194 = vmatprep.mubr.msk.f32.mxu1 %vm11836_vm1, %v10956_v23  ;;  %vm11851_vm1 = vmmov %vm11814_vm0 }
 0xe22   : > { %v9850_v61 = vpop.permute.xlu0 %9849  ;;  %v9845_v1 = vpop.permute.xlu1 %9844 }
 0xe23   : > { %v9847_v36 = vunpack.i.h.bf16 %v9845_v1  ;;  %v9846_v21 = vunpack.i.l.bf16 %v9845_v1  ;;  %v9852_v47 = vunpack.i.h.bf16 %v9850_v61  ;;  %v9851_v6 = vunpack.i.l.bf16 %v9850_v61 }
 0xe24   : > { %9195 = vmatmul.mubr.msk.f32.vlgmr.msra.gmra.mrb[4].mxu1 %vm11837_vm14, %v11010_v38  ;;  %vm11853_vm14 = vmmov %vm11814_vm0 }
 0xe25   : > { %v9420_v57 = vpack.c.bf16 %v9847_v36, %v9846_v21  ;;  %8179 = vrot.lane.b32.xlu1 %v11046_v46, %s11779_s22  ;;  %9197 = vmatprep.mubr.msk.f32.mxu1 %vm11838_vm15, %v11025_v42  ;;  %v9424_v23 = vpack.c.bf16 %v9852_v47, %v9851_v6  ;;  %v11854_v6 = vld [vmem:[#allocation9_spill] sm:$0xff]  ;;  %vm11855_vm15 = vmmov %vm11814_vm0 }
 0xe26   : > { %v11325_v2 = vpop.permute.xlu0 %5289  ;;  %v11327_v3 = vpop.permute.xlu1 %7729 }
 0xe27   : > { %9421 = vmatprep.subr.bf16.mxu1 %v9420_v57 }
 0xe28   : > { %9198 = vmatmul.mubr.msk.f32.gmra.mrb[6].mxu1 %vm11839_vm11, %v10963_v29  ;;  %vm11858_vm11 = vmmov %vm11814_vm0 }
 0xe29   : > { %9423 = vmatpush3.bf16.msra.mxu1 %v9420_v57  ;;  %9204 = vmatprep.mubr.msk.f32.mxu1 %vm11840_vm2, %v11041_v45  ;;  %v11856_v57 = vld [vmem:[#allocation8_spill] sm:$0xff]  ;;  %vm11860_vm2 = vmmov %vm11814_vm0 }
 0xe2a   : > { %9425 = vmatprep.subr.bf16.mxu1 %v9424_v23  ;;  %v11333_v38 = vpop.permute.xlu0 %5291  ;;  %v11335_v26 = vpop.permute.xlu1 %7731 }
 0xe2c   : > { %9205 = vmatmul.mubr.msk.f32.vlgmr.msra.gmra.mrb[4].mxu1 %vm11841_vm10, %v10969_v30  ;;  %vm11862_vm10 = vmmov %vm11814_vm0 }
 0xe2d   : > { %9207 = vmatprep.mubr.msk.f32.mxu1 %vm11842_vm12, %v10977_v32  ;;  %9427 = vmatpush3.bf16.msra.mxu1 %v9424_v23  ;;  %vm11864_vm12 = vmmov %vm11814_vm0 }
 0xe2e   : > { %v11341_v42 = vpop.permute.xlu0 %5293  ;;  %v11343_v11 = vpop.permute.xlu1 %7733 }
 0xe30   : > { %9208 = vmatmul.mubr.msk.f32.gmra.mrb[6].mxu1 %vm11843_vm3, %v11053_v48  ;;  %vm11866_vm3 = vmmov %vm11814_vm0 }
 0xe31   : > { %9214 = vmatprep.mubr.msk.f32.mxu1 %vm11844_vm5, %v10985_v34  ;;  %vm11868_vm5 = vmmov %vm11814_vm0 }
 0xe32   : > { %v9860_v29 = vpop.permute.xlu0 %9859  ;;  %v9855_v45 = vpop.permute.xlu1 %9854 }
 0xe33   : > { %v9857_v13 = vunpack.i.h.bf16 %v9855_v45  ;;  %v9856_v59 = vunpack.i.l.bf16 %v9855_v45  ;;  %v9862_v63 = vunpack.i.h.bf16 %v9860_v29  ;;  %v9861_v30 = vunpack.i.l.bf16 %v9860_v29  ;;  %v11859_v29 = vld [vmem:[#allocation11_spill] sm:$0xff]  ;;  %v11861_v45 = vld [vmem:[#allocation14_spill] sm:$0xff] }
 0xe34   : > { %9215 = vmatmul.mubr.msk.f32.vlgmr.msra.gmra.mrb[4].mxu1 %vm11845_vm6, %v11063_v50  ;;  %vm11870_vm6 = vmmov %vm11814_vm0 }
 0xe35   : > { %v9428_v32 = vpack.c.bf16 %v9857_v13, %v9856_v59  ;;  %9217 = vmatprep.mubr.msk.f32.mxu1 %vm11846_vm7, %v11069_v51  ;;  %v9432_v48 = vpack.c.bf16 %v9862_v63, %v9861_v30  ;;  %v11863_v13 = vld [vmem:[#allocation12_spill] sm:$0xff]  ;;  %vm11872_vm7 = vmmov %vm11814_vm0 }
 0xe36   : > { %v11353_v53 = vpop.permute.xlu0 %5398  ;;  %v11355_v14 = vpop.permute.xlu1 %7735 }
 0xe37   : > { %9429 = vmatprep.subr.bf16.mxu1 %v9428_v32 }
 0xe38   : > { %9218 = vmatmul.mubr.msk.f32.gmra.mrb[6].mxu1 %vm11847_vm9, %v10991_v35  ;;  %vm11874_vm9 = vmmov %vm11814_vm0 }
 0xe39   : > { %9431 = vmatpush3.bf16.msra.mxu1 %v9428_v32  ;;  %9224 = vmatprep.mubr.msk.f32.mxu1 %vm11814_vm0, %v11079_v52 }
 0xe3a   : > { %9433 = vmatprep.subr.bf16.mxu1 %v9432_v48  ;;  %v9870_v34 = vpop.permute.xlu0 %9869  ;;  %v11361_v50 = vpop.permute.xlu1 %7840 }
 0xe3b   : > { %v9872_v56 = vunpack.i.h.bf16 %v9870_v34  ;;  %v9871_v61 = vunpack.i.l.bf16 %v9870_v34 }
 0xe3c   : > { %9225 = vmatmul.mubr.msk.f32.vlgmr.msra.gmra.mrb[4].mxu1 %vm11848_vm13, %v11004_v37  ;;  %vm11877_vm13 = vmmov %vm11814_vm0 }
 0xe3d   : > { %v9436_v51 = vpack.c.bf16 %v9872_v56, %v9871_v61  ;;  %9227 = vmatprep.mubr.msk.f32.mxu1 %vm11849_vm4, %v11017_v40  ;;  %9435 = vmatpush3.bf16.msra.mxu1 %v9432_v48  ;;  %v11852_v40 = vld [vmem:[#allocation10_spill] sm:$0xff]  ;;  %v11865_v56 = vld [vmem:[#allocation16_spill] sm:$0xff]  ;;  %v11867_v61 = vld [vmem:[#allocation13_spill] sm:$0xff] }
 0xe3e   : > { %v11367_v1 = vpop.permute.xlu0 %5400  ;;  %v9865_v35 = vpop.permute.xlu1 %9864  ;;  %vm11878_vm4 = vmmov %vm11814_vm0 }
 0xe3f   : > { %v9867_v36 = vunpack.i.h.bf16 %v9865_v35  ;;  %v9866_v21 = vunpack.i.l.bf16 %v9865_v35  ;;  %9437 = vmatprep.subr.bf16.mxu1 %v9436_v51 }
 0xe40   : > { %9228 = vmatmul.mubr.msk.f32.gmra.mrb[6].mxu1 %vm11850_vm8, %v11085_v49  ;;  %vm11879_vm8 = vmmov %vm11814_vm0 }
 0xe41   : > { %v9348_v52 = vpack.c.bf16 %v9867_v36, %v9866_v21  ;;  %9234 = vmatprep.mubr.msk.f32.mxu1 %vm11851_vm1, %v11023_v41  ;;  %v11857_v41 = vld [vmem:[#allocation15_spill] sm:$0xff]  ;;  %v11871_v21 = vld [vmem:[#allocation17_spill] sm:$0xff]  ;;  %vm11880_vm1 = vmmov %vm11814_vm0 }
 0xe42   : > { %v11373_v47 = vpop.permute.xlu0 %5402  ;;  %v11375_v37 = vpop.permute.xlu1 %7842 }
 0xe43   : > { %9349 = vmatprep.subr.bf16.mxu0 %v9348_v52 }
 0xe44   : > { %9235 = vmatmul.mubr.msk.f32.vlgmr.msra.gmra.mrb[4].mxu1 %vm11853_vm14, %v11852_v40  ;;  %9351 = vmatpush3.bf16.msra.mxu0 %v9348_v52  ;;  %vm11881_vm14 = vmmov %vm11814_vm0 }
 0xe45   : > { %9439 = vmatpush3.bf16.msra.mxu1 %v9436_v51  ;;  %9237 = vmatprep.mubr.msk.f32.mxu1 %vm11855_vm15, %v11854_v6  ;;  %v11869_v51 = vld [vmem:[#allocation6_spill] sm:$0xff]  ;;  %v11873_v6 = vld [vmem:[#allocation7_spill] sm:$0xff]  ;;  %vm11882_vm15 = vmmov %vm11814_vm0 }
 0xe46   : > { %9353 = vmatprep.subr.bf16.mxu0 %v11856_v57  ;;  %v11382_v49 = vpop.permute.xlu0 %5404  ;;  %v11384_v23 = vpop.permute.xlu1 %7844 }
 0xe47   : > { %9025 = vmatmul.mubr.msk.f32.vlgmr.msra.gmra.mrb[8].mxu0 %vm11858_vm11, %v11857_v41  ;;  %v11876_v41 = vld [vmem:[#allocation18_spill] sm:$0xff]  ;;  %vm11883_vm11 = vmmov %vm11814_vm0 }
 0xe48   : > { %9238 = vmatmul.mubr.msk.f32.gmra.mrb[6].mxu1 %vm11860_vm2, %v11859_v29  ;;  %9027 = vmatprep.mubr.msk.f32.mxu0 %vm11862_vm10, %v11861_v45  ;;  %vm11884_vm2 = vmmov %vm11814_vm0 }
 0xe49   : > { %9355 = vmatpush3.bf16.msra.mxu0 %v11856_v57  ;;  %9244 = vmatprep.mubr.msk.f32.mxu1 %vm11864_vm12, %v11863_v13  ;;  %v11875_v57 = vld [vmem:[#allocation19_spill] sm:$0xff]  ;;  %vm11886_vm10 = vmmov %vm11814_vm0 }
 0xe4a   : > { %v9880_v59 = vpop.permute.xlu0 %9879  ;;  %v9875_v63 = vpop.permute.xlu1 %9874  ;;  %vm11887_vm12 = vmmov %vm11814_vm0 }
 0xe4b   : > { %v9882_v30 = vunpack.i.h.bf16 %v9880_v59  ;;  %v9881_v32 = vunpack.i.l.bf16 %v9880_v59  ;;  %v9877_v48 = vunpack.i.h.bf16 %v9875_v63  ;;  %v9876_v34 = vunpack.i.l.bf16 %v9875_v63  ;;  %9028 = vmatmul.mubr.msk.f32.gmra.mrb[10].mxu0 %vm11866_vm3, %v11865_v56  ;;  %vm11888_vm3 = vmmov %vm11814_vm0 }
 0xe4c   : > { %9245 = vmatmul.mubr.msk.f32.vlgmr.msra.gmra.mrb[4].mxu1 %vm11868_vm5, %v11867_v61  ;;  %9034 = vmatprep.mubr.msk.f32.mxu0 %vm11870_vm6, %v11869_v51  ;;  %vm11889_vm5 = vmmov %vm11814_vm0 }
 0xe4d   : > { %v9356_v35 = vpack.c.bf16 %v9882_v30, %v9881_v32  ;;  %v9440_v36 = vpack.c.bf16 %v9877_v48, %v9876_v34  ;;  %9247 = vmatprep.mubr.msk.f32.mxu1 %vm11872_vm7, %v11871_v21  ;;  %vm11890_vm6 = vmmov %vm11814_vm0 }
 0xe4e   : > { %v11403_v52 = vpop.permute.xlu0 %5509  ;;  %v11405_v40 = vpop.permute.xlu1 %7846  ;;  %vm11891_vm7 = vmmov %vm11814_vm0 }
 0xe4f   : > { %9035 = vmatmul.mubr.msk.f32.vlgmr.msra.gmra.mrb[8].mxu0 %vm11874_vm9, %v11873_v6  ;;  %9357 = vmatprep.subr.bf16.mxu0 %v9356_v35  ;;  %vm11892_vm9 = vmmov %vm11814_vm0 }
 0xe50   : > { %9248 = vmatmul.mubr.msk.f32.gmra.mrb[6].mxu1 %vm11814_vm0, %v11875_v57  ;;  %9441 = vmatprep.subr.bf16.mxu1 %v9440_v36 }
 0xe51   : > { %9359 = vmatpush3.bf16.msra.mxu0 %v9356_v35  ;;  %9443 = vmatpush3.bf16.msra.mxu1 %v9440_v36 }
 0xe52   : > { %9254 = vmatprep.mubr.msk.f32.mxu1 %vm11877_vm13, %v11876_v41  ;;  %v9890_v29 = vpop.permute.xlu0 %9889  ;;  %v9885_v45 = vpop.permute.xlu1 %9884  ;;  %9037 = vmatprep.mubr.msk.f32.mxu0 %vm11878_vm4, %v10939_v22  ;;  %vm11893_vm13 = vmmov %vm11814_vm0 }
 0xe53   : > { %v9892_v13 = vunpack.i.h.bf16 %v9890_v29  ;;  %v9891_v59 = vunpack.i.l.bf16 %v9890_v29  ;;  %v9887_v63 = vunpack.i.h.bf16 %v9885_v45  ;;  %v9886_v30 = vunpack.i.l.bf16 %v9885_v45  ;;  %9038 = vmatmul.mubr.msk.f32.gmra.mrb[10].mxu0 %vm11879_vm8, %v10948_v28  ;;  %vm11894_vm4 = vmmov %vm11814_vm0 }
 0xe54   : > { %9255 = vmatmul.mubr.msk.f32.vlgmr.msra.gmra.mrb[4].mxu1 %vm11880_vm1, %v11158_v16  ;;  %9044 = vmatprep.mubr.msk.f32.mxu0 %vm11881_vm14, %v11163_v18  ;;  %v11885_v16 = vld [vmem:[#allocation20_spill] sm:$0xff]  ;;  %vm11895_vm8 = vmmov %vm11814_vm0 }
 0xe55   : > { %v9360_v32 = vpack.c.bf16 %v9892_v13, %v9891_v59  ;;  %v9444_v48 = vpack.c.bf16 %v9887_v63, %v9886_v30  ;;  %9257 = vmatprep.mubr.msk.f32.mxu1 %vm11882_vm15, %v11156_v54  ;;  %vm11896_vm1 = vmmov %vm11814_vm0  ;;  %v9975_v30 = vld [vmem:[%s11668_s4 + $0x8] sm:$0xff] }
 0xe56   : > { %v11423_v34 = vpop.permute.xlu0 %5511  ;;  %v11425_v22 = vpop.permute.xlu1 %7951  ;;  %vm11897_vm14 = vmmov %vm11814_vm0 }
 0xe57   : > { %9045 = vmatmul.mubr.msk.f32.vlgmr.msra.gmra.mrb[8].mxu0 %vm11883_vm11, %v11177_v44  ;;  %9361 = vmatprep.subr.bf16.mxu0 %v9360_v32  ;;  %vm11898_vm15 = vmmov %vm11814_vm0 }
 0xe58   : > { %9258 = vmatmul.mubr.msk.f32.gmra.mrb[6].mxu1 %vm11884_vm2, %v11165_v17  ;;  %9445 = vmatprep.subr.bf16.mxu1 %v9444_v48  ;;  %vm11899_vm11 = vmmov %vm11814_vm0 }
 0xe59   : > { %9047 = vmatprep.mubr.msk.f32.mxu0 %vm11886_vm10, %v11885_v16  ;;  %9363 = vmatpush3.bf16.msra.mxu0 %v9360_v32  ;;  %vm11900_vm2 = vmmov %vm11814_vm0  ;;  %v9977_v16 = vld [vmem:[%s11668_s4 + $0x48] sm:$0xff] }
 0xe5a   : > { %9447 = vmatpush3.bf16.msra.mxu1 %v9444_v48  ;;  %v9900_v28 = vpop.permute.xlu0 %9899  ;;  %v9895_v18 = vpop.permute.xlu1 %9894  ;;  %9264 = vmatprep.mubr.msk.f32.mxu1 %vm11887_vm12, %v11002_v0  ;;  %vm11901_vm10 = vmmov %vm11814_vm0 }
 0xe5b   : > { %v9902_v54 = vunpack.i.h.bf16 %v9900_v28  ;;  %v9901_v56 = vunpack.i.l.bf16 %v9900_v28  ;;  %v9897_v61 = vunpack.i.h.bf16 %v9895_v18  ;;  %v9896_v51 = vunpack.i.l.bf16 %v9895_v18  ;;  %9048 = vmatmul.mubr.msk.f32.gmra.mrb[10].mxu0 %vm11888_vm3, %v11196_v31  ;;  %vm11902_vm12 = vmmov %vm11814_vm0 }
 0xe5c   : > { %9054 = vmatprep.mubr.msk.f32.mxu0 %vm11889_vm5, %v11194_v58  ;;  %vm11903_vm3 = vmmov %vm11814_vm0 }
 0xe5d   : > { %v9364_v17 = vpack.c.bf16 %v9902_v54, %v9901_v56  ;;  %v9448_v44 = vpack.c.bf16 %v9897_v61, %v9896_v51  ;;  %9265 = vmatmul.mubr.msk.f32.vlgmr.msra.gmra.mrb[4].mxu1 %vm11890_vm6, %v11015_v39  ;;  %vm11904_vm5 = vmmov %vm11814_vm0 }
 0xe5e   : > { %v11441_v35 = vpop.permute.xlu0 %5513  ;;  %9267 = vmatprep.mubr.msk.f32.mxu1 %vm11891_vm7, %v11033_v43  ;;  %vm11905_vm6 = vmmov %vm11814_vm0 }
 0xe5f   : > { %v11445_v0 = vpop.permute.xlu1 %7953  ;;  %9055 = vmatmul.mubr.msk.f32.vlgmr.msra.gmra.mrb[8].mxu0 %vm11892_vm9, %v11205_v62  ;;  %9365 = vmatprep.subr.bf16.mxu0 %v9364_v17  ;;  %vm11906_vm7 = vmmov %vm11814_vm0 }
 0xe60   : > { %9449 = vmatprep.subr.bf16.mxu1 %v9448_v44  ;;  %9057 = vmatprep.mubr.msk.f32.mxu0 %vm11814_vm0, %v11217_v60  ;;  %vm11907_vm9 = vmmov %vm11814_vm0 }
 0xe61   : > { %9268 = vmatmul.mubr.msk.f32.gmra.mrb[6].mxu1 %vm11893_vm13, %v11046_v46  ;;  %9367 = vmatpush3.bf16.msra.mxu0 %v9364_v17  ;;  %vm11908_vm13 = vmmov %vm11814_vm0 }
 0xe62   : > { %9451 = vmatpush3.bf16.msra.mxu1 %v9448_v44  ;;  %9274 = vmatprep.mubr.msk.f32.mxu1 %vm11894_vm4, %v11207_v55  ;;  %v9910_v39 = vpop.permute.xlu0 %9909  ;;  %vm11909_vm4 = vmmov %vm11814_vm0 }
 0xe63   : > { %v9912_v43 = vunpack.i.h.bf16 %v9910_v39  ;;  %v9911_v31 = vunpack.i.l.bf16 %v9910_v39  ;;  %v9905_v58 = vpop.permute.xlu1 %9904  ;;  %9058 = vmatmul.mubr.msk.f32.gmra.mrb[10].mxu0 %vm11895_vm8, %v11237_v7  ;;  %vm11910_vm8 = vmmov %vm11814_vm0 }
 0xe64   : > { %v9907_v62 = vunpack.i.h.bf16 %v9905_v58  ;;  %v9906_v36 = vunpack.i.l.bf16 %v9905_v58  ;;  %9064 = vmatprep.mubr.msk.f32.mxu0 %vm11896_vm1, %v11248_v8  ;;  %vm11911_vm1 = vmmov %vm11814_vm0 }
 0xe65   : > { %v9368_v60 = vpack.c.bf16 %v9912_v43, %v9911_v31  ;;  %9275 = vmatmul.mubr.msk.f32.vlgmr.msra.gmra.mrb[4].mxu1 %vm11897_vm14, %v11219_v4  ;;  %vm11912_vm14 = vmmov %vm11814_vm0 }
 0xe66   : > { %v9452_v46 = vpack.c.bf16 %v9907_v62, %v9906_v36  ;;  %9277 = vmatprep.mubr.msk.f32.mxu1 %vm11898_vm15, %v11239_v20  ;;  %v11463_v55 = vpop.permute.xlu0 %5515  ;;  %vm11913_vm15 = vmmov %vm11814_vm0 }
 0xe67   : > { %v11465_v21 = vpop.permute.xlu1 %7955  ;;  %9065 = vmatmul.mubr.msk.f32.vlgmr.msra.gmra.mrb[8].mxu0 %vm11899_vm11, %v11260_v9  ;;  %9369 = vmatprep.subr.bf16.mxu0 %v9368_v60  ;;  %vm11914_vm11 = vmmov %vm11814_vm0 }
 0xe68   : > { %9453 = vmatprep.subr.bf16.mxu1 %v9452_v46  ;;  %9067 = vmatprep.mubr.msk.f32.mxu0 %vm11900_vm2, %v11280_v15  ;;  %vm11915_vm2 = vmmov %vm11814_vm0 }
 0xe69   : > { %9278 = vmatmul.mubr.msk.f32.gmra.mrb[6].mxu1 %vm11901_vm10, %v11250_v10  ;;  %9371 = vmatpush3.bf16.msra.mxu0 %v9368_v60  ;;  %vm11916_vm10 = vmmov %vm11814_vm0 }
 0xe6a   : > { %9455 = vmatpush3.bf16.msra.mxu1 %v9452_v46  ;;  %9284 = vmatprep.mubr.msk.f32.mxu1 %vm11902_vm12, %v11262_v12  ;;  %v9920_v4 = vpop.permute.xlu0 %9919  ;;  %vm11917_vm12 = vmmov %vm11814_vm0 }
 0xe6b   : > { %v9922_v7 = vunpack.i.h.bf16 %v9920_v4  ;;  %v9921_v20 = vunpack.i.l.bf16 %v9920_v4  ;;  %v9915_v8 = vpop.permute.xlu1 %9914  ;;  %9068 = vmatmul.mubr.msk.f32.gmra.mrb[10].mxu0 %vm11903_vm3, %v11290_v25  ;;  %vm11918_vm3 = vmmov %vm11814_vm0 }
 0xe6c   : > { %v9917_v9 = vunpack.i.h.bf16 %v9915_v8  ;;  %v9916_v6 = vunpack.i.l.bf16 %v9915_v8  ;;  %9074 = vmatprep.mubr.msk.f32.mxu0 %vm11904_vm5, %v11307_v19  ;;  %vm11919_vm5 = vmmov %vm11814_vm0 }
 0xe6d   : > { %v9372_v15 = vpack.c.bf16 %v9922_v7, %v9921_v20  ;;  %9285 = vmatmul.mubr.msk.f32.vlgmr.msra.gmra.mrb[4].mxu1 %vm11905_vm6, %v11282_v5  ;;  %vm11920_vm6 = vmmov %vm11814_vm0 }
 0xe6e   : > { %v9456_v10 = vpack.c.bf16 %v9917_v9, %v9916_v6  ;;  %9287 = vmatprep.mubr.msk.f32.mxu1 %vm11906_vm7, %v11292_v33  ;;  %v11483_v12 = vpop.permute.xlu0 %8062  ;;  %vm11921_vm7 = vmmov %vm11814_vm0 }
 0xe6f   : > { %v11485_v57 = vpop.permute.xlu1 %7957  ;;  %9075 = vmatmul.mubr.msk.f32.vlgmr.msra.gmra.mrb[8].mxu0 %vm11907_vm9, %v11325_v2  ;;  %9373 = vmatprep.subr.bf16.mxu0 %v9372_v15  ;;  %vm11922_vm9 = vmmov %vm11814_vm0 }
 0xe70   : > { %9457 = vmatprep.subr.bf16.mxu1 %v9456_v10  ;;  %9077 = vmatprep.mubr.msk.f32.mxu0 %vm11814_vm0, %v11333_v38 }
 0xe71   : > { %9288 = vmatmul.mubr.msk.f32.gmra.mrb[6].mxu1 %vm11908_vm13, %v11309_v24  ;;  %9375 = vmatpush3.bf16.msra.mxu0 %v9372_v15  ;;  %vm11923_vm13 = vmmov %vm11814_vm0 }
 0xe72   : > { %9459 = vmatpush3.bf16.msra.mxu1 %v9456_v10  ;;  %9294 = vmatprep.mubr.msk.f32.mxu1 %vm11909_vm4, %v11327_v3  ;;  %v9930_v5 = vpop.permute.xlu0 %9929  ;;  %vm11924_vm4 = vmmov %vm11814_vm0 }
 0xe73   : > { %v9932_v25 = vunpack.i.h.bf16 %v9930_v5  ;;  %v9931_v33 = vunpack.i.l.bf16 %v9930_v5  ;;  %v9925_v19 = vpop.permute.xlu1 %9924  ;;  %9078 = vmatmul.mubr.msk.f32.gmra.mrb[10].mxu0 %vm11910_vm8, %v11341_v42  ;;  %vm11925_vm8 = vmmov %vm11814_vm0 }
 0xe74   : > { %v9927_v2 = vunpack.i.h.bf16 %v9925_v19  ;;  %v9926_v41 = vunpack.i.l.bf16 %v9925_v19  ;;  %9084 = vmatprep.mubr.msk.f32.mxu0 %vm11911_vm1, %v11353_v53  ;;  %vm11926_vm1 = vmmov %vm11814_vm0 }
 0xe75   : > { %v9376_v38 = vpack.c.bf16 %v9932_v25, %v9931_v33  ;;  %9295 = vmatmul.mubr.msk.f32.vlgmr.msra.gmra.mrb[4].mxu1 %vm11912_vm14, %v11335_v26  ;;  %vm11927_vm14 = vmmov %vm11814_vm0 }
 0xe76   : > { %v9460_v24 = vpack.c.bf16 %v9927_v2, %v9926_v41  ;;  %9297 = vmatprep.mubr.msk.f32.mxu1 %vm11913_vm15, %v11343_v11  ;;  %v11503_v3 = vpop.permute.xlu0 %8066  ;;  %vm11928_vm15 = vmmov %vm11814_vm0 }
 0xe77   : > { %v8065_v29 = vpop.permute.xlu1 %8064  ;;  %9085 = vmatmul.mubr.msk.f32.vlgmr.msra.gmra.mrb[8].mxu0 %vm11914_vm11, %v11367_v1  ;;  %9377 = vmatprep.subr.bf16.mxu0 %v9376_v38  ;;  %vm11929_vm11 = vmmov %vm11814_vm0 }
 0xe78   : > { %9461 = vmatprep.subr.bf16.mxu1 %v9460_v24  ;;  %9087 = vmatprep.mubr.msk.f32.mxu0 %vm11915_vm2, %v11373_v47  ;;  %vm11930_vm2 = vmmov %vm11814_vm0 }
 0xe79   : > { %9298 = vmatmul.mubr.msk.f32.gmra.mrb[6].mxu1 %vm11916_vm10, %v11355_v14  ;;  %9379 = vmatpush3.bf16.msra.mxu0 %v9376_v38  ;;  %vm11931_vm10 = vmmov %vm11814_vm0 }
 0xe7a   : > { %9463 = vmatpush3.bf16.msra.mxu1 %v9460_v24  ;;  %9304 = vmatprep.mubr.msk.f32.mxu1 %vm11917_vm12, %v11361_v50  ;;  %v9940_v26 = vpop.permute.xlu0 %9939  ;;  %vm11932_vm12 = vmmov %vm11814_vm0 }
 0xe7b   : > { %v9942_v42 = vunpack.i.h.bf16 %v9940_v26  ;;  %v9941_v11 = vunpack.i.l.bf16 %v9940_v26  ;;  %v9935_v53 = vpop.permute.xlu1 %9934  ;;  %9088 = vmatmul.mubr.msk.f32.gmra.mrb[10].mxu0 %vm11918_vm3, %v11382_v49  ;;  %vm11933_vm3 = vmmov %vm11814_vm0 }
 0xe7c   : > { %v9937_v1 = vunpack.i.h.bf16 %v9935_v53  ;;  %v9936_v45 = vunpack.i.l.bf16 %v9935_v53  ;;  %9094 = vmatprep.mubr.msk.f32.mxu0 %vm11919_vm5, %v11403_v52  ;;  %vm11934_vm5 = vmmov %vm11814_vm0 }
 0xe7d   : > { %v9380_v47 = vpack.c.bf16 %v9942_v42, %v9941_v11  ;;  %9305 = vmatmul.mubr.msk.f32.vlgmr.msra.gmra.mrb[4].mxu1 %vm11920_vm6, %v11375_v37  ;;  %vm11935_vm6 = vmmov %vm11814_vm0 }
 0xe7e   : > { %v9464_v14 = vpack.c.bf16 %v9937_v1, %v9936_v45  ;;  %9307 = vmatprep.mubr.msk.f32.mxu1 %vm11921_vm7, %v11384_v23  ;;  %v5732_v50 = vpop.permute.xlu0 %5731  ;;  %vm11936_vm7 = vmmov %vm11814_vm0 }
 0xe7f   : > { %v8069_v13 = vpop.permute.xlu1 %8068  ;;  %9095 = vmatmul.mubr.msk.f32.vlgmr.msra.gmra.mrb[8].mxu0 %vm11922_vm9, %v11423_v34  ;;  %9381 = vmatprep.subr.bf16.mxu0 %v9380_v47  ;;  %vm11937_vm9 = vmmov %vm11814_vm0 }
 0xe80   : > { %9465 = vmatprep.subr.bf16.mxu1 %v9464_v14  ;;  %9097 = vmatprep.mubr.msk.f32.mxu0 %vm11814_vm0, %v11441_v35 }
 0xe81   : > { %9308 = vmatmul.mubr.msk.f32.gmra.mrb[6].mxu1 %vm11923_vm13, %v11405_v40  ;;  %9383 = vmatpush3.bf16.msra.mxu0 %v9380_v47  ;;  %vm11938_vm13 = vmmov %vm11814_vm0 }
 0xe82   : > { %9467 = vmatpush3.bf16.msra.mxu1 %v9464_v14  ;;  %9314 = vmatprep.mubr.msk.f32.mxu1 %vm11924_vm4, %v11425_v22  ;;  %v9950_v37 = vpop.permute.xlu0 %9949  ;;  %v9976_v22 = vld [vmem:[%s11668_s4 + $0x28] sm:$0xff]  ;;  %vm11939_vm4 = vmmov %vm11814_vm0 }
 0xe83   : > { %v9952_v49 = vunpack.i.h.bf16 %v9950_v37  ;;  %v9951_v23 = vunpack.i.l.bf16 %v9950_v37  ;;  %v9945_v52 = vpop.permute.xlu1 %9944  ;;  %9098 = vmatmul.mubr.msk.f32.gmra.mrb[10].mxu0 %vm11925_vm8, %v11463_v55  ;;  %vm11940_vm8 = vmmov %vm11814_vm0 }
 0xe84   : > { %v9947_v59 = vunpack.i.h.bf16 %v9945_v52  ;;  %v9946_v63 = vunpack.i.l.bf16 %v9945_v52  ;;  %9104 = vmatprep.mubr.msk.f32.mxu0 %vm11926_vm1, %v9975_v30  ;;  %vm11941_vm1 = vmmov %vm11814_vm0 }
 0xe85   : > { %v9384_v40 = vpack.c.bf16 %v9952_v49, %v9951_v23  ;;  %9315 = vmatmul.mubr.msk.f32.vlgmr.msra.gmra.mrb[4].mxu1 %vm11927_vm14, %v11445_v0  ;;  %vm11942_vm14 = vmmov %vm11814_vm0 }
 0xe86   : > { %v9468_v32 = vpack.c.bf16 %v9947_v59, %v9946_v63  ;;  %9317 = vmatprep.mubr.msk.f32.mxu1 %vm11928_vm15, %v11465_v21  ;;  %v5734_v48 = vpop.permute.xlu0 %5733  ;;  %vm11943_vm15 = vmmov %vm11814_vm0 }
 0xe87   : > { %v8174_v34 = vpop.permute.xlu1 %8173  ;;  %9105 = vmatmul.mubr.msk.f32.vlgmr.msra.gmra.mrb[8].mxu0 %vm11929_vm11, %v9976_v22  ;;  %9385 = vmatprep.subr.bf16.mxu0 %v9384_v40  ;;  %vm8284_vm11 = vcmask 515072  }
 0xe88   : > { %9469 = vmatprep.subr.bf16.mxu1 %v9468_v32  ;;  %9387 = vmatpush3.bf16.msra.mxu0 %v9384_v40 }
 0xe89   : > { %9318 = vmatmul.mubr.msk.f32.gmra.mrb[6].mxu1 %vm11930_vm2, %v11485_v57  ;;  %9107 = vmatprep.mubr.msk.f32.mxu0 %vm11931_vm10, %v9977_v16  ;;  %vm8293_vm2 = vcmask 23552   ;;  %vm8318_vm10 = vcmask 48152  }
 0xe8a   : > { %9471 = vmatpush3.bf16.msra.mxu1 %v9468_v32  ;;  %9324 = vmatprep.mubr.msk.f32.mxu1 %vm11932_vm12, %v11483_v12  ;;  %v5736_v28 = vpop.permute.xlu0 %5735  ;;  %vm8343_vm12 = vcmask 72752  }
 0xe8b   : > { %v9955_v18 = vpop.permute.xlu1 %9954  ;;  %9108 = vmatmul.mubr.msk.f32.gmra.mrb[10].mxu0 %vm11933_vm3, %v11301_v27  ;;  %vm8368_vm3 = vcmask 97352  }
 0xe8c   : > { %v9957_v54 = vunpack.i.h.bf16 %v9955_v18  ;;  %v9956_v56 = vunpack.i.l.bf16 %v9955_v18  ;;  %9114 = vmatprep.mubr.msk.f32.mxu0 %vm11934_vm5, %v5732_v50  ;;  %vm8393_vm5 = vcmask 121952  }
 0xe8d   : > { %9325 = vmatmul.mubr.msk.f32.vlgmr.msra.gmra.mrb[4].mxu1 %vm11935_vm6, %v8065_v29  ;;  %vm8418_vm6 = vcmask 146552  }
 0xe8e   : > { %v9472_v61 = vpack.c.bf16 %v9957_v54, %v9956_v56  ;;  %9327 = vmatprep.mubr.msk.f32.mxu1 %vm11936_vm7, %v11503_v3  ;;  %v5738_v17 = vpop.permute.xlu0 %5737  ;;  %vm8435_vm7 = vcmask 146432  }
 0xe8f   : > { %v8176_v51 = vpop.permute.xlu1 %8175  ;;  %9115 = vmatmul.mubr.msk.f32.vlgmr.msra.gmra.mrb[8].mxu0 %vm11937_vm9, %v5734_v48 }
 0xe90   : > { %9473 = vmatprep.subr.bf16.mxu1 %v9472_v61  ;;  %9117 = vmatprep.mubr.msk.f32.mxu0 %vm11814_vm0, %v5736_v28 }
 0xe91   : > { %9328 = vmatmul.mubr.msk.f32.gmra.mrb[6].mxu1 %vm11938_vm13, %v8069_v13 }
 0xe92   : > { %9475 = vmatpush3.bf16.msra.mxu1 %v9472_v61  ;;  %9334 = vmatprep.mubr.msk.f32.mxu1 %vm11939_vm4, %v8174_v34 }
 0xe93   : > { %v8178_v27 = vpop.permute.xlu1 %8177  ;;  %9118 = vmatmul.mubr.msk.f32.gmra.mrb[10].mxu0 %vm11940_vm8, %v5738_v17  ;;  %vm8543_vm8 = vcmask 0  }
 0xe95   : > { %9335 = vmatmul.mubr.msk.f32.vlgmr.msra.gmra.mrb[4].mxu1 %vm11941_vm1, %v8176_v51 }
 0xe96   : > { %9337 = vmatprep.mubr.msk.f32.mxu1 %vm11942_vm14, %v8178_v27 }
 0xe97   : > { %v8180_v44 = vpop.permute.xlu1 %8179 }
 0xe99   : > { %9338 = vmatmul.mubr.msk.f32.gmra.mrb[6].mxu1 %vm11943_vm15, %v8180_v44 }
 0xf62   : > { %v9116_v35 = vpop.f32.mrb[8].mxu0 }
 0xf63   : > { %v5819_v0 = vpop.f32.mrb[9].mxu0 }
 0xf66   : > { %v9119_v39 = vpop.f32.mrb[10].mxu0 }
 0xf67   : > { %v5829_v43 = vpop.f32.mrb[11].mxu0 }
 0xf68   : > { %v9336_v31 = vpop.f32.mrb[4].mxu1 }
 0xf69   : > { %v9476_v58 = vadd.f32 %v9336_v31, %v9116_v35  ;;  %v8261_v62 = vpop.f32.mrb[5].mxu1 }
 0xf6a   : > { %v9477_v36 = vadd.f32 %v8261_v62, %v5819_v0 }
 0xf6b   : > { %8286 = vst.msk [vmem:[#allocation3 + $0x20] sm:$0xff] %vm8284_vm11, %v9476_v58 }
 0xf6c   : > { %v9339_v60 = vpop.f32.mrb[6].mxu1  ;;  %8285 = vst.msk [vmem:[#allocation3] sm:$0xff] %vm8284_vm11, %v9477_v36 }
 0xf6d   : > { %v9478_v46 = vadd.f32 %v9339_v60, %v9119_v39  ;;  %v8271_v55 = vpop.f32.mrb[7].mxu1 }
 0xf6e   : > { %v9479_v21 = vadd.f32 %v8271_v55, %v5829_v43 }
 0xf6f   : > { %8288 = vst.msk [vmem:[#allocation3 + $0x60] sm:$0xff] %vm8284_vm11, %v9478_v46 }
 0xf70   : > { %8287 = vst.msk [vmem:[#allocation3 + $0x40] sm:$0xff] %vm8284_vm11, %v9479_v21 }
 0xf72   : > { %v8349_v4 = vld [vmem:[#allocation3 + $0x20] sm:$0xff] }
 0xf73   : > { %8358 = vrot.lane.b32.xlu0 %v8349_v4, %s10058_s28  ;;  %8308 = vrot.lane.b32.xlu1 %v8349_v4, %s11818_s23  ;;  %v8298_v7 = vld [vmem:[#allocation3] sm:$0xff]  ;;  %8295 = vst.msk [vmem:[#allocation4 + $0x20] sm:$0xff] %vm8293_vm2, %v8349_v4 }
 0xf74   : > { %8294 = vst.msk [vmem:[#allocation4] sm:$0xff] %vm8293_vm2, %v8298_v7 }
 0xf76   : > { %v8301_v20 = vld [vmem:[#allocation3 + $0x60] sm:$0xff] }
 0xf77   : > { %8333 = vrot.lane.b32.xlu1 %v8349_v4, %s11766_s16  ;;  %8306 = vrot.lane.b32.xlu0 %v8298_v7, %s11818_s23  ;;  %v8325_v8 = vld [vmem:[#allocation3 + $0x40] sm:$0xff]  ;;  %8297 = vst.msk [vmem:[#allocation4 + $0x60] sm:$0xff] %vm8293_vm2, %v8301_v20 }
 0xf78   : > { %8296 = vst.msk [vmem:[#allocation4 + $0x40] sm:$0xff] %vm8293_vm2, %v8325_v8 }
 0xf7b   : > { %8383 = vrot.lane.b32.xlu1 %v8349_v4, %s11803_s9  ;;  %8331 = vrot.lane.b32.xlu0 %v8298_v7, %s11766_s16 }
 0xf7f   : > { %8408 = vrot.lane.b32.xlu1 %v8349_v4, %s10066_s26  ;;  %8381 = vrot.lane.b32.xlu0 %v8298_v7, %s11803_s9 }
 0xf83   : > { %8356 = vrot.lane.b32.xlu1 %v8298_v7, %s10058_s28  ;;  %8406 = vrot.lane.b32.xlu0 %v8298_v7, %s10066_s26 }
 0xf87   : > { %8312 = vrot.lane.b32.xlu0 %v8301_v20, %s11818_s23  ;;  %8335 = vrot.lane.b32.xlu1 %v8325_v8, %s11766_s16 }
 0xf8b   : > { %8337 = vrot.lane.b32.xlu0 %v8301_v20, %s11766_s16  ;;  %8360 = vrot.lane.b32.xlu1 %v8325_v8, %s10058_s28 }
 0xf8f   : > { %8385 = vrot.lane.b32.xlu1 %v8325_v8, %s11803_s9  ;;  %8310 = vrot.lane.b32.xlu0 %v8325_v8, %s11818_s23 }
 0xf93   : > { %8410 = vrot.lane.b32.xlu1 %v8325_v8, %s10066_s26  ;;  %8362 = vrot.lane.b32.xlu0 %v8301_v20, %s10058_s28  ;;  %v8427_v8 = vld [vmem:[%s11676_s12] sm:$0xff] }
 0xf97   : > { %8412 = vrot.lane.b32.xlu1 %v8301_v20, %s10066_s26  ;;  %8387 = vrot.lane.b32.xlu0 %v8301_v20, %s11803_s9 }
 0xfe5   : > { %v8359_v9 = vpop.permute.xlu0 %8358  ;;  %v8309_v6 = vpop.permute.xlu1 %8308 }
 0xfe6   : > { %8320 = vst.msk [vmem:[#allocation4 + $0x20] sm:$0xff] %vm8318_vm10, %v8309_v6  ;;  %v8429_v6 = vld [vmem:[%s11676_s12 + $0x10] sm:$0xff] }
 0xfe9   : > { %v8334_v15 = vpop.permute.xlu1 %8333  ;;  %v8307_v10 = vpop.permute.xlu0 %8306 }
 0xfea   : > { %8345 = vst.msk [vmem:[#allocation4 + $0x20] sm:$0xff] %vm8343_vm12, %v8334_v15  ;;  %v8430_v15 = vld [vmem:[%s11676_s12 + $0x18] sm:$0xff] }
 0xfeb   : > { %8319 = vst.msk [vmem:[#allocation4] sm:$0xff] %vm8318_vm10, %v8307_v10 }
 0xfec   : > { %8370 = vst.msk [vmem:[#allocation4 + $0x20] sm:$0xff] %vm8368_vm3, %v8359_v9  ;;  %v8428_v9 = vld [vmem:[%s11676_s12 + $0x8] sm:$0xff] }
 0xfed   : > { %v8384_v12 = vpop.permute.xlu1 %8383  ;;  %v8332_v57 = vpop.permute.xlu0 %8331 }
 0xfee   : > { %8395 = vst.msk [vmem:[#allocation4 + $0x20] sm:$0xff] %vm8393_vm5, %v8384_v12  ;;  %v8431_v12 = vld [vmem:[%s11677_s13] sm:$0xff] }
 0xfef   : > { %8344 = vst.msk [vmem:[#allocation4] sm:$0xff] %vm8343_vm12, %v8332_v57 }
 0xff1   : > { %v8409_v5 = vpop.permute.xlu1 %8408  ;;  %v8382_v25 = vpop.permute.xlu0 %8381 }
 0xff2   : > { %8420 = vst.msk [vmem:[#allocation4 + $0x20] sm:$0xff] %vm8418_vm6, %v8409_v5 }
 0xff5   : > { %v8357_v33 = vpop.permute.xlu1 %8356  ;;  %v8407_v19 = vpop.permute.xlu0 %8406 }
 0xff6   : > { %8369 = vst.msk [vmem:[#allocation4] sm:$0xff] %vm8368_vm3, %v8357_v33 }
 0xff7   : > { %8394 = vst.msk [vmem:[#allocation4] sm:$0xff] %vm8393_vm5, %v8382_v25 }
 0xff8   : > { %8419 = vst.msk [vmem:[#allocation4] sm:$0xff] %vm8418_vm6, %v8407_v19  ;;  %v8432_v19 = vld [vmem:[%s11677_s13 + $0x8] sm:$0xff] }
 0xff9   : > { %v8313_v2 = vpop.permute.xlu0 %8312  ;;  %v8336_v41 = vpop.permute.xlu1 %8335  ;;  %v8424_v45 = vld [vmem:[#allocation4 + $0x20] sm:$0xff] }
 0xffa   : > { %8322 = vst.msk [vmem:[#allocation4 + $0x60] sm:$0xff] %vm8318_vm10, %v8313_v2  ;;  %v8437_v50 = vsel %vm8435_vm7, %v8424_v45, 0.0  ;;  %v8433_v2 = vld [vmem:[%s11677_s13 + $0x10] sm:$0xff] }
 0xffd   : > { %v8338_v38 = vpop.permute.xlu0 %8337  ;;  %v8361_v24 = vpop.permute.xlu1 %8360 }
 0xffe   : > { %8347 = vst.msk [vmem:[#allocation4 + $0x60] sm:$0xff] %vm8343_vm12, %v8338_v38 }
 0xfff   : > { %v8423_v1 = vld [vmem:[#allocation4] sm:$0xff] }
0x1000   : > { %v8436_v14 = vsel %vm8435_vm7, %v8423_v1, 0.0 }
0x1001   : > { %v8386_v3 = vpop.permute.xlu1 %8385  ;;  %v8311_v29 = vpop.permute.xlu0 %8310  ;;  %v8438_v37 = vadd.f32 %v8437_v50, %v8436_v14 }
0x1002   : > { %8321 = vst.msk [vmem:[#allocation4 + $0x40] sm:$0xff] %vm8318_vm10, %v8311_v29 }
0x1003   : > { %8346 = vst.msk [vmem:[#allocation4 + $0x40] sm:$0xff] %vm8343_vm12, %v8336_v41  ;;  %v8434_v41 = vld [vmem:[%s11677_s13 + $0x18] sm:$0xff] }
0x1004   : > { %8371 = vst.msk [vmem:[#allocation4 + $0x40] sm:$0xff] %vm8368_vm3, %v8361_v24 }
0x1005   : > { %v8411_v26 = vpop.permute.xlu1 %8410  ;;  %8396 = vst.msk [vmem:[#allocation4 + $0x40] sm:$0xff] %vm8393_vm5, %v8386_v3  ;;  %v8363_v42 = vpop.permute.xlu0 %8362 }
0x1006   : > { %8421 = vst.msk [vmem:[#allocation4 + $0x40] sm:$0xff] %vm8418_vm6, %v8411_v26 }
0x1007   : > { %8372 = vst.msk [vmem:[#allocation4 + $0x60] sm:$0xff] %vm8368_vm3, %v8363_v42 }
0x1009   : > { %v8413_v11 = vpop.permute.xlu1 %8412  ;;  %v8388_v53 = vpop.permute.xlu0 %8387 }
0x100a   : > { %8397 = vst.msk [vmem:[#allocation4 + $0x60] sm:$0xff] %vm8393_vm5, %v8388_v53 }
0x100b   : > { %8422 = vst.msk [vmem:[#allocation4 + $0x60] sm:$0xff] %vm8418_vm6, %v8413_v11 }
0x100d   : > { %v8425_v47 = vld [vmem:[#allocation4 + $0x40] sm:$0xff] }
0x100e   : > { %v8439_v13 = vsel %vm8435_vm7, %v8425_v47, 0.0 }
0x100f   : > { %v8440_v23 = vadd.f32 %v8439_v13, %v8438_v37 }
0x1012   : > { %v8426_v49 = vld [vmem:[#allocation4 + $0x60] sm:$0xff] }
0x1013   : > { %v8441_v52 = vsel %vm8435_vm7, %v8426_v49, 0.0 }
0x1014   : > { %v8442_v59 = vadd.f32 %v8441_v52, %v8440_v23  ;;  %v8515_v52 = vld [vmem:[%s11669_s5 + $0x18] sm:$0xff] }
0x1016   : > { %8443 = vadd.xlane.f32.xlu0 %v8442_v59 }
0x10a3   : > { %v8444_v63 = vpop.xlane.xlu0 %8443 }
0x10a4   : > { %v8445_v30 = vrot.slane %v8444_v63, 4 }
0x10a6   : > { %v8446_v40 = vadd.f32 %v8445_v30, %v8444_v63 }
0x10a8   : > { %v8447_v32 = vrot.slane %v8446_v40, 2 }
0x10aa   : > { %v8448_v48 = vadd.f32 %v8447_v32, %v8446_v40 }
0x10ac   : > { %v8449_v34 = vrot.slane %v8448_v48, 1 }
0x10ae   : > { %v8450_v22 = vadd.f32 %v8449_v34, %v8448_v48 }
0x10b0   : > { %9706 = vpush %v8450_v22 }
0x10e1   : > { %s9707_s16 = spop %9706 }
0x10e2   : > { %s8452_s28 = smul.f32 0.0017361111, %s9707_s16 }
0x10e4   : > { %v8453_v16 = vstv %s8452_s28 }
0x10e5   : > { %v8454_v28 = vsub.f32 %v8423_v1, %v8453_v16  ;;  %v8455_v18 = vsub.f32 %v8424_v45, %v8453_v16  ;;  %v8456_v54 = vsub.f32 %v8425_v47, %v8453_v16  ;;  %v8457_v56 = vsub.f32 %v8426_v49, %v8453_v16  ;;  %v8512_v1 = vld [vmem:[%s11669_s5] sm:$0xff]  ;;  %v8513_v45 = vld [vmem:[%s11669_s5 + $0x8] sm:$0xff]  ;;  %v8514_v47 = vld [vmem:[%s11669_s5 + $0x10] sm:$0xff] }
0x10e7   : > { %v8458_v61 = vmul.f32 %v8454_v28, %v8454_v28  ;;  %v8459_v51 = vmul.f32 %v8455_v18, %v8455_v18  ;;  %v8460_v17 = vmul.f32 %v8456_v54, %v8456_v54  ;;  %v8461_v27 = vmul.f32 %v8457_v56, %v8457_v56 }
0x10e9   : > { %v8462_v44 = vsel %vm8435_vm7, %v8458_v61, 0.0  ;;  %v8463_v35 = vsel %vm8435_vm7, %v8459_v51, 0.0  ;;  %v8465_v39 = vsel %vm8435_vm7, %v8460_v17, 0.0  ;;  %v8467_v31 = vsel %vm8435_vm7, %v8461_v27, 0.0 }
0x10ea   : > { %v8464_v0 = vadd.f32 %v8463_v35, %v8462_v44 }
0x10ec   : > { %v8466_v43 = vadd.f32 %v8465_v39, %v8464_v0 }
0x10ee   : > { %v8468_v58 = vadd.f32 %v8467_v31, %v8466_v43 }
0x10f0   : > { %8469 = vadd.xlane.f32.xlu1 %v8468_v58 }
0x117d   : > { %v8470_v62 = vpop.xlane.xlu1 %8469 }
0x117e   : > { %v8471_v36 = vrot.slane %v8470_v62, 4 }
0x1180   : > { %v8472_v60 = vadd.f32 %v8471_v36, %v8470_v62 }
0x1182   : > { %v8473_v46 = vrot.slane %v8472_v60, 2 }
0x1184   : > { %v8474_v55 = vadd.f32 %v8473_v46, %v8472_v60 }
0x1186   : > { %v8475_v21 = vrot.slane %v8474_v55, 1 }
0x1188   : > { %v8476_v4 = vadd.f32 %v8475_v21, %v8474_v55 }
0x118a   : > { %9708 = vpush %v8476_v4 }
0x11bb   : > { %s9709_s0 = spop %9708 }
0x11bc   : > { %s8478_s24 = smul.f32 0.0017361111, %s9709_s0 }
0x11be   : > { %s8479_s21 = sadd.f32 1e-05, %s8478_s24 }
0x11c0   : > { %v8480_v7 = vstv %s8479_s21 }
0x11c1   : > { %9968 = vrsqrt.f32 %v8480_v7 }
0x11cb   : > { %v9969_v20 = vpop.eup %9968 }
0x11cc   : > { %9710 = vpush %v9969_v20 }
0x11fd   : > { %s9711_s14 = spop %9710 }
0x11fe   : > { %v8483_v10 = vstv %s9711_s14 }
0x11ff   : > { %v8484_v57 = vmul.f32 %v8483_v10, %v8454_v28  ;;  %v8485_v5 = vmul.f32 %v8483_v10, %v8455_v18  ;;  %v8486_v25 = vmul.f32 %v8483_v10, %v8456_v54  ;;  %v8487_v33 = vmul.f32 %v8483_v10, %v8457_v56 }
0x1201   : > { %v8488_v38 = vmul.f32 %v8484_v57, %v8427_v8  ;;  %v8489_v24 = vmul.f32 %v8485_v5, %v8428_v9  ;;  %v8490_v3 = vmul.f32 %v8486_v25, %v8429_v6  ;;  %v8491_v29 = vmul.f32 %v8487_v33, %v8430_v15 }
0x1203   : > { %v8492_v26 = vadd.f32 %v8488_v38, %v8431_v12  ;;  %v8493_v42 = vadd.f32 %v8489_v24, %v8432_v19  ;;  %v8494_v11 = vadd.f32 %v8490_v3, %v8433_v2  ;;  %v8495_v53 = vadd.f32 %v8491_v29, %v8434_v41 }
0x1205   : > { %vm8496_vm9 = vcmp.gt.f32.partialorder %v8492_v26, 0.0  ;;  %vm8497_vm0 = vcmp.gt.f32.partialorder %v8493_v42, 0.0  ;;  %v8500_v14 = vmul.f32 0.2, %v8492_v26  ;;  %v8501_v50 = vmul.f32 0.2, %v8493_v42 }
0x1206   : > { %v8502_v13 = vmul.f32 0.2, %v8494_v11  ;;  %vm8498_vm13 = vcmp.gt.f32.partialorder %v8494_v11, 0.0  ;;  %vm8499_vm4 = vcmp.gt.f32.partialorder %v8495_v53, 0.0  ;;  %v8503_v37 = vmul.f32 0.2, %v8495_v53 }
0x1207   : > { %v8504_v49 = vsel %vm8496_vm9, %v8492_v26, %v8500_v14  ;;  %v8505_v23 = vsel %vm8497_vm0, %v8493_v42, %v8501_v50 }
0x1208   : > { %v8506_v59 = vsel %vm8498_vm13, %v8494_v11, %v8502_v13  ;;  %v8507_v63 = vsel %vm8499_vm4, %v8495_v53, %v8503_v37  ;;  %8509 = vst.msk [vmem:[#allocation4 + $0x20] sm:$0xff] %vm8435_vm7, %v8505_v23  ;;  %v8516_v30 = vmul.f32 %v8512_v1, %v8504_v49  ;;  %v8517_v40 = vmul.f32 %v8513_v45, %v8505_v23 }
0x1209   : > { %8508 = vst.msk [vmem:[#allocation4] sm:$0xff] %vm8435_vm7, %v8504_v49  ;;  %8510 = vst.msk [vmem:[#allocation4 + $0x40] sm:$0xff] %vm8435_vm7, %v8506_v59  ;;  %v8518_v32 = vmul.f32 %v8514_v47, %v8506_v59  ;;  %v8519_v48 = vmul.f32 %v8515_v52, %v8507_v63 }
0x120a   : > { %8511 = vst.msk [vmem:[#allocation4 + $0x60] sm:$0xff] %vm8435_vm7, %v8507_v63  ;;  %v8520_v34 = vsel %vm8435_vm7, %v8516_v30, 0.0  ;;  %v8521_v22 = vsel %vm8435_vm7, %v8517_v40, 0.0 }
0x120b   : > { %v8522_v16 = vadd.f32 %v8521_v22, %v8520_v34  ;;  %v8523_v28 = vsel %vm8435_vm7, %v8518_v32, 0.0  ;;  %v8525_v54 = vsel %vm8435_vm7, %v8519_v48, 0.0 }
0x120d   : > { %v8524_v18 = vadd.f32 %v8523_v28, %v8522_v16 }
0x120f   : > { %v8526_v56 = vadd.f32 %v8525_v54, %v8524_v18 }
0x1211   : > { %8527 = vadd.xlane.f32.xlu0 %v8526_v56 }
0x129e   : > { %v8528_v61 = vpop.xlane.xlu0 %8527 }
0x129f   : > { %v8529_v51 = vrot.slane %v8528_v61, 4 }
0x12a1   : > { %v8530_v17 = vadd.f32 %v8529_v51, %v8528_v61 }
0x12a3   : > { %v8531_v27 = vrot.slane %v8530_v17, 2 }
0x12a5   : > { %v8532_v44 = vadd.f32 %v8531_v27, %v8530_v17 }
0x12a7   : > { %v8533_v35 = vrot.slane %v8532_v44, 1 }
0x12a9   : > { %v8534_v0 = vadd.f32 %v8533_v35, %v8532_v44 }
0x12ab   : > { %9712 = vpush %v8534_v0 }
0x12dc   : > { %s9713_s1 = spop %9712 }
0x12dd   : > { %v8536_v39 = vstv %s9713_s1 }
0x12de   : > { %v8537_v43 = vsub.f32 0.0, %v8536_v39 }
0x12e0   : > { %v8538_v31 = vmul.f32 1.442695, %v8537_v43 }
0x12e2   : > { %9970 = vpow2.f32 %v8538_v31 }
0x12ec   : > { %v9971_v58 = vpop.eup %9970 }
0x12ed   : > { %v8540_v62 = vadd.f32 1.0, %v9971_v58 }
0x12ef   : > { %9972 = vrcp.f32 %v8540_v62 }
0x12f9   : > { %v9973_v36 = vpop.eup %9972 }
0x12fa   : > { %8544 = vst.msk [vmem:[%s463_s3] sm:$0x1] %vm8543_vm8, %v9973_v36 }
0x12fb PF: > { %s11945_s23 = sld [smem:[#allocation5_spill]] }
0x1301   : > { %s24_s29 = sadd.s32 1, %s11945_s23  }
0x1302   : > { %p21_p4 = scmp.ge.s32.totalorder %s24_s29, 4  }
0x1304   :  { %23 = sbr.rel (!%p21_p4) target bundleno = 10 (0xa), region = 106 }

</bundles_post_ra>
